<compile_context>
chip_gen: v7x
topology: tpu7x:2x2x1
jax: 0.10.0
libtpu: 0.0.40
codegen_flags: <defaults>
</compile_context>

<pallas_src>
import functools

import jax
import jax.numpy as jnp
from jax.experimental import pallas as pl
from jax.experimental.pallas import tpu as pltpu

NUM_CLASSES = 10


# ----------------------------- fused kernel ----------------------------------

def _fused_kernel(x_ref, wb1_ref, cb1_ref, wb2_ref, cb2_ref,
                  wf1_ref, fb1_ref, wf2_ref, fb2_ref, o_ref,
                  *, H, W, KH, C1, C2):
    """Whole NormalModel forward for one image, entirely in VMEM/vregs.

    Conv lane layouts: conv1 output lane = w*C1 + c, conv2 output lane = w*C2 + c.
    After each 2x2 maxpool the data stays "uncompacted": valid results live at even
    rows / even lane blocks; the garbage positions are multiplied by zero rows that
    were baked into the next stage's packed weights.
    """
    f32, bf16 = jnp.float32, jnp.bfloat16
    PH = KH // 2
    L1 = W * C1                  # conv1 output lane width
    L2 = (W // 2) * C2           # conv2 output lane width

    # ---- conv1 (5x5, pad 2) + bias + ReLU: ONE banded matmul -----------------
    xi = x_ref[0].astype(f32)                                        # (H, W)
    zr = jnp.zeros((PH, W), f32)
    xp = jnp.concatenate([zr, xi, zr], axis=0)                       # (H+4, W)
    lhs1 = jnp.concatenate([xp[kh:kh + H, :] for kh in range(KH)],
                           axis=1).astype(bf16)                      # (H, KH*W)
    acc1 = jnp.dot(lhs1, wb1_ref[...], preferred_element_type=f32)   # (H, L1)
    act1 = jnp.maximum(acc1 + cb1_ref[...], 0.0)

    # ---- maxpool 2x2 #1 (valid at even rows / even w lane-blocks) ------------
    dn1 = jnp.concatenate([act1[1:, :], jnp.zeros((1, L1), f32)], axis=0)
    hm1 = jnp.maximum(act1, dn1)
    rt1 = jnp.concatenate([hm1[:, C1:], hm1[:, :C1]], axis=1)        # lane shift by C1
    p1 = jnp.maximum(hm1, rt1)                                       # (H, L1)

    # ---- conv2 (5x5, pad 2) + bias + ReLU: 5 banded matmuls ------------------
    zr2 = jnp.zeros((2 * PH, L1), f32)
    x2 = jnp.concatenate([zr2, p1, zr2], axis=0)                     # (H+8, L1)
    acc2 = jnp.dot(x2[0:H, :].astype(bf16), wb2_ref[0],
                   preferred_element_type=f32)                       # (H, L2)
    for kh in range(1, KH):
        acc2 = acc2 + jnp.dot(x2[2 * kh:2 * kh + H, :].astype(bf16),
                              wb2_ref[kh], preferred_element_type=f32)
    act2 = jnp.maximum(acc2 + cb2_ref[...], 0.0)

    # ---- maxpool 2x2 #2 (valid at rows 0,4,8,... / even w lane-blocks) -------
    dn2 = jnp.concatenate([act2[2:, :], jnp.zeros((2, L2), f32)], axis=0)
    hm2 = jnp.maximum(act2, dn2)
    rt2 = jnp.concatenate([hm2[:, C2:], hm2[:, :C2]], axis=1)
    p2 = jnp.maximum(hm2, rt2)                                       # (H, L2)

    # ---- classifier: Flatten (NCHW order baked into wf1) -> FC1 -> ReLU -> FC2
    flat = jnp.concatenate([p2[4 * q:4 * q + 1, :] for q in range(H // 4)],
                           axis=1).astype(bf16)                      # (1, (H//4)*L2)
    h1 = jnp.dot(flat, wf1_ref[...], preferred_element_type=f32)
    h1 = jnp.maximum(h1 + fb1_ref[...], 0.0)                         # (1, 128)
    logits = jnp.dot(h1.astype(bf16), wf2_ref[...],
                     preferred_element_type=f32) + fb2_ref[...]      # (1, 128)
    o_ref[0] = logits[:, :o_ref.shape[-1]]


# ----------------------------- wrapper ----------------------------------------

def normal_model_forward(packed, x_nchw):
    N, Cin, H, W = x_nchw.shape
    assert Cin == 1, "NormalModel's first conv is Conv2d(1, 32, ...)"
    C1 = packed["cb1"].shape[1] // W
    C2 = packed["cb2"].shape[1] // (W // 2)
    KH = packed["wb1"].shape[0] // W
    x = x_nchw.reshape(N, H, W)         # NCHW -> (N,H,W): metadata-only (Cin == 1)

    kernel = functools.partial(_fused_kernel, H=H, W=W, KH=KH, C1=C1, C2=C2)
    out = pl.pallas_call(
        kernel,
        out_shape=jax.ShapeDtypeStruct((N, 1, NUM_CLASSES), jnp.float32),
        grid=(N,),
        in_specs=[
            pl.BlockSpec((1, H, W), lambda n: (n, 0, 0)),
            # Weights / biases: whole-array blocks with constant index maps (fetched once,
            # resident in VMEM).  VMEM footprint is ~3 MiB, far below any generation's limit.
            pl.BlockSpec(packed["wb1"].shape, lambda n: (0, 0)),
            pl.BlockSpec(packed["cb1"].shape, lambda n: (0, 0)),
            pl.BlockSpec(packed["wb2"].shape, lambda n: (0, 0, 0)),
            pl.BlockSpec(packed["cb2"].shape, lambda n: (0, 0)),
            pl.BlockSpec(packed["wf1"].shape, lambda n: (0, 0)),
            pl.BlockSpec(packed["fb1"].shape, lambda n: (0, 0)),
            pl.BlockSpec(packed["wf2"].shape, lambda n: (0, 0)),
            pl.BlockSpec(packed["fb2"].shape, lambda n: (0, 0)),
        ],
        out_specs=pl.BlockSpec((1, 1, NUM_CLASSES), lambda n: (n, 0, 0)),
        compiler_params=pltpu.CompilerParams(
            dimension_semantics=("parallel",),   # batch axis -> both TensorCores on v7x
        ),
    )(x, packed["wb1"], packed["cb1"], packed["wb2"], packed["cb2"],
      packed["wf1"], packed["fb1"], packed["wf2"], packed["fb2"])
    return out.reshape(N, NUM_CLASSES)


# ----------------------------- params -----------------------------------------

def init_params(key, input_shape):
    """Deterministic synthetic parameters in *PyTorch* layouts."""
    cin, h, w = input_shape
    flat = 64 * (h // 4) * (w // 4)
    ks = jax.random.split(key, 8)
    return {
        "w1": jax.random.normal(ks[0], (32, cin, 5, 5), jnp.float32) * 0.1,   # (Cout,Cin,KH,KW)
        "b1": jax.random.normal(ks[1], (32,), jnp.float32) * 0.01,
        "w2": jax.random.normal(ks[2], (64, 32, 5, 5), jnp.float32) * 0.05,
        "b2": jax.random.normal(ks[3], (64,), jnp.float32) * 0.01,
        "wf1": jax.random.normal(ks[4], (128, flat), jnp.float32) * 0.03,     # (out,in)
        "bf1": jax.random.normal(ks[5], (128,), jnp.float32) * 0.01,
        "wf2": jax.random.normal(ks[6], (10, 128), jnp.float32) * 0.08,
        "bf2": jax.random.normal(ks[7], (10,), jnp.float32) * 0.01,
    }


def pack_params(p, input_shape):
    """PyTorch layouts -> banded, MXU/lane-friendly packed layouts."""
    cin, H, W = input_shape
    assert cin == 1 and H % 4 == 0 and W % 4 == 0
    KH, KW = p["w1"].shape[2], p["w1"].shape[3]
    C1 = p["w1"].shape[0]           # 32
    C2 = p["w2"].shape[0]           # 64
    Wo2 = W // 2                    # conv2 spatial width (after pool1)
    Hq, Wq = H // 4, W // 4         # spatial size after pool2
    NF = p["wf1"].shape[0]          # 128

    def band(w, w_in, w_out):
        # w: (Cout,Cin,KH,KW) -> (KH, w_in, Cin, w_out*Cout) banded weights:
        #   band[kh, wp, ci, w*Cout+co] = w[co, ci, kh, wp-w+KW//2] inside the band, else 0.
        cout, ci_, _, _ = w.shape
        wp = jnp.arange(w_in)[:, None]
        wo = jnp.arange(w_out)[None, :]
        kw = wp - wo + KW // 2
        valid = ((kw >= 0) & (kw < KW)).astype(w.dtype)
        g = w[:, :, :, jnp.clip(kw, 0, KW - 1)]                 # (Cout,Cin,KH,w_in,w_out)
        g = g * valid[None, None, None, :, :]
        g = jnp.transpose(g, (2, 3, 1, 4, 0))                   # (KH, wp, ci, w, co)
        return g.reshape(KH, w_in, ci_, w_out * cout)

    # conv1: single matmul, LHS lane index = kh*W + wp (Cin == 1).
    wb1 = band(p["w1"], W, W).reshape(KH * W, W * C1)            # (80, 512)
    cb1 = jnp.tile(p["b1"], (W,)).reshape(1, W * C1)

    # conv2: LHS lane index = conv1 output layout (wfull*C1 + c); only even wfull
    # (pooled) blocks are real data, odd blocks get zero weight rows.
    b2w = band(p["w2"], Wo2, Wo2)                                # (KH, Wo2, C1, Wo2*C2)
    wb2 = jnp.zeros((KH, W, C1, Wo2 * C2), b2w.dtype).at[:, 0::2, :, :].set(b2w)
    wb2 = wb2.reshape(KH, W * C1, Wo2 * C2)                      # (5, 512, 512)
    cb2 = jnp.tile(p["b2"], (Wo2,)).reshape(1, Wo2 * C2)

    # FC1 rows permuted to the kernel's flatten order [q, wfull2*C2 + c] (even wfull2
    # valid), exactly reproducing PyTorch's NCHW Flatten semantics.
    wt = p["wf1"].T.reshape(C2, Hq, Wq, NF)                      # [c, h, w, n]
    wt = jnp.transpose(wt, (1, 2, 0, 3))                         # [h, w, c, n]
    wf1 = jnp.zeros((Hq, 2 * Wq, C2, NF), wt.dtype).at[:, 0::2, :, :].set(wt)
    wf1 = wf1.reshape(Hq * 2 * Wq * C2, NF)                      # (2048, 128)

    wf2 = jnp.pad(p["wf2"].T, ((0, 0), (0, NF - p["wf2"].shape[0])))   # (128, 128)
    fb2 = jnp.pad(p["bf2"], (0, NF - p["bf2"].shape[0])).reshape(1, NF)

    return {
        "wb1": wb1.astype(jnp.bfloat16), "cb1": cb1.astype(jnp.float32),
        "wb2": wb2.astype(jnp.bfloat16), "cb2": cb2.astype(jnp.float32),
        "wf1": wf1.astype(jnp.bfloat16),
        "fb1": p["bf1"].astype(jnp.float32).reshape(1, NF),
        "wf2": wf2.astype(jnp.bfloat16), "fb2": fb2.astype(jnp.float32),
    }


# ----------------------------- reference --------------------------------------

def reference_forward(params, x_nchw):
    """Pure-JAX f32 reference matching the PyTorch module exactly."""
    x = x_nchw.astype(jnp.float32)

    def conv(x, w, b):
        y = jax.lax.conv_general_dilated(
            x, w, window_strides=(1, 1), padding=((2, 2), (2, 2)),
            dimension_numbers=("NCHW", "OIHW", "NCHW"))
        return jax.nn.relu(y + b[None, :, None, None])

    def pool(x):
        return jax.lax.reduce_window(x, -jnp.inf, jax.lax.max,
                                     (1, 1, 2, 2), (1, 1, 2, 2), "VALID")

    x = pool(conv(x, params["w1"], params["b1"]))
    x = pool(conv(x, params["w2"], params["b2"]))
    x = x.reshape(x.shape[0], -1)                 # PyTorch NCHW flatten
    x = jax.nn.relu(x @ params["wf1"].T + params["bf1"])
    return x @ params["wf2"].T + params["bf2"]


if __name__ == "__main__":
    key = jax.random.PRNGKey(0)
    k_param, k_data = jax.random.split(key)

    input_shape = (1, 16, 16)          # (C, H, W): module fixes C=1 (Conv2d(1, 32, ...))
    batch = 2

    params = init_params(k_param, input_shape)
    packed = pack_params(params, input_shape)
    x = jax.random.normal(k_data, (batch,) + input_shape, jnp.float32)  # NCHW

    fwd = jax.jit(normal_model_forward)
    out = jax.block_until_ready(fwd(packed, x))

    assert out.shape == (batch, NUM_CLASSES), out.shape
    assert out.dtype == jnp.float32
    assert bool(jnp.all(jnp.isfinite(out)))

    # Loose check against the f32 reference (kernel feeds bf16 operands to the MXU).
    ref = reference_forward(params, x)
    err = float(jnp.max(jnp.abs(out - ref)))
    scale = float(jnp.max(jnp.abs(ref)))
    assert err <= 0.05 * scale + 0.05, (err, scale)

    print("KERNEL_OK")
</pallas_src>

<mosaic_0001>
module attributes {stable_mosaic.version = 11 : i64} {
  func.func @_fused_kernel(%arg0: i32, %arg1: memref<1x16x16xf32, #tpu.memory_space<vmem>>, %arg2: memref<80x512xbf16, #tpu.memory_space<vmem>>, %arg3: memref<1x512xf32, #tpu.memory_space<vmem>>, %arg4: memref<5x512x512xbf16, #tpu.memory_space<vmem>>, %arg5: memref<1x512xf32, #tpu.memory_space<vmem>>, %arg6: memref<2048x128xbf16, #tpu.memory_space<vmem>>, %arg7: memref<1x128xf32, #tpu.memory_space<vmem>>, %arg8: memref<128x128xbf16, #tpu.memory_space<vmem>>, %arg9: memref<1x128xf32, #tpu.memory_space<vmem>>, %arg10: memref<1x1x10xf32, #tpu.memory_space<vmem>>) attributes {dimension_semantics = [#tpu.dimension_semantics<parallel>], iteration_bounds = array<i64: 2>, scalar_prefetch = 0 : i64, scratch_operands = 0 : i64, tpu.core_type = #tpu.core_type<tc>, window_params = [{transform_indices = @transform_0, window_bounds = array<i64: 1, 16, 16>}, {pipeline_mode = #tpu.pipeline_mode<synchronous>, transform_indices = @transform_1, window_bounds = array<i64: 80, 512>}, {pipeline_mode = #tpu.pipeline_mode<synchronous>, transform_indices = @transform_2, window_bounds = array<i64: 1, 512>}, {pipeline_mode = #tpu.pipeline_mode<synchronous>, transform_indices = @transform_3, window_bounds = array<i64: 5, 512, 512>}, {pipeline_mode = #tpu.pipeline_mode<synchronous>, transform_indices = @transform_4, window_bounds = array<i64: 1, 512>}, {pipeline_mode = #tpu.pipeline_mode<synchronous>, transform_indices = @transform_5, window_bounds = array<i64: 2048, 128>}, {pipeline_mode = #tpu.pipeline_mode<synchronous>, transform_indices = @transform_6, window_bounds = array<i64: 1, 128>}, {pipeline_mode = #tpu.pipeline_mode<synchronous>, transform_indices = @transform_7, window_bounds = array<i64: 128, 128>}, {pipeline_mode = #tpu.pipeline_mode<synchronous>, transform_indices = @transform_8, window_bounds = array<i64: 1, 128>}, {transform_indices = @transform_9, window_bounds = array<i64: 1, 1, 10>}]} {
    %c0 = arith.constant 0 : index
    %c0_0 = arith.constant 0 : index
    %c0_1 = arith.constant 0 : index
    %0 = vector.load %arg1[%c0, %c0_0, %c0_1] : memref<1x16x16xf32, #tpu.memory_space<vmem>>, vector<1x16x16xf32>
    %1 = vector.shape_cast %0 : vector<1x16x16xf32> to vector<16x16xf32>
    %cst = arith.constant 0.000000e+00 : f32
    %2 = vector.broadcast %cst : f32 to vector<2x16xf32>
    %3 = tpu.concatenate %2, %1, %2 in 0 : vector<2x16xf32>, vector<16x16xf32>, vector<2x16xf32> -> vector<20x16xf32>
    %4 = vector.extract_strided_slice %3 {offsets = [0, 0], sizes = [16, 16], strides = [1, 1]} : vector<20x16xf32> to vector<16x16xf32>
    %5 = vector.extract_strided_slice %3 {offsets = [1, 0], sizes = [16, 16], strides = [1, 1]} : vector<20x16xf32> to vector<16x16xf32>
    %6 = vector.extract_strided_slice %3 {offsets = [2, 0], sizes = [16, 16], strides = [1, 1]} : vector<20x16xf32> to vector<16x16xf32>
    %7 = vector.extract_strided_slice %3 {offsets = [3, 0], sizes = [16, 16], strides = [1, 1]} : vector<20x16xf32> to vector<16x16xf32>
    %8 = vector.extract_strided_slice %3 {offsets = [4, 0], sizes = [16, 16], strides = [1, 1]} : vector<20x16xf32> to vector<16x16xf32>
    %9 = tpu.concatenate %4, %5, %6, %7, %8 in 1 : vector<16x16xf32>, vector<16x16xf32>, vector<16x16xf32>, vector<16x16xf32>, vector<16x16xf32> -> vector<16x80xf32>
    %10 = arith.truncf %9 : vector<16x80xf32> to vector<16x80xbf16>
    %c0_2 = arith.constant 0 : index
    %c0_3 = arith.constant 0 : index
    %11 = vector.load %arg2[%c0_2, %c0_3] : memref<80x512xbf16, #tpu.memory_space<vmem>>, vector<80x512xbf16>
    %cst_4 = arith.constant dense<0.000000e+00> : vector<16x512xf32>
    %12 = tpu.matmul %10, %11, %cst_4 {dimension_numbers = #tpu.dot_dimension_numbers<[1], [0], [0], [1], [0, 0, 1, 1], [], []>} : vector<16x80xbf16>, vector<80x512xbf16>, vector<16x512xf32> -> vector<16x512xf32>
    %c0_5 = arith.constant 0 : index
    %c0_6 = arith.constant 0 : index
    %13 = vector.load %arg3[%c0_5, %c0_6] : memref<1x512xf32, #tpu.memory_space<vmem>>, vector<1x512xf32>
    %14 = vector.broadcast %13 : vector<1x512xf32> to vector<16x512xf32>
    %15 = arith.addf %12, %14 : vector<16x512xf32>
    %cst_7 = arith.constant 0.000000e+00 : f32
    %16 = vector.broadcast %cst_7 : f32 to vector<16x512xf32>
    %17 = arith.maximumf %15, %16 : vector<16x512xf32>
    %18 = vector.extract_strided_slice %17 {offsets = [1, 0], sizes = [15, 512], strides = [1, 1]} : vector<16x512xf32> to vector<15x512xf32>
    %cst_8 = arith.constant 0.000000e+00 : f32
    %19 = vector.broadcast %cst_8 : f32 to vector<1x512xf32>
    %20 = tpu.concatenate %18, %19 in 0 : vector<15x512xf32>, vector<1x512xf32> -> vector<16x512xf32>
    %21 = arith.maximumf %17, %20 : vector<16x512xf32>
    %22 = vector.extract_strided_slice %21 {offsets = [0, 32], sizes = [16, 480], strides = [1, 1]} : vector<16x512xf32> to vector<16x480xf32>
    %23 = vector.extract_strided_slice %21 {offsets = [0, 0], sizes = [16, 32], strides = [1, 1]} : vector<16x512xf32> to vector<16x32xf32>
    %24 = tpu.concatenate %22, %23 in 1 : vector<16x480xf32>, vector<16x32xf32> -> vector<16x512xf32>
    %25 = arith.maximumf %21, %24 : vector<16x512xf32>
    %cst_9 = arith.constant 0.000000e+00 : f32
    %26 = vector.broadcast %cst_9 : f32 to vector<4x512xf32>
    %27 = tpu.concatenate %26, %25, %26 in 0 : vector<4x512xf32>, vector<16x512xf32>, vector<4x512xf32> -> vector<24x512xf32>
    %28 = vector.extract_strided_slice %27 {offsets = [0, 0], sizes = [16, 512], strides = [1, 1]} : vector<24x512xf32> to vector<16x512xf32>
    %29 = arith.truncf %28 : vector<16x512xf32> to vector<16x512xbf16>
    %c0_10 = arith.constant 0 : index
    %c0_11 = arith.constant 0 : index
    %c0_12 = arith.constant 0 : index
    %30 = vector.load %arg4[%c0_10, %c0_11, %c0_12] : memref<5x512x512xbf16, #tpu.memory_space<vmem>>, vector<1x512x512xbf16>
    %31 = vector.shape_cast %30 : vector<1x512x512xbf16> to vector<512x512xbf16>
    %cst_13 = arith.constant dense<0.000000e+00> : vector<16x512xf32>
    %32 = tpu.matmul %29, %31, %cst_13 {dimension_numbers = #tpu.dot_dimension_numbers<[1], [0], [0], [1], [0, 0, 1, 1], [], []>} : vector<16x512xbf16>, vector<512x512xbf16>, vector<16x512xf32> -> vector<16x512xf32>
    %33 = vector.extract_strided_slice %27 {offsets = [2, 0], sizes = [16, 512], strides = [1, 1]} : vector<24x512xf32> to vector<16x512xf32>
    %34 = arith.truncf %33 : vector<16x512xf32> to vector<16x512xbf16>
    %c1 = arith.constant 1 : index
    %c0_14 = arith.constant 0 : index
    %c0_15 = arith.constant 0 : index
    %35 = vector.load %arg4[%c1, %c0_14, %c0_15] : memref<5x512x512xbf16, #tpu.memory_space<vmem>>, vector<1x512x512xbf16>
    %36 = vector.shape_cast %35 : vector<1x512x512xbf16> to vector<512x512xbf16>
    %cst_16 = arith.constant dense<0.000000e+00> : vector<16x512xf32>
    %37 = tpu.matmul %34, %36, %cst_16 {dimension_numbers = #tpu.dot_dimension_numbers<[1], [0], [0], [1], [0, 0, 1, 1], [], []>} : vector<16x512xbf16>, vector<512x512xbf16>, vector<16x512xf32> -> vector<16x512xf32>
    %38 = arith.addf %32, %37 : vector<16x512xf32>
    %39 = vector.extract_strided_slice %27 {offsets = [4, 0], sizes = [16, 512], strides = [1, 1]} : vector<24x512xf32> to vector<16x512xf32>
    %40 = arith.truncf %39 : vector<16x512xf32> to vector<16x512xbf16>
    %c2 = arith.constant 2 : index
    %c0_17 = arith.constant 0 : index
    %c0_18 = arith.constant 0 : index
    %41 = vector.load %arg4[%c2, %c0_17, %c0_18] : memref<5x512x512xbf16, #tpu.memory_space<vmem>>, vector<1x512x512xbf16>
    %42 = vector.shape_cast %41 : vector<1x512x512xbf16> to vector<512x512xbf16>
    %cst_19 = arith.constant dense<0.000000e+00> : vector<16x512xf32>
    %43 = tpu.matmul %40, %42, %cst_19 {dimension_numbers = #tpu.dot_dimension_numbers<[1], [0], [0], [1], [0, 0, 1, 1], [], []>} : vector<16x512xbf16>, vector<512x512xbf16>, vector<16x512xf32> -> vector<16x512xf32>
    %44 = arith.addf %38, %43 : vector<16x512xf32>
    %45 = vector.extract_strided_slice %27 {offsets = [6, 0], sizes = [16, 512], strides = [1, 1]} : vector<24x512xf32> to vector<16x512xf32>
    %46 = arith.truncf %45 : vector<16x512xf32> to vector<16x512xbf16>
    %c3 = arith.constant 3 : index
    %c0_20 = arith.constant 0 : index
    %c0_21 = arith.constant 0 : index
    %47 = vector.load %arg4[%c3, %c0_20, %c0_21] : memref<5x512x512xbf16, #tpu.memory_space<vmem>>, vector<1x512x512xbf16>
    %48 = vector.shape_cast %47 : vector<1x512x512xbf16> to vector<512x512xbf16>
    %cst_22 = arith.constant dense<0.000000e+00> : vector<16x512xf32>
    %49 = tpu.matmul %46, %48, %cst_22 {dimension_numbers = #tpu.dot_dimension_numbers<[1], [0], [0], [1], [0, 0, 1, 1], [], []>} : vector<16x512xbf16>, vector<512x512xbf16>, vector<16x512xf32> -> vector<16x512xf32>
    %50 = arith.addf %44, %49 : vector<16x512xf32>
    %51 = vector.extract_strided_slice %27 {offsets = [8, 0], sizes = [16, 512], strides = [1, 1]} : vector<24x512xf32> to vector<16x512xf32>
    %52 = arith.truncf %51 : vector<16x512xf32> to vector<16x512xbf16>
    %c4 = arith.constant 4 : index
    %c0_23 = arith.constant 0 : index
    %c0_24 = arith.constant 0 : index
    %53 = vector.load %arg4[%c4, %c0_23, %c0_24] : memref<5x512x512xbf16, #tpu.memory_space<vmem>>, vector<1x512x512xbf16>
    %54 = vector.shape_cast %53 : vector<1x512x512xbf16> to vector<512x512xbf16>
    %cst_25 = arith.constant dense<0.000000e+00> : vector<16x512xf32>
    %55 = tpu.matmul %52, %54, %cst_25 {dimension_numbers = #tpu.dot_dimension_numbers<[1], [0], [0], [1], [0, 0, 1, 1], [], []>} : vector<16x512xbf16>, vector<512x512xbf16>, vector<16x512xf32> -> vector<16x512xf32>
    %56 = arith.addf %50, %55 : vector<16x512xf32>
    %c0_26 = arith.constant 0 : index
    %c0_27 = arith.constant 0 : index
    %57 = vector.load %arg5[%c0_26, %c0_27] : memref<1x512xf32, #tpu.memory_space<vmem>>, vector<1x512xf32>
    %58 = vector.broadcast %57 : vector<1x512xf32> to vector<16x512xf32>
    %59 = arith.addf %56, %58 : vector<16x512xf32>
    %cst_28 = arith.constant 0.000000e+00 : f32
    %60 = vector.broadcast %cst_28 : f32 to vector<16x512xf32>
    %61 = arith.maximumf %59, %60 : vector<16x512xf32>
    %62 = vector.extract_strided_slice %61 {offsets = [2, 0], sizes = [14, 512], strides = [1, 1]} : vector<16x512xf32> to vector<14x512xf32>
    %cst_29 = arith.constant 0.000000e+00 : f32
    %63 = vector.broadcast %cst_29 : f32 to vector<2x512xf32>
    %64 = tpu.concatenate %62, %63 in 0 : vector<14x512xf32>, vector<2x512xf32> -> vector<16x512xf32>
    %65 = arith.maximumf %61, %64 : vector<16x512xf32>
    %66 = vector.extract_strided_slice %65 {offsets = [0, 64], sizes = [16, 448], strides = [1, 1]} : vector<16x512xf32> to vector<16x448xf32>
    %67 = vector.extract_strided_slice %65 {offsets = [0, 0], sizes = [16, 64], strides = [1, 1]} : vector<16x512xf32> to vector<16x64xf32>
    %68 = tpu.concatenate %66, %67 in 1 : vector<16x448xf32>, vector<16x64xf32> -> vector<16x512xf32>
    %69 = arith.maximumf %65, %68 : vector<16x512xf32>
    %70 = vector.extract_strided_slice %69 {offsets = [0, 0], sizes = [1, 512], strides = [1, 1]} : vector<16x512xf32> to vector<1x512xf32>
    %71 = vector.extract_strided_slice %69 {offsets = [4, 0], sizes = [1, 512], strides = [1, 1]} : vector<16x512xf32> to vector<1x512xf32>
    %72 = vector.extract_strided_slice %69 {offsets = [8, 0], sizes = [1, 512], strides = [1, 1]} : vector<16x512xf32> to vector<1x512xf32>
    %73 = vector.extract_strided_slice %69 {offsets = [12, 0], sizes = [1, 512], strides = [1, 1]} : vector<16x512xf32> to vector<1x512xf32>
    %74 = tpu.concatenate %70, %71, %72, %73 in 1 : vector<1x512xf32>, vector<1x512xf32>, vector<1x512xf32>, vector<1x512xf32> -> vector<1x2048xf32>
    %75 = arith.truncf %74 : vector<1x2048xf32> to vector<1x2048xbf16>
    %c0_30 = arith.constant 0 : index
    %c0_31 = arith.constant 0 : index
    %76 = vector.load %arg6[%c0_30, %c0_31] : memref<2048x128xbf16, #tpu.memory_space<vmem>>, vector<2048x128xbf16>
    %cst_32 = arith.constant dense<0.000000e+00> : vector<1x128xf32>
    %77 = tpu.matmul %75, %76, %cst_32 {dimension_numbers = #tpu.dot_dimension_numbers<[1], [0], [0], [1], [0, 0, 1, 1], [], []>} : vector<1x2048xbf16>, vector<2048x128xbf16>, vector<1x128xf32> -> vector<1x128xf32>
    %c0_33 = arith.constant 0 : index
    %c0_34 = arith.constant 0 : index
    %78 = vector.load %arg7[%c0_33, %c0_34] : memref<1x128xf32, #tpu.memory_space<vmem>>, vector<1x128xf32>
    %79 = arith.addf %77, %78 : vector<1x128xf32>
    %cst_35 = arith.constant 0.000000e+00 : f32
    %80 = vector.broadcast %cst_35 : f32 to vector<1x128xf32>
    %81 = arith.maximumf %79, %80 : vector<1x128xf32>
    %82 = arith.truncf %81 : vector<1x128xf32> to vector<1x128xbf16>
    %c0_36 = arith.constant 0 : index
    %c0_37 = arith.constant 0 : index
    %83 = vector.load %arg8[%c0_36, %c0_37] : memref<128x128xbf16, #tpu.memory_space<vmem>>, vector<128x128xbf16>
    %cst_38 = arith.constant dense<0.000000e+00> : vector<1x128xf32>
    %84 = tpu.matmul %82, %83, %cst_38 {dimension_numbers = #tpu.dot_dimension_numbers<[1], [0], [0], [1], [0, 0, 1, 1], [], []>} : vector<1x128xbf16>, vector<128x128xbf16>, vector<1x128xf32> -> vector<1x128xf32>
    %c0_39 = arith.constant 0 : index
    %c0_40 = arith.constant 0 : index
    %85 = vector.load %arg9[%c0_39, %c0_40] : memref<1x128xf32, #tpu.memory_space<vmem>>, vector<1x128xf32>
    %86 = arith.addf %84, %85 : vector<1x128xf32>
    %87 = vector.extract_strided_slice %86 {offsets = [0, 0], sizes = [1, 10], strides = [1, 1]} : vector<1x128xf32> to vector<1x10xf32>
    %c0_41 = arith.constant 0 : index
    %c0_42 = arith.constant 0 : index
    %c0_43 = arith.constant 0 : index
    %88 = vector.load %arg10[%c0_41, %c0_42, %c0_43] : memref<1x1x10xf32, #tpu.memory_space<vmem>>, vector<1x1x10xf32>
    %89 = vector.shape_cast %88 : vector<1x1x10xf32> to vector<1x10xf32>
    %90 = vector.shape_cast %87 : vector<1x10xf32> to vector<1x1x10xf32>
    tpu.vector_store %arg10[%c0_41, %c0_42, %c0_43], %90 {strides = array<i32>} : memref<1x1x10xf32, #tpu.memory_space<vmem>>, vector<1x1x10xf32>,
    return
  }
  func.func @transform_0(%arg0: i32) -> (i32, i32, i32) {
    %c0_i32 = arith.constant 0 : i32
    %c0_i32_0 = arith.constant 0 : i32
    %c0_i32_1 = arith.constant 0 : i32
    return %arg0, %c0_i32, %c0_i32_0 : i32, i32, i32
  }
  func.func @transform_1(%arg0: i32) -> (i32, i32) {
    %c0_i32 = arith.constant 0 : i32
    %c0_i32_0 = arith.constant 0 : i32
    %c0_i32_1 = arith.constant 0 : i32
    return %c0_i32, %c0_i32_0 : i32, i32
  }
  func.func @transform_2(%arg0: i32) -> (i32, i32) {
    %c0_i32 = arith.constant 0 : i32
    %c0_i32_0 = arith.constant 0 : i32
    %c0_i32_1 = arith.constant 0 : i32
    return %c0_i32, %c0_i32_0 : i32, i32
  }
  func.func @transform_3(%arg0: i32) -> (i32, i32, i32) {
    %c0_i32 = arith.constant 0 : i32
    %c0_i32_0 = arith.constant 0 : i32
    %c0_i32_1 = arith.constant 0 : i32
    %c0_i32_2 = arith.constant 0 : i32
    return %c0_i32, %c0_i32_0, %c0_i32_1 : i32, i32, i32
  }
  func.func @transform_4(%arg0: i32) -> (i32, i32) {
    %c0_i32 = arith.constant 0 : i32
    %c0_i32_0 = arith.constant 0 : i32
    %c0_i32_1 = arith.constant 0 : i32
    return %c0_i32, %c0_i32_0 : i32, i32
  }
  func.func @transform_5(%arg0: i32) -> (i32, i32) {
    %c0_i32 = arith.constant 0 : i32
    %c0_i32_0 = arith.constant 0 : i32
    %c0_i32_1 = arith.constant 0 : i32
    return %c0_i32, %c0_i32_0 : i32, i32
  }
  func.func @transform_6(%arg0: i32) -> (i32, i32) {
    %c0_i32 = arith.constant 0 : i32
    %c0_i32_0 = arith.constant 0 : i32
    %c0_i32_1 = arith.constant 0 : i32
    return %c0_i32, %c0_i32_0 : i32, i32
  }
  func.func @transform_7(%arg0: i32) -> (i32, i32) {
    %c0_i32 = arith.constant 0 : i32
    %c0_i32_0 = arith.constant 0 : i32
    %c0_i32_1 = arith.constant 0 : i32
    return %c0_i32, %c0_i32_0 : i32, i32
  }
  func.func @transform_8(%arg0: i32) -> (i32, i32) {
    %c0_i32 = arith.constant 0 : i32
    %c0_i32_0 = arith.constant 0 : i32
    %c0_i32_1 = arith.constant 0 : i32
    return %c0_i32, %c0_i32_0 : i32, i32
  }
  func.func @transform_9(%arg0: i32) -> (i32, i32, i32) {
    %c0_i32 = arith.constant 0 : i32
    %c0_i32_0 = arith.constant 0 : i32
    %c0_i32_1 = arith.constant 0 : i32
    return %arg0, %c0_i32, %c0_i32_0 : i32, i32, i32
  }
}

</mosaic_0001>

<bundles_post_ra>
// kernel: normal_model_forward.1
= control target key start
LH: loop header
LB: loop body
LE: loop exit
PB: predicated region body
PF: predicated region fallthrough
CT: control target
= control target key end

     0   :  { %s11136_s0 = inlined_call_operand.hbm [shape: f32[2,16,16], index: 0, kind: input, shape index: {}]   ;;  %s11137_s1 = inlined_call_operand.hbm [shape: bf16[80,512], index: 1, kind: input, shape index: {}]   ;;  %s11138_s2 = inlined_call_operand.hbm [shape: f32[1,512], index: 2, kind: input, shape index: {}]   ;;  %s11139_s3 = inlined_call_operand.hbm [shape: bf16[5,512,512], index: 3, kind: input, shape index: {}]   ;;  %s11140_s4 = inlined_call_operand.hbm [shape: f32[1,512], index: 4, kind: input, shape index: {}]   ;;  %s11141_s5 = inlined_call_operand.hbm [shape: bf16[2048,128], index: 5, kind: input, shape index: {}]   ;;  %s11142_s6 = inlined_call_operand.hbm [shape: f32[1,128], index: 6, kind: input, shape index: {}]   ;;  %s11143_s7 = inlined_call_operand.hbm [shape: bf16[128,128], index: 7, kind: input, shape index: {}]   ;;  %s11144_s8 = inlined_call_operand.hbm [shape: f32[1,128], index: 8, kind: input, shape index: {}]   ;;  %s11145_s9 = inlined_call_operand.hbm [shape: f32[2,1,10], index: 9, kind: output, shape index: {}]  }
   0x1   :  { %11150 = sst [smem:[#allocation24_spill]] %s11137_s1 }
   0x2   :  { %11151 = sst [smem:[#allocation25_spill]] %s11139_s3 }
   0x3   :  { %11152 = sst [smem:[#allocation26_spill]] %s11145_s9 }
   0x4   :  { %14 = vsyncpa [#allocation3], 0 }
   0x5   :  { %16 = vsyncpa [#allocation3 + $0x1], 0 }
   0x6   :  { %17 = vsyncpa [#allocation6], 0 }
   0x7   :  { %18 = vsyncpa [#allocation9], 0 }
   0x8   :  { %19 = vsyncpa [#allocation12], 0 }
   0x9   :  { %20 = vsyncpa [#allocation15], 0 }
   0xa   :  { %21 = vsyncpa [#allocation4], 0 }
   0xb   :  { %23 = vsyncpa [#allocation4 + $0x1], 0  ;;  %s10382_s30 = smov 0   ;;  %s10384_s10 = smov 0  }
   0xc   :  { %s10386_s11 = smov 0   ;;  %s10388_s12 = smov 0  }
   0xd LB: > { %s10307_s13 = smov [#allocation5]   ;;  %s10403_s15 = sadd.s32 4294967295, %s10305_s12   ;;  %s10305_s12 = sphi %s10388_s12, %s11184_s12   ;;  %s10301_s11 = sphi %s10386_s11, %s11183_s11   ;;  %s10297_s10 = sphi %s10384_s10, %s11182_s10   ;;  %s10293_s30 = sphi %s10382_s30, %s11181_s30  }
   0xe   : > { %s266_s14 = sshll.u32 %s10307_s13, 4  ;;  %p7483_p0 = scmp.ge.s32.totalorder %s10305_s12, 1  ;;  %s10408_s14 = int_to_ptr.vmem [resolvable:$true] %s266_s14 }
   0xf   : > { %p11147_p1 = scmp.eq.s32.totalorder %s10403_s15, 0  ;;  %p254_p2 = scmp.lt.s32.totalorder %s10305_s12, 3 }
  0x10   : > { %s10308_s17 = smov [#allocation8]   ;;  %s10309_s20 = smov [#allocation11]  }
  0x11   : > { %p10410_p3 = pnand %p7483_p0, %p254_p2  ;;  %s290_s18 = sshll.u32 %s10308_s17, 4  ;;  %s10423_s18 = int_to_ptr.vmem [resolvable:$true] %s290_s18 }
  0x12   : > { %s314_s21 = sshll.u32 %s10309_s20, 4  ;;  %s11155_s1 = sld [smem:[#allocation24_spill]]  ;;  %s10425_s21 = int_to_ptr.vmem [resolvable:$true] %s314_s21 }
  0x13   : > { %s11153_s16 = scalar_select %p10410_p3, 1, 0 }
  0x14   : > { %p8677_p5 = pneg %p10410_p3 }
  0x16   : > { %p10419_p6 = pnand %p8677_p5, %p11147_p1 }
  0x18   : > { %s9969_s24 = scalar_lea.hbm %s11155_s1, 2560  ;;  %p10435_p8 = pneg %p10419_p6 }
  0x19   : > { %p9970_p7 = scmp.ne.s32.totalorder %s11155_s1, %s9969_s24  ;;  %p9976_p11 = scmp.lt.u32.totalorder %s9969_s24, %s11155_s1 }
  0x1b   : > { %p9972_p9 = pnand %p10435_p8, %p9970_p7 }
  0x1d   : > { %p9973_p10 = pneg %p9972_p9 }
  0x1f   : > { %p9978_p12 = pnand %p9976_p11, %p9973_p10 }
  0x21   : > { %9981 = shalt.err (!%p9978_p12)
}
  0x22   : > { %s9982_s13 = scalar_lea.vmem %s10408_s14, 2560  ;;  %p9990_p5 = scmp.lt.s32.totalorder %s10408_s14, %s10408_s14 }
  0x23   : > { %p9983_p13 = scmp.ne.s32.totalorder %s10408_s14, %s9982_s13  ;;  %p9991_p4 = scmp.lt.s32.totalorder %s9982_s13, %s9982_s13 }
  0x25   : > { %p9985_p0 = pnand %p9983_p13, %p10435_p8  ;;  %p9992_p7 = por %p9991_p4, %p9990_p5 }
  0x27   : > { %p9986_p2 = pneg %p9985_p0 }
  0x29   : > { %p9993_p9 = pnand %p9992_p7, %p9986_p2 }
  0x2b   : > { %9996 = shalt.err (!%p9993_p9)
}
  0x2c   : > { %s10310_s17 = smov 256   ;;  %s10311_s20 = smov 16  }
  0x2d   : > { %8680 = dma.hbm_to_vmem [thread:$0]  (!%p10419_p6), %s11155_s1, 2560, %s10408_s14, [#allocation6], %s10310_s17, %s10310_s17, %s10311_s20  }
  0x2e   : > { %s11157_s3 = sld [smem:[#allocation25_spill]] }
  0x34   : > { %s9997_s26 = scalar_lea.hbm %s11157_s3, 81920 }
  0x35   : > { %p9998_p4 = scmp.ne.s32.totalorder %s11157_s3, %s9997_s26  ;;  %p10004_p12 = scmp.lt.u32.totalorder %s9997_s26, %s11157_s3 }
  0x37   : > { %p10000_p10 = pnand %p9998_p4, %p10435_p8 }
  0x39   : > { %p10001_p11 = pneg %p10000_p10 }
  0x3b   : > { %p10006_p13 = pnand %p10004_p12, %p10001_p11 }
  0x3d   : > { %10009 = shalt.err (!%p10006_p13)
}
  0x3e   : > { %s10010_s14 = scalar_lea.vmem %s10423_s18, 81920  ;;  %p10018_p7 = scmp.lt.s32.totalorder %s10423_s18, %s10423_s18 }
  0x3f   : > { %p10011_p0 = scmp.ne.s32.totalorder %s10423_s18, %s10010_s14  ;;  %p10019_p9 = scmp.lt.s32.totalorder %s10010_s14, %s10010_s14 }
  0x41   : > { %p10013_p2 = pnand %p10011_p0, %p10435_p8  ;;  %p10020_p4 = por %p10019_p9, %p10018_p7 }
  0x43   : > { %p10014_p5 = pneg %p10013_p2 }
  0x45   : > { %p10021_p10 = pnand %p10020_p4, %p10014_p5 }
  0x47   : > { %10024 = shalt.err (!%p10021_p10)
}
  0x48   : > { %8686 = dma.hbm_to_vmem [thread:$0]  (!%p10419_p6), %s11157_s3, 81920, %s10423_s18, [#allocation9], %s10310_s17, %s10310_s17, %s10311_s20  }
  0x49   : > { %s10025_s25 = scalar_lea.hbm %s11141_s5, 16384 }
  0x4a   : > { %p10026_p11 = scmp.ne.s32.totalorder %s11141_s5, %s10025_s25  ;;  %p10032_p0 = scmp.lt.u32.totalorder %s10025_s25, %s11141_s5 }
  0x4c   : > { %p10028_p12 = pnand %p10026_p11, %p10435_p8 }
  0x4e   : > { %p10029_p13 = pneg %p10028_p12 }
  0x50   : > { %p10034_p2 = pnand %p10032_p0, %p10029_p13 }
  0x52   : > { %10037 = shalt.err (!%p10034_p2)
}
  0x53   : > { %s10038_s18 = scalar_lea.vmem %s10425_s21, 16384  ;;  %p10046_p4 = scmp.lt.s32.totalorder %s10425_s21, %s10425_s21 }
  0x54   : > { %p10039_p5 = scmp.ne.s32.totalorder %s10425_s21, %s10038_s18  ;;  %p10047_p10 = scmp.lt.s32.totalorder %s10038_s18, %s10038_s18 }
  0x56   : > { %p10041_p7 = pnand %p10039_p5, %p10435_p8  ;;  %p10048_p11 = por %p10047_p10, %p10046_p4 }
  0x58   : > { %p10042_p9 = pneg %p10041_p7 }
  0x5a   : > { %p10049_p12 = pnand %p10048_p11, %p10042_p9 }
  0x5c   : > { %10052 = shalt.err (!%p10049_p12)
}
  0x5d   : > { %s10312_s17 = smov 64   ;;  %s10313_s20 = smov 4  }
  0x5e   : > { %8692 = dma.hbm_to_vmem [thread:$0]  (!%p10419_p6), %s11141_s5, 16384, %s10425_s21, [#allocation12], %s10312_s17, %s10312_s17, %s10313_s20  }
  0x5f   : > { %s10314_s22 = smov [#allocation14]   ;;  %s10315_s24 = smov [#allocation7]  }
  0x60   : > { %s338_s23 = sshll.u32 %s10314_s22, 4  ;;  %s280_s25 = sshll.u32 %s10315_s24, 4  ;;  %s339_s23 = int_to_ptr.vmem [resolvable:$true] %s338_s23  ;;  %s281_s25 = int_to_ptr.vmem [resolvable:$true] %s280_s25 }
  0x61   : > { %s10053_s29 = scalar_lea.hbm %s11143_s7, 1024 }
  0x62   : > { %p10054_p13 = scmp.ne.s32.totalorder %s11143_s7, %s10053_s29  ;;  %p10060_p5 = scmp.lt.u32.totalorder %s10053_s29, %s11143_s7 }
  0x64   : > { %p10056_p0 = pnand %p10054_p13, %p10435_p8 }
  0x66   : > { %p10057_p2 = pneg %p10056_p0 }
  0x68   : > { %p10062_p7 = pnand %p10060_p5, %p10057_p2 }
  0x6a   : > { %10065 = shalt.err (!%p10062_p7)
}
  0x6b   : > { %s10066_s21 = scalar_lea.vmem %s339_s23, 1024  ;;  %p10074_p11 = scmp.lt.s32.totalorder %s339_s23, %s339_s23 }
  0x6c   : > { %p10067_p9 = scmp.ne.s32.totalorder %s339_s23, %s10066_s21  ;;  %p10075_p12 = scmp.lt.s32.totalorder %s10066_s21, %s10066_s21 }
  0x6e   : > { %p10069_p4 = pnand %p10067_p9, %p10435_p8  ;;  %p10076_p1 = por %p10075_p12, %p10074_p11 }
  0x70   : > { %p10070_p10 = pneg %p10069_p4 }
  0x72   : > { %p10077_p3 = pnand %p10076_p1, %p10070_p10 }
  0x74   : > { %10080 = shalt.err (!%p10077_p3)
}
  0x75   : > { %8698 = dma.hbm_to_vmem [thread:$0]  (!%p10419_p6), %s11143_s7, 1024, %s339_s23, [#allocation15], %s10312_s17, %s10312_s17, %s10313_s20  }
  0x76   : > { %s10081_s22 = scalar_lea.hbm %s11138_s2, 64 }
  0x77   : > { %p10082_p13 = scmp.ne.s32.totalorder %s11138_s2, %s10081_s22  ;;  %p10088_p3 = scmp.lt.u32.totalorder %s10081_s22, %s11138_s2 }
  0x79   : > { %p10084_p0 = pnand %p10082_p13, %p10435_p8 }
  0x7b   : > { %p10085_p1 = pneg %p10084_p0 }
  0x7d   : > { %p10090_p2 = pnand %p10088_p3, %p10085_p1 }
  0x7f   : > { %10093 = shalt.err (!%p10090_p2)
}
  0x80   : > { %s10094_s13 = scalar_lea.vmem %s281_s25, 64  ;;  %p10102_p4 = scmp.lt.s32.totalorder %s281_s25, %s281_s25 }
  0x81   : > { %p10095_p5 = scmp.ne.s32.totalorder %s281_s25, %s10094_s13  ;;  %p10103_p10 = scmp.lt.s32.totalorder %s10094_s13, %s10094_s13 }
  0x83   : > { %p10097_p7 = pnand %p10095_p5, %p10435_p8  ;;  %p10104_p11 = por %p10103_p10, %p10102_p4 }
  0x85   : > { %p10098_p9 = pneg %p10097_p7 }
  0x87   : > { %p10105_p12 = pnand %p10104_p11, %p10098_p9 }
  0x89   : > { %10108 = shalt.err (!%p10105_p12)
}
  0x8a   : > { %8683 = dma.hbm_to_vmem [thread:$0]  (!%p10419_p6), %s11138_s2, 64, %s281_s25, [#allocation6]  }
  0x8b   : > { %s10316_s23 = smov [#allocation10]   ;;  %s10317_s21 = smov [#allocation13]  }
  0x8c   : > { %s304_s18 = sshll.u32 %s10316_s23, 4  ;;  %s328_s14 = sshll.u32 %s10317_s21, 4  ;;  %s305_s18 = int_to_ptr.vmem [resolvable:$true] %s304_s18  ;;  %s329_s14 = int_to_ptr.vmem [resolvable:$true] %s328_s14 }
  0x8d   : > { %s10109_s3 = scalar_lea.hbm %s11140_s4, 64 }
  0x8e   : > { %p10110_p13 = scmp.ne.s32.totalorder %s11140_s4, %s10109_s3  ;;  %p10116_p3 = scmp.lt.u32.totalorder %s10109_s3, %s11140_s4 }
  0x90   : > { %p10112_p0 = pnand %p10110_p13, %p10435_p8 }
  0x92   : > { %p10113_p1 = pneg %p10112_p0 }
  0x94   : > { %p10118_p2 = pnand %p10116_p3, %p10113_p1 }
  0x96   : > { %10121 = shalt.err (!%p10118_p2)
}
  0x97   : > { %s10122_s25 = scalar_lea.vmem %s305_s18, 64  ;;  %p10130_p4 = scmp.lt.s32.totalorder %s305_s18, %s305_s18 }
  0x98   : > { %p10123_p5 = scmp.ne.s32.totalorder %s305_s18, %s10122_s25  ;;  %p10131_p10 = scmp.lt.s32.totalorder %s10122_s25, %s10122_s25 }
  0x9a   : > { %p10125_p7 = pnand %p10123_p5, %p10435_p8  ;;  %p10132_p11 = por %p10131_p10, %p10130_p4 }
  0x9c   : > { %p10126_p9 = pneg %p10125_p7 }
  0x9e   : > { %p10133_p12 = pnand %p10132_p11, %p10126_p9 }
  0xa0   : > { %10136 = shalt.err (!%p10133_p12)
}
  0xa1   : > { %8689 = dma.hbm_to_vmem [thread:$0]  (!%p10419_p6), %s11140_s4, 64, %s305_s18, [#allocation9]  }
  0xa2   : > { %s10137_s23 = scalar_lea.hbm %s11142_s6, 16 }
  0xa3   : > { %p10138_p13 = scmp.ne.s32.totalorder %s11142_s6, %s10137_s23  ;;  %p10144_p3 = scmp.lt.u32.totalorder %s10137_s23, %s11142_s6 }
  0xa5   : > { %p10140_p0 = pnand %p10138_p13, %p10435_p8 }
  0xa7   : > { %p10141_p1 = pneg %p10140_p0 }
  0xa9   : > { %p10146_p2 = pnand %p10144_p3, %p10141_p1 }
  0xab   : > { %10149 = shalt.err (!%p10146_p2)
}
  0xac   : > { %s10150_s22 = scalar_lea.vmem %s329_s14, 16  ;;  %s10157_s18 = scalar_lea.vmem %s329_s14, 32 }
  0xad   : > { %p10151_p5 = scmp.ne.s32.totalorder %s329_s14, %s10150_s22  ;;  %p10158_p4 = scmp.lt.s32.totalorder %s329_s14, %s329_s14 }
  0xae   : > { %p10159_p10 = scmp.lt.s32.totalorder %s10157_s18, %s10150_s22 }
  0xaf   : > { %p10153_p7 = pnand %p10151_p5, %p10435_p8 }
  0xb0   : > { %p10160_p11 = por %p10159_p10, %p10158_p4 }
  0xb1   : > { %p10154_p9 = pneg %p10153_p7 }
  0xb3   : > { %p10161_p12 = pnand %p10160_p11, %p10154_p9 }
  0xb5   : > { %10164 = shalt.err (!%p10161_p12)
}
  0xb6   : > { %8695 = dma.hbm_to_vmem [thread:$0]  (!%p10419_p6), %s11142_s6, 16, %s329_s14, [#allocation12]  }
  0xb7   : > { %s10318_s28 = smov [#allocation16]   ;;  %s10165_s17 = scalar_lea.hbm %s11144_s8, 16 }
  0xb8   : > { %s352_s25 = sshll.u32 %s10318_s28, 4  ;;  %p10166_p13 = scmp.ne.s32.totalorder %s11144_s8, %s10165_s17  ;;  %s353_s25 = int_to_ptr.vmem [resolvable:$true] %s352_s25 }
  0xb9   : > { %p10172_p3 = scmp.lt.u32.totalorder %s10165_s17, %s11144_s8 }
  0xba   : > { %p10168_p0 = pnand %p10166_p13, %p10435_p8 }
  0xbc   : > { %p10169_p1 = pneg %p10168_p0 }
  0xbe   : > { %p10174_p2 = pnand %p10172_p3, %p10169_p1 }
  0xc0   : > { %10177 = shalt.err (!%p10174_p2)
}
  0xc1   : > { %s10178_s14 = scalar_lea.vmem %s353_s25, 16  ;;  %s10185_s1 = scalar_lea.vmem %s353_s25, 32 }
  0xc2   : > { %p10179_p5 = scmp.ne.s32.totalorder %s353_s25, %s10178_s14  ;;  %p10186_p4 = scmp.lt.s32.totalorder %s353_s25, %s353_s25 }
  0xc3   : > { %p10187_p10 = scmp.lt.s32.totalorder %s10185_s1, %s10178_s14 }
  0xc4   : > { %p10181_p7 = pnand %p10179_p5, %p10435_p8 }
  0xc5   : > { %p10188_p11 = por %p10187_p10, %p10186_p4 }
  0xc6   : > { %p10182_p9 = pneg %p10181_p7 }
  0xc8   : > { %p10189_p12 = pnand %p10188_p11, %p10182_p9 }
  0xca   : > { %10192 = shalt.err (!%p10189_p12)
}
  0xcb   : > { %8701 = dma.hbm_to_vmem [thread:$0]  (!%p10419_p6), %s11144_s8, 16, %s353_s25, [#allocation15]  }
  0xcc   : > { %s7482_s27 = sadd.s32 4294967294, %s10305_s12   ;;  %s10594_s19 = sadd.s32 1, %s10305_s12  }
  0xcd   : > { %s33_s18 = ssub.s32 %s10305_s12, %s10594_s19  ;;  %s36_s24 = sadd.s32 1, %s10301_s11 }
  0xce   : > { %p34_p8 = scmp.eq.s32.totalorder %s33_s18, 0  ;;  %p43_p13 = scmp.ne.s32.totalorder %s10301_s11, %s10297_s10 }
  0xcf   : > { %p44_p0 = scmp.eq.s32.totalorder %s10305_s12, 0  ;;  %p49_p1 = scmp.ne.s32.totalorder %s10297_s10, %s10293_s30 }
  0xd0   : > { %s10605_s26 = scalar_select %p34_p8, %s10301_s11, %s36_s24  }
  0xd1   : > { %p10607_p3 = por %p44_p0, %p43_p13  ;;  %p11159_p2 = scmp.eq.s32.totalorder %s10403_s15, 0 }
  0xd2   : > { %p241_p5 = scmp.eq.s32.totalorder %s10403_s15, 1  ;;  %p247_p7 = scmp.eq.s32.totalorder %s7482_s27, 1 }
  0xd3   : > { %p10613_p6 = por %p11159_p2, %p49_p1  ;;  %p8718_p9 = scmp.lt.s32.totalorder %s10305_s12, 2 }
  0xd4   : > { %s363_s29 = sand.u32 1, %s10301_s11   ;;  %p10620_p4 = por %p241_p5, %p43_p13 }
  0xd5   : > { %p10624_p10 = por %p247_p7, %p49_p1  ;;  %s7493_s20 = sshll.u32 %s363_s29, 4 }
  0xd6   : > { %s11161_s13 = scalar_select %p10620_p4, 1, 0 }
  0xd7   : > { %s11162_s17 = scalar_select %p10624_p10, 1, 0 }
  0xd8   : > { %s8363_s23 = sshll.u32 %s10305_s12, 8  ;;  %s367_s1 = scalar_lea.vmem [#allocation2], %s7493_s20 }
  0xd9   : > { %s10632_s14 = scalar_lea.hbm %s11136_s0, %s8363_s23  ;;  %s374_s3 = sshll.u32 %s367_s1, 4  ;;  %s10634_s3 = int_to_ptr.vmem [resolvable:$true] %s374_s3 }
  0xda   : > { %p10638_p11 = pnand %p8718_p9, %p10607_p3  ;;  %s10642_s27 = scalar_lea.sflag [#allocation3], %s363_s29 }
  0xdb   : > { %s10193_s18 = scalar_lea.hbm %s10632_s14, 256  ;;  %s10198_s28 = scalar_lea.hbm %s11136_s0, 512 }
  0xdc   : > { %p10194_p12 = scmp.ne.s32.totalorder %s10632_s14, %s10193_s18  ;;  %p10195_p8 = pneg %p10638_p11 }
  0xdd   : > { %p10199_p1 = scmp.lt.u32.totalorder %s10632_s14, %s11136_s0  ;;  %p10200_p3 = scmp.lt.u32.totalorder %s10198_s28, %s10193_s18 }
  0xde   : > { %p10196_p13 = pnand %p10195_p8, %p10194_p12  ;;  %p10202_p5 = scmp.lt.u32.totalorder %s10193_s18, %s10632_s14 }
  0xdf   : > { %p10201_p2 = por %p10200_p3, %p10199_p1 }
  0xe0   : > { %p10197_p0 = pneg %p10196_p13 }
  0xe1   : > { %p10203_p7 = por %p10202_p5, %p10201_p2 }
  0xe3   : > { %p10204_p9 = pnand %p10203_p7, %p10197_p0 }
  0xe5   : > { %10207 = shalt.err (!%p10204_p9)
}
  0xe6   : > { %s10208_s29 = scalar_lea.vmem %s10634_s3, 256  ;;  %s10319_s9 = smov [#allocation2]  }
  0xe7   : > { %p10209_p12 = scmp.ne.s32.totalorder %s10634_s3, %s10208_s29  ;;  %s10213_s1 = sshll.u32 %s10319_s9, 4  ;;  %s10214_s1 = int_to_ptr.vmem [resolvable:$false] %s10213_s1 }
  0xe8   : > { %s10215_s24 = scalar_lea.vmem %s10214_s1, 512  ;;  %p10216_p4 = scmp.lt.s32.totalorder %s10634_s3, %s10214_s1 }
  0xe9   : > { %p10211_p13 = pnand %p10209_p12, %p10195_p8  ;;  %p10217_p1 = scmp.lt.s32.totalorder %s10215_s24, %s10208_s29 }
  0xeb   : > { %p10212_p10 = pneg %p10211_p13  ;;  %p10218_p3 = por %p10217_p1, %p10216_p4 }
  0xed   : > { %p10219_p2 = pnand %p10218_p3, %p10212_p10 }
  0xef   : > { %10222 = shalt.err (!%p10219_p2)
}
  0xf0   : > { %s10320_s18 = smov 128   ;;  %s10321_s20 = smov 8  }
  0xf1   : > { %8705 = dma.hbm_to_vmem [thread:$0]  (!%p10638_p11), %s10632_s14, 256, %s10634_s3, %s10642_s27, %s10320_s18, %s10320_s18, %s10321_s20  }
  0xf2   : > { %p11164_p8 = scmp.ne.s32.totalorder %s11153_s16, 0 }
  0xf3   : > { %s10673_s28 = sand.u32 (!%p11164_p8), 1, %s10297_s10  }
  0xf4   : > { %386 = sbr.rel (%p11164_p8) target bundleno = 2255 (0x8cf), region = 56  ;;  %s7497_s23 = sshll.u32 (!%p11164_p8), %s10673_s28, 4 }
  0xf5   : > { %s389_s21 = scalar_lea.sflag (!%p11164_p8), [#allocation3], %s10673_s28  ;;  %s392_s29 = scalar_lea.vmem (!%p11164_p8), [#allocation2], %s7497_s23 }
  0xfb   : > { %10268 = dma.done.wait (%p10613_p6), %s389_s21, 256  }
  0xfc   : > { %10270 = vsyncadd (%p10613_p6), %s389_s21, 4294967040  ;;  %p11165_p4 = scmp.eq.s32.totalorder %s10403_s15, 0 }
  0xfe   : > { %10272 = dma.done.wait (%p11165_p4), [#allocation6], 2624   ;;  %p11166_p10 = pmov %p11165_p4 }
  0xff   : > { %p11167_p11 = pmov %p11165_p4 }
 0x100   : > { %10274 = vsyncadd (%p11166_p10), [#allocation6], 4294964672 }
 0x101   : > { %10276 = dma.done.wait (%p11167_p11), [#allocation9], 81984   ;;  %p11168_p0 = pmov %p11165_p4 }
 0x103   : > { %10278 = vsyncadd (%p11168_p0), [#allocation9], 4294885312  ;;  %p11169_p5 = pmov %p11168_p0 }
 0x104   : > { %p11170_p7 = pmov %p11168_p0 }
 0x105   : > { %10280 = dma.done.wait (%p11169_p5), [#allocation12], 16400  }
 0x106   : > { %10282 = vsyncadd (%p11170_p7), [#allocation12], 4294950896  ;;  %p11171_p6 = pmov %p11168_p0 }
 0x107   : > { %p11172_p9 = pmov %p11168_p0 }
 0x108   : > { %10284 = dma.done.wait (%p11171_p6), [#allocation15], 1040  }
 0x109   : > { %10286 = vsyncadd (%p11172_p9), [#allocation15], 4294966256  ;;  %v459_v0 = vld [vmem:[%s392_s29] sm:$0xff]  ;;  %v460_v1 = vld [vmem:[%s392_s29 + $0x8] sm:$0xff]  ;;  %vm463_vm0 = vcmask 1041408   ;;  %vm474_vm1 = vcmask 1046528  }
 0x10a   : > { %vm498_vm2 = vcmask 1044480   ;;  %v464_v2 = vrot.slane %v459_v0, 6  ;;  %v465_v3 = vrot.slane %v460_v1, 6  ;;  %v8843_v4 = vld [vmem:[#allocation5 + $0x4] ss:$16 sps:$4 sm:$0xff]   ;;  %vm486_vm3 = vcmask 1045504  }
 0x10b   : > { %v8845_v5 = vld [vmem:[#allocation5] ss:$16 sps:$4 sm:$0xff]   ;;  %v8846_v6 = vld [vmem:[#allocation5 + $0x24] ss:$16 sps:$4 sm:$0xff]   ;;  %vm510_vm4 = vcmask 1043456   ;;  %681 = vmatprep.subr.bf16.mxu1 %v8843_v4  ;;  %s10322_s16 = smov 16  }
 0x10c   : > { %v10697_v7 = vsel %vm463_vm0, %v464_v2, %v465_v3  ;;  %v10699_v8 = vsel %vm463_vm0, 0.0, %v464_v2  ;;  %v471_v9 = vsel %vm463_vm0, %v465_v3, 0.0  ;;  %682 = vmatpush1.bf16.msra.mxu1 %v8845_v5  ;;  %v8848_v14 = vld [vmem:[#allocation5 + $0x20] ss:$16 sps:$4 sm:$0xff]   ;;  %v8849_v19 = vld [vmem:[#allocation5 + $0x44] ss:$16 sps:$4 sm:$0xff]   ;;  %vm7784_vm11 = vmneg %vm510_vm4 }
 0x10d   : > { %v475_v10 = vrot.slane %v10699_v8, 1  ;;  %v476_v11 = vrot.slane %v10697_v7, 1  ;;  %v478_v12 = vrot.slane %v471_v9, 1  ;;  %v499_v13 = vrot.slane %v10699_v8, 3  ;;  %683 = vmatprep.subr.bf16.mxu1 %v8846_v6  ;;  %v8851_v32 = vld [vmem:[#allocation5 + $0x40] ss:$16 sps:$4 sm:$0xff]  }
 0x10e   : > { %v500_v15 = vrot.slane %v10697_v7, 3  ;;  %v502_v16 = vrot.slane %v471_v9, 3  ;;  %v487_v17 = vrot.slane %v10699_v8, 2  ;;  %v488_v18 = vrot.slane %v10697_v7, 2  ;;  %v8852_v34 = vld [vmem:[#allocation5 + $0x64] ss:$16 sps:$4 sm:$0xff]  }
 0x10f   : > { %v477_v20 = vsel %vm474_vm1, %v475_v10, %v476_v11  ;;  %v479_v21 = vsel %vm474_vm1, %v476_v11, %v478_v12  ;;  %v490_v22 = vrot.slane %v471_v9, 2  ;;  %v511_v23 = vrot.slane %v10699_v8, 4  ;;  %s10323_s25 = smov 48   ;;  %v8854_v39 = vld [vmem:[#allocation5 + $0x60] ss:$16 sps:$4 sm:$0xff]   ;;  %s10325_s14 = smov 32  }
 0x110   : > { %v8783_v24 = vpack.i.bf16 %v479_v21, %v477_v20  ;;  %v501_v25 = vsel %vm498_vm2, %v499_v13, %v500_v15  ;;  %v503_v26 = vsel %vm498_vm2, %v500_v15, %v502_v16  ;;  %v489_v27 = vsel %vm486_vm3, %v487_v17, %v488_v18  ;;  %684 = vmatpush1.bf16.msra.mxu1 %v8848_v14  ;;  %v8855_v40 = vld [vmem:[#allocation5 + $0x84] ss:$16 sps:$4 sm:$0xff]   ;;  %s10326_s3 = smov 64   ;;  %v8857_v41 = vld [vmem:[#allocation5 + $0x80] ss:$16 sps:$4 sm:$0xff]   ;;  %s10327_s22 = smov 96  }
 0x111   : > { %v8793_v28 = vpack.i.bf16 %v503_v26, %v501_v25  ;;  %v491_v29 = vsel %vm486_vm3, %v488_v18, %v490_v22  ;;  %v512_v30 = vrot.slane %v10697_v7, 4  ;;  %v514_v31 = vrot.slane %v471_v9, 4  ;;  %685 = vmatprep.subr.bf16.mxu1 %v8849_v19  ;;  %v8860_v42 = vld [vmem:[#allocation5 + $0xc] ss:$16 sps:$4 sm:$0xff]   ;;  %v8858_v59 = vld [vmem:[#allocation5 + $0x8] ss:$16 sps:$4 sm:$0xff]  }
 0x112   : > { %8784 = vrot.lane.b32.xlu0 %v8783_v24, %s10322_s16  ;;  %v8788_v33 = vpack.i.bf16 %v491_v29, %v489_v27  ;;  %v10324_v37 = vmov 0   ;;  %vm522_vm5 = vcmask 130048   ;;  %vm525_vm6 = vcmask 261120   ;;  %v8863_v62 = vld [vmem:[#allocation5 + $0x2c] ss:$16 sps:$4 sm:$0xff]   ;;  %s8360_s27 = sshll.u32 %s10403_s15, 4 }
 0x113   : > { %8794 = vrot.lane.b32.xlu1 %v8793_v28, %s10323_s25  ;;  %v513_v35 = vsel %vm510_vm4, %v511_v23, %v512_v30  ;;  %v515_v36 = vsel %vm510_vm4, %v512_v30, %v514_v31  ;;  %713 = vmatprep.mubr.bf16.mxu1 %v10324_v37  ;;  %vm528_vm7 = vcmask 392192   ;;  %vm531_vm8 = vcmask 523264   ;;  %v8861_v2 = vld [vmem:[#allocation5 + $0x28] ss:$16 sps:$4 sm:$0xff]   ;;  %v8866_v3 = vld [vmem:[#allocation5 + $0x4c] ss:$16 sps:$4 sm:$0xff]  }
 0x114   : > { %v8798_v38 = vpack.i.bf16 %v515_v36, %v513_v35  ;;  %686 = vmatpush1.bf16.msra.mxu1 %v8851_v32  ;;  %vm677_vm9 = vcmask 654336   ;;  %v8864_v4 = vld [vmem:[#allocation5 + $0x48] ss:$16 sps:$4 sm:$0xff]   ;;  %v8869_v5 = vld [vmem:[#allocation5 + $0x6c] ss:$16 sps:$4 sm:$0xff]   ;;  %v557_v23 = vlaneseq  ;;  %vm839_vm10 = vcmask 785408  }
 0x115   : > { %687 = vmatprep.subr.bf16.mxu1 %v8852_v34  ;;  %v8867_v6 = vld [vmem:[#allocation5 + $0x68] ss:$16 sps:$4 sm:$0xff]   ;;  %v8875_v10 = vld [vmem:[#allocation8 + $0x408] ss:$16 sps:$4 sm:$0xff]   ;;  %v8877_v11 = vld [vmem:[#allocation8 + $0x40c] ss:$16 sps:$4 sm:$0xff]  }
 0x116   : > { %8789 = vrot.lane.b32.xlu0 %v8788_v33, %s10325_s14  ;;  %v8873_v9 = vld [vmem:[#allocation8 + $0x404] ss:$16 sps:$4 sm:$0xff]   ;;  %v8878_v12 = vld [vmem:[#allocation8 + $0x400] ss:$16 sps:$4 sm:$0xff]   ;;  %v8883_v14 = vld [vmem:[#allocation8 + $0x42c] ss:$16 sps:$4 sm:$0xff]  }
 0x117   : > { %8799 = vrot.lane.b32.xlu1 %v8798_v38, %s10326_s3  ;;  %v8879_v13 = vld [vmem:[#allocation8 + $0x424] ss:$16 sps:$4 sm:$0xff]   ;;  %1836 = vmatprep.subr.bf16.mxu0 %v8873_v9  ;;  %v8881_v15 = vld [vmem:[#allocation8 + $0x428] ss:$16 sps:$4 sm:$0xff]   ;;  %v8884_v16 = vld [vmem:[#allocation8 + $0x420] ss:$16 sps:$4 sm:$0xff]  }
 0x118   : > { %688 = vmatpush1.bf16.msra.mxu1 %v8854_v39  ;;  %1837 = vmatpush1.bf16.msra.mxu0 %v8878_v12  ;;  %v8885_v17 = vld [vmem:[#allocation8 + $0x444] ss:$16 sps:$4 sm:$0xff]   ;;  %v8889_v18 = vld [vmem:[#allocation8 + $0x44c] ss:$16 sps:$4 sm:$0xff]   ;;  %v8887_v19 = vld [vmem:[#allocation8 + $0x448] ss:$16 sps:$4 sm:$0xff]  }
 0x119   : > { %689 = vmatprep.subr.bf16.mxu1 %v8855_v40  ;;  %1838 = vmatprep.subr.bf16.mxu0 %v8879_v13  ;;  %v8890_v20 = vld [vmem:[#allocation8 + $0x440] ss:$16 sps:$4 sm:$0xff]   ;;  %v8891_v21 = vld [vmem:[#allocation8 + $0x464] ss:$16 sps:$4 sm:$0xff]   ;;  %v8895_v22 = vld [vmem:[#allocation8 + $0x46c] ss:$16 sps:$4 sm:$0xff]  }
 0x11a   : > { %v8893_v24 = vld [vmem:[#allocation8 + $0x468] ss:$16 sps:$4 sm:$0xff]   ;;  %v8896_v25 = vld [vmem:[#allocation8 + $0x460] ss:$16 sps:$4 sm:$0xff]   ;;  %v8897_v26 = vld [vmem:[#allocation8 + $0x484] ss:$16 sps:$4 sm:$0xff]  }
 0x11b   : > { %v8901_v27 = vld [vmem:[#allocation8 + $0x48c] ss:$16 sps:$4 sm:$0xff]   ;;  %v10724_v28 = vshrl.u32 %v557_v23, 7  ;;  %v8899_v29 = vld [vmem:[#allocation8 + $0x488] ss:$16 sps:$4 sm:$0xff]   ;;  %vm10328_vm12 = vmmov 1  }
 0x11c   : > { %690 = vmatpush1.bf16.msra.mxu1 %v8857_v41  ;;  %1839 = vmatpush1.bf16.msra.mxu0 %v8884_v16  ;;  %v8902_v30 = vld [vmem:[#allocation8 + $0x480] ss:$16 sps:$4 sm:$0xff]   ;;  %v8903_v31 = vld [vmem:[#allocation8 + $0x4a4] ss:$16 sps:$4 sm:$0xff]   ;;  %v8907_v32 = vld [vmem:[#allocation8 + $0x4ac] ss:$16 sps:$4 sm:$0xff]  }
 0x11d   : > { %724 = vmatprep.subr.bf16.mxu1 %v8860_v42  ;;  %1840 = vmatprep.subr.bf16.mxu0 %v8885_v17  ;;  %v8905_v33 = vld [vmem:[#allocation8 + $0x4a8] ss:$16 sps:$4 sm:$0xff]   ;;  %v8908_v34 = vld [vmem:[#allocation8 + $0x4a0] ss:$16 sps:$4 sm:$0xff]   ;;  %v8909_v35 = vld [vmem:[#allocation8 + $0x4c4] ss:$16 sps:$4 sm:$0xff]  }
 0x11e   : > { %v8913_v36 = vld [vmem:[#allocation8 + $0x4cc] ss:$16 sps:$4 sm:$0xff]   ;;  %v8914_v38 = vld [vmem:[#allocation8 + $0x4c0] ss:$16 sps:$4 sm:$0xff]   ;;  %v8915_v39 = vld [vmem:[#allocation8 + $0x4e4] ss:$16 sps:$4 sm:$0xff]  }
 0x11f   : > { %v8919_v40 = vld [vmem:[#allocation8 + $0x4ec] ss:$16 sps:$4 sm:$0xff]   ;;  %v8917_v41 = vld [vmem:[#allocation8 + $0x4e8] ss:$16 sps:$4 sm:$0xff]   ;;  %v8920_v42 = vld [vmem:[#allocation8 + $0x4e0] ss:$16 sps:$4 sm:$0xff]  }
 0x120   : > { %1841 = vmatpush1.bf16.msra.mxu0 %v8890_v20  ;;  %v567_v20 = vsub.s32 2, %v10724_v28  ;;  %vm10913_vm13 = vmpackc.low %vm10328_vm12, %vm7784_vm11  ;;  %vm10330_vm15 = vmmov 0   ;;  %s457_s9 = scalar_lea.vmem [#allocation17], %s10673_s28  ;;  %vm7325_vm0 = vcmask 73728   ;;  %s11177_s20 = sld [smem:[#allocation26_spill]] }
 0x121   : > { %1842 = vmatprep.subr.bf16.mxu0 %v8891_v21  ;;  %v571_v21 = vsub.s32 3, %v10724_v28  ;;  %vm10959_vm14 = vmpackc.low %vm510_vm4, %vm10328_vm12  ;;  %s7340_s1 = sshll.u32 %s457_s9, 4  ;;  %s7328_s15 = scalar_lea.sflag [#allocation4], %s10673_s28  ;;  %s11094_s1 = int_to_ptr.vmem [resolvable:$true] %s7340_s1 }
 0x122   : > { %s10223_s21 = scalar_lea.vmem %s11094_s1, 16  ;;  %p11178_p13 = scmp.ne.s32.totalorder %s11161_s13, 0 }
 0x123   : > { %p10224_p12 = scmp.ne.s32.totalorder %s11094_s1, %s10223_s21  ;;  %s10331_s29 = smov [#allocation17]  }
 0x124   : > { %1843 = vmatpush1.bf16.msra.mxu0 %v8896_v25  ;;  %v8949_v25 = vld [vmem:[#allocation8 + $0x58c] ss:$16 sps:$4 sm:$0xff]   ;;  %s10227_s16 = sshll.u32 %s10331_s29, 4  ;;  %s10228_s16 = int_to_ptr.vmem [resolvable:$false] %s10227_s16 }
 0x125   : > { %1844 = vmatprep.subr.bf16.mxu0 %v8897_v26  ;;  %p10225_p1 = pnand %p10224_p12, %p11178_p13  ;;  %s10229_s25 = scalar_lea.vmem %s10228_s16, 32 }
 0x126   : > { %s11092_s23 = scalar_lea.hbm %s11177_s20, %s8360_s27  ;;  %p10230_p2 = scmp.lt.s32.totalorder %s11094_s1, %s10228_s16 }
 0x127   : > { %p10226_p3 = pneg %p10225_p1  ;;  %p10231_p8 = scmp.lt.s32.totalorder %s10229_s25, %s10223_s21 }
 0x128   : > { %1845 = vmatpush1.bf16.msra.mxu0 %v8902_v30 }
 0x129   : > { %1846 = vmatprep.subr.bf16.mxu0 %v8903_v31  ;;  %p10232_p4 = por %p10231_p8, %p10230_p2 }
 0x12b   : > { %p10233_p10 = pnand %p10232_p4, %p10226_p3 }
 0x12c   : > { %1847 = vmatpush1.bf16.msra.mxu0 %v8908_v34 }
 0x12d   : > { %1848 = vmatprep.subr.bf16.mxu0 %v8909_v35 }
 0x130   : > { %1849 = vmatpush1.bf16.msra.mxu0 %v8914_v38 }
 0x131   : > { %1850 = vmatprep.subr.bf16.mxu0 %v8915_v39 }
 0x134   : > { %1851 = vmatpush1.bf16.msra.mxu0 %v8920_v42  ;;  %v8951_v42 = vld [vmem:[#allocation8 + $0x5a4] ss:$16 sps:$4 sm:$0xff]  }
 0x184   : > { %v8785_v43 = vpop.permute.xlu0 %8784 }
 0x185   : > { %v8795_v44 = vpop.permute.xlu1 %8794  ;;  %v8787_v45 = vunpack.i.h.bf16 %v8785_v43  ;;  %v8786_v46 = vunpack.i.l.bf16 %v8785_v43  ;;  %v8921_v43 = vld [vmem:[#allocation8 + $0x504] ss:$16 sps:$4 sm:$0xff]  }
 0x186   : > { %v8797_v48 = vunpack.i.h.bf16 %v8795_v44  ;;  %v8796_v49 = vunpack.i.l.bf16 %v8795_v44  ;;  %v8925_v44 = vld [vmem:[#allocation8 + $0x50c] ss:$16 sps:$4 sm:$0xff]   ;;  %1852 = vmatprep.subr.bf16.mxu0 %v8921_v43 }
 0x187   : > { %v524_v53 = vsel %vm522_vm5, %v10697_v7, %v8787_v45  ;;  %v523_v54 = vsel %vm522_vm5, %v10699_v8, %v8786_v46  ;;  %v8872_v7 = vld [vmem:[#allocation5 + $0x8c] ss:$16 sps:$4 sm:$0xff]   ;;  %v8870_v8 = vld [vmem:[#allocation5 + $0x88] ss:$16 sps:$4 sm:$0xff]   ;;  %v8926_v46 = vld [vmem:[#allocation8 + $0x500] ss:$16 sps:$4 sm:$0xff]  }
 0x188   : > { %v8790_v47 = vpop.permute.xlu0 %8789  ;;  %v8923_v45 = vld [vmem:[#allocation8 + $0x508] ss:$16 sps:$4 sm:$0xff]   ;;  %1853 = vmatpush1.bf16.msra.mxu0 %v8926_v46  ;;  %v8955_v43 = vld [vmem:[#allocation8 + $0x5ac] ss:$16 sps:$4 sm:$0xff]  }
 0x189   : > { %v8792_v50 = vunpack.i.h.bf16 %v8790_v47  ;;  %v8791_v51 = vunpack.i.l.bf16 %v8790_v47  ;;  %v8800_v52 = vpop.permute.xlu1 %8799  ;;  %v8927_v47 = vld [vmem:[#allocation8 + $0x524] ss:$16 sps:$4 sm:$0xff]   ;;  %v8953_v46 = vld [vmem:[#allocation8 + $0x5a8] ss:$16 sps:$4 sm:$0xff]  }
 0x18a   : > { %v8802_v55 = vunpack.i.h.bf16 %v8800_v52  ;;  %v8801_v56 = vunpack.i.l.bf16 %v8800_v52  ;;  %v8937_v52 = vld [vmem:[#allocation8 + $0x54c] ss:$16 sps:$4 sm:$0xff]   ;;  %1854 = vmatprep.subr.bf16.mxu0 %v8927_v47  ;;  %v8956_v47 = vld [vmem:[#allocation8 + $0x5a0] ss:$16 sps:$4 sm:$0xff]  }
 0x18b   : > { %v526_v57 = vsel %vm525_vm6, %v523_v54, %v8791_v51  ;;  %v527_v58 = vsel %vm525_vm6, %v524_v53, %v8792_v50  ;;  %v8932_v50 = vld [vmem:[#allocation8 + $0x520] ss:$16 sps:$4 sm:$0xff]   ;;  %v8933_v51 = vld [vmem:[#allocation8 + $0x544] ss:$16 sps:$4 sm:$0xff]   ;;  %v8935_v53 = vld [vmem:[#allocation8 + $0x548] ss:$16 sps:$4 sm:$0xff]  }
 0x18c   : > { %v529_v60 = vsel %vm528_vm7, %v526_v57, %v8796_v49  ;;  %v530_v61 = vsel %vm528_vm7, %v527_v58, %v8797_v48  ;;  %v8931_v48 = vld [vmem:[#allocation8 + $0x52c] ss:$16 sps:$4 sm:$0xff]   ;;  %v8929_v49 = vld [vmem:[#allocation8 + $0x528] ss:$16 sps:$4 sm:$0xff]   ;;  %v8938_v54 = vld [vmem:[#allocation8 + $0x540] ss:$16 sps:$4 sm:$0xff]   ;;  %1855 = vmatpush1.bf16.msra.mxu0 %v8932_v50 }
 0x18d   : > { %v532_v63 = vsel %vm531_vm8, %v529_v60, %v8801_v56  ;;  %v533_v0 = vsel %vm531_vm8, %v530_v61, %v8802_v55  ;;  %v8939_v55 = vld [vmem:[#allocation8 + $0x564] ss:$16 sps:$4 sm:$0xff]   ;;  %v8943_v56 = vld [vmem:[#allocation8 + $0x56c] ss:$16 sps:$4 sm:$0xff]   ;;  %1856 = vmatprep.subr.bf16.mxu0 %v8933_v51  ;;  %v8941_v57 = vld [vmem:[#allocation8 + $0x568] ss:$16 sps:$4 sm:$0xff]  }
 0x18e   : > { %v534_v1 = vpack.c.bf16 %v533_v0, %v532_v63  ;;  %v8944_v58 = vld [vmem:[#allocation8 + $0x560] ss:$16 sps:$4 sm:$0xff]   ;;  %v555_v60 = vld [vmem:[#allocation7] sm:$0xf]  ;;  %v563_v61 = vsub.s32 1, %v10724_v28 }
 0x18f   : > { %v572_v23 = vrot.slane %v555_v60, %v571_v21 }
 0x190   : > { %7526 = vmatmul.mubr.msk.bf16.vlgmr.msra.gmra.mrb[0].mxu1 %vm677_vm9, %v534_v1  ;;  %1857 = vmatpush1.bf16.msra.mxu0 %v8938_v54  ;;  %v564_v63 = vrot.slane %v555_v60, %v563_v61 }
 0x191   : > { %725 = vmatpush1.bf16.msra.mxu1 %v8858_v59  ;;  %756 = vmatprep.mubr.bf16.mxu1 %v10324_v37  ;;  %v8911_v37 = vld [vmem:[#allocation8 + $0x4c8] ss:$16 sps:$4 sm:$0xff]   ;;  %v559_v59 = vsub.s32 0, %v10724_v28 }
 0x192   : > { %726 = vmatprep.subr.bf16.mxu1 %v8863_v62  ;;  %1858 = vmatprep.subr.bf16.mxu0 %v8939_v55 }
 0x193   : > { %v560_v62 = vrot.slane %v555_v60, %v559_v59 }
 0x194   : > { %1859 = vmatpush1.bf16.msra.mxu0 %v8944_v58  ;;  %v8957_v58 = vld [vmem:[#allocation8 + $0x5c4] ss:$16 sps:$4 sm:$0xff]  }
 0x195   : > { %727 = vmatpush1.bf16.msra.mxu1 %v8861_v2 }
 0x196   : > { %728 = vmatprep.subr.bf16.mxu1 %v8866_v3 }
 0x199   : > { %729 = vmatpush1.bf16.msra.mxu1 %v8864_v4 }
 0x19a   : > { %730 = vmatprep.subr.bf16.mxu1 %v8869_v5 }
 0x19d   : > { %731 = vmatpush1.bf16.msra.mxu1 %v8867_v6 }
 0x19e   : > { %732 = vmatprep.subr.bf16.mxu1 %v8872_v7 }
 0x1a1   : > { %733 = vmatpush1.bf16.msra.mxu1 %v8870_v8 }
 0x1a2   : > { %1922 = vmatprep.subr.bf16.mxu1 %v8877_v11 }
 0x1a4   : > { %7527 = vmatmul.mubr.msk.bf16.vlgmr.msra.gmra.mrb[4].mxu1 %vm677_vm9, %v534_v1 }
 0x1a5   : > { %1923 = vmatpush1.bf16.msra.mxu1 %v8875_v10 }
 0x1a6   : > { %1924 = vmatprep.subr.bf16.mxu1 %v8883_v14 }
 0x1a9   : > { %1925 = vmatpush1.bf16.msra.mxu1 %v8881_v15 }
 0x1aa   : > { %1926 = vmatprep.subr.bf16.mxu1 %v8889_v18 }
 0x1ad   : > { %1927 = vmatpush1.bf16.msra.mxu1 %v8887_v19 }
 0x1ae   : > { %1928 = vmatprep.subr.bf16.mxu1 %v8895_v22  ;;  %v568_v22 = vrot.slane %v555_v60, %v567_v20  ;;  %v8961_v60 = vld [vmem:[#allocation8 + $0x5cc] ss:$16 sps:$4 sm:$0xff]  }
 0x1b1   : > { %1929 = vmatpush1.bf16.msra.mxu1 %v8893_v24  ;;  %v8945_v24 = vld [vmem:[#allocation8 + $0x584] ss:$16 sps:$4 sm:$0xff]  }
 0x1b2   : > { %1930 = vmatprep.subr.bf16.mxu1 %v8901_v27  ;;  %v8947_v27 = vld [vmem:[#allocation8 + $0x588] ss:$16 sps:$4 sm:$0xff]   ;;  %1860 = vmatprep.subr.bf16.mxu0 %v8945_v24 }
 0x1b5   : > { %1931 = vmatpush1.bf16.msra.mxu1 %v8899_v29  ;;  %v8950_v29 = vld [vmem:[#allocation8 + $0x580] ss:$16 sps:$4 sm:$0xff]  }
 0x1b6   : > { %1932 = vmatprep.subr.bf16.mxu1 %v8907_v32  ;;  %1861 = vmatpush1.bf16.msra.mxu0 %v8950_v29 }
 0x1b7   : > { %1862 = vmatprep.subr.bf16.mxu0 %v8951_v42 }
 0x1b9   : > { %1933 = vmatpush1.bf16.msra.mxu1 %v8905_v33 }
 0x1ba   : > { %1934 = vmatprep.subr.bf16.mxu1 %v8913_v36  ;;  %1863 = vmatpush1.bf16.msra.mxu0 %v8956_v47 }
 0x1bb   : > { %1864 = vmatprep.subr.bf16.mxu0 %v8957_v58 }
 0x1bd   : > { %1935 = vmatpush1.bf16.msra.mxu1 %v8911_v37 }
 0x1be   : > { %1936 = vmatprep.subr.bf16.mxu1 %v8919_v40 }
 0x1c1   : > { %1937 = vmatpush1.bf16.msra.mxu1 %v8917_v41 }
 0x1c2   : > { %1938 = vmatprep.subr.bf16.mxu1 %v8925_v44 }
 0x1c5   : > { %1939 = vmatpush1.bf16.msra.mxu1 %v8923_v45 }
 0x1c6   : > { %1940 = vmatprep.subr.bf16.mxu1 %v8931_v48 }
 0x1c9   : > { %1941 = vmatpush1.bf16.msra.mxu1 %v8929_v49 }
 0x1ca   : > { %1942 = vmatprep.subr.bf16.mxu1 %v8937_v52 }
 0x1cd   : > { %1943 = vmatpush1.bf16.msra.mxu1 %v8935_v53 }
 0x1ce   : > { %1944 = vmatprep.subr.bf16.mxu1 %v8943_v56 }
 0x1d1   : > { %1945 = vmatpush1.bf16.msra.mxu1 %v8941_v57 }
 0x1d2   : > { %1946 = vmatprep.subr.bf16.mxu1 %v8949_v25 }
 0x1d5   : > { %1947 = vmatpush1.bf16.msra.mxu1 %v8947_v27 }
 0x1d6   : > { %1948 = vmatprep.subr.bf16.mxu1 %v8955_v43 }
 0x1d9   : > { %1949 = vmatpush1.bf16.msra.mxu1 %v8953_v46 }
 0x1da   : > { %1950 = vmatprep.subr.bf16.mxu1 %v8961_v60 }
 0x263   : > { %v715_v0 = vpop.f32.mrb[0].mxu1 }
 0x264   : > { %v716_v1 = vadd.f32 %v715_v0, %v560_v62  ;;  %v717_v2 = vpop.f32.mrb[1].mxu1  ;;  %v8959_v0 = vld [vmem:[#allocation8 + $0x5c8] ss:$16 sps:$4 sm:$0xff]  }
 0x265   : > { %v718_v3 = vadd.f32 %v717_v2, %v564_v63  ;;  %v719_v4 = vpop.f32.mrb[2].mxu1  ;;  %1951 = vmatpush1.bf16.msra.mxu1 %v8959_v0 }
 0x266   : > { %v767_v5 = vmax.f32 %v716_v1, 0.0  ;;  %v720_v6 = vadd.f32 %v719_v4, %v560_v62  ;;  %v721_v7 = vpop.f32.mrb[3].mxu1  ;;  %v8962_v1 = vld [vmem:[#allocation8 + $0x5c0] ss:$16 sps:$4 sm:$0xff]  }
 0x267   : > { %v768_v8 = vmax.f32 %v718_v3, 0.0  ;;  %v722_v9 = vadd.f32 %v721_v7, %v564_v63  ;;  %1865 = vmatpush1.bf16.msra.mxu0 %v8962_v1  ;;  %v8965_v7 = vld [vmem:[#allocation8 + $0x5e8] ss:$16 sps:$4 sm:$0xff]  }
 0x268   : > { %v771_v10 = vmax.f32 %v720_v6, 0.0  ;;  %v783_v12 = vrot.slane %v767_v5, 1  ;;  %v8967_v6 = vld [vmem:[#allocation8 + $0x5ec] ss:$16 sps:$4 sm:$0xff]  }
 0x269   : > { %v772_v11 = vmax.f32 %v722_v9, 0.0  ;;  %v786_v14 = vrot.slane %v768_v8, 1  ;;  %1952 = vmatprep.subr.bf16.mxu1 %v8967_v6 }
 0x26a   : > { %v784_v13 = vrot.slane %v771_v10, 1  ;;  %1953 = vmatpush1.bf16.msra.mxu1 %v8965_v7 }
 0x26b   : > { %v787_v15 = vrot.slane %v772_v11, 1 }
 0x26c   : > { %v785_v16 = vsel %vm474_vm1, %v783_v12, %v784_v13  ;;  %v803_v48 = vsel %vm474_vm1, %v784_v13, 0.0  ;;  %v8974_v12 = vld [vmem:[#allocation8 + $0x60c] ss:$16 sps:$4 sm:$0xff]  }
 0x26d   : > { %v788_v17 = vsel %vm474_vm1, %v786_v14, %v787_v15  ;;  %v10734_v18 = vmax.f32 %v767_v5, %v785_v16  ;;  %v804_v40 = vsel %vm474_vm1, %v787_v15, 0.0  ;;  %v10754_v62 = vmax.f32 %v771_v10, %v803_v48  ;;  %v8963_v5 = vld [vmem:[#allocation8 + $0x5e4] ss:$16 sps:$4 sm:$0xff]   ;;  %1965 = vmatprep.subr.bf16.mxu1 %v8974_v12 }
 0x26e   : > { %v10736_v19 = vmax.f32 %v768_v8, %v788_v17  ;;  %v812_v51 = vmax.f32 %v772_v11, %v804_v40  ;;  %v8968_v8 = vld [vmem:[#allocation8 + $0x5e0] ss:$16 sps:$4 sm:$0xff]   ;;  %1866 = vmatprep.subr.bf16.mxu0 %v8963_v5  ;;  %v8971_v11 = vld [vmem:[#allocation8 + $0x604] ss:$16 sps:$4 sm:$0xff]  }
 0x26f   : > { %v8813_v10 = vpack.i.bf16 %v10754_v62, %v10734_v18  ;;  %1867 = vmatpush1.bf16.msra.mxu0 %v8968_v8 }
 0x270   : > { %1879 = vmatprep.subr.bf16.mxu0 %v8971_v11 }
 0x277   : > { %v758_v26 = vpop.f32.mrb[4].mxu1 }
 0x278   : > { %v759_v30 = vadd.f32 %v758_v26, %v568_v22  ;;  %v760_v31 = vpop.f32.mrb[5].mxu1 }
 0x279   : > { %v761_v32 = vadd.f32 %v760_v31, %v572_v23  ;;  %v762_v33 = vpop.f32.mrb[6].mxu1 }
 0x27a   : > { %v769_v34 = vmax.f32 %v759_v30, 0.0  ;;  %v763_v35 = vadd.f32 %v762_v33, %v568_v22  ;;  %v764_v36 = vpop.f32.mrb[7].mxu1 }
 0x27b   : > { %v770_v37 = vmax.f32 %v761_v32, 0.0  ;;  %v765_v38 = vadd.f32 %v764_v36, %v572_v23 }
 0x27c   : > { %v773_v39 = vmax.f32 %v763_v35, 0.0  ;;  %v789_v44 = vrot.slane %v769_v34, 1 }
 0x27d   : > { %v774_v41 = vmax.f32 %v765_v38, 0.0  ;;  %v792_v49 = vrot.slane %v770_v37, 1 }
 0x27e   : > { %v790_v45 = vrot.slane %v773_v39, 1 }
 0x27f   : > { %v793_v50 = vrot.slane %v774_v41, 1 }
 0x280   : > { %v805_v52 = vsel %vm474_vm1, %v790_v45, 0.0  ;;  %v791_v53 = vsel %vm474_vm1, %v789_v44, %v790_v45 }
 0x281   : > { %v10748_v54 = vmax.f32 %v773_v39, %v805_v52  ;;  %v806_v55 = vsel %vm474_vm1, %v793_v50, 0.0  ;;  %v10751_v56 = vmax.f32 %v769_v34, %v791_v53  ;;  %v794_v57 = vsel %vm474_vm1, %v792_v49, %v793_v50 }
 0x282   : > { %v10756_v63 = vmax.f32 %v770_v37, %v794_v57  ;;  %v814_v2 = vmax.f32 %v774_v41, %v806_v55 }
 0x283   : > { %v8808_v3 = vpack.i.bf16 %v10748_v54, %v812_v51  ;;  %v8803_v4 = vpack.i.bf16 %v10751_v56, %v10736_v19 }
 0x284   : > { %v8818_v9 = vpack.i.bf16 %v814_v2, %v10756_v63 }
 0x285   : > { %8809 = vrot.lane.b32.xlu1 %v8808_v3, %s10327_s22  ;;  %8804 = vrot.lane.b32.xlu0 %v8803_v4, %s10327_s22 }
 0x289   : > { %8819 = vrot.lane.b32.xlu1 %v8818_v9, %s10327_s22  ;;  %8814 = vrot.lane.b32.xlu0 %v8813_v10, %s10327_s22 }
 0x2f7   : > { %v8810_v13 = vpop.permute.xlu1 %8809  ;;  %v8805_v14 = vpop.permute.xlu0 %8804 }
 0x2f8   : > { %v8812_v15 = vunpack.i.h.bf16 %v8810_v13  ;;  %v8811_v16 = vunpack.i.l.bf16 %v8810_v13  ;;  %v8807_v17 = vunpack.i.h.bf16 %v8805_v14  ;;  %v8806_v22 = vunpack.i.l.bf16 %v8805_v14 }
 0x2fa   : > { %v844_v23 = vsel %vm839_vm10, %v8811_v16, %v8812_v15  ;;  %v841_v24 = vsel %vm839_vm10, %v8806_v22, %v8807_v17 }
 0x2fb   : > { %v863_v25 = vmax.f32 %v812_v51, %v844_v23  ;;  %v859_v26 = vmax.f32 %v10736_v19, %v841_v24  ;;  %v8820_v27 = vpop.permute.xlu1 %8819  ;;  %v8815_v29 = vpop.permute.xlu0 %8814 }
 0x2fc   : > { %v8822_v30 = vunpack.i.h.bf16 %v8820_v27  ;;  %v8821_v31 = vunpack.i.l.bf16 %v8820_v27  ;;  %v8817_v32 = vunpack.i.h.bf16 %v8815_v29  ;;  %v8816_v33 = vunpack.i.l.bf16 %v8815_v29  ;;  %v8977_v27 = vld [vmem:[#allocation8 + $0x624] ss:$16 sps:$4 sm:$0xff]  }
 0x2fd   : > { %v10767_v34 = vrot.slane %v863_v25, 4  ;;  %v875_v35 = vrot.slane %v859_v26, 4 }
 0x2fe   : > { %v842_v36 = vsel %vm839_vm10, %v8807_v17, %v8821_v31  ;;  %v845_v37 = vsel %vm839_vm10, %v8812_v15, %v8822_v30  ;;  %v843_v38 = vsel %vm839_vm10, %v8817_v32, %v8811_v16  ;;  %v857_v39 = vsel %vm839_vm10, %v8822_v30, %v8817_v32  ;;  %v8969_v16 = vld [vmem:[#allocation8 + $0x600] ss:$16 sps:$4 sm:$0xff]   ;;  %v8972_v17 = vld [vmem:[#allocation8 + $0x608] ss:$16 sps:$4 sm:$0xff]  }
 0x2ff   : > { %v860_v40 = vmax.f32 %v10751_v56, %v842_v36  ;;  %v864_v19 = vmax.f32 %v10748_v54, %v845_v37  ;;  %v862_v41 = vmax.f32 %v10754_v62, %v843_v38  ;;  %v865_v42 = vmax.f32 %v814_v2, %v857_v39  ;;  %v8975_v39 = vld [vmem:[#allocation8 + $0x620] ss:$16 sps:$4 sm:$0xff]  }
 0x300   : > { %v840_v43 = vsel %vm839_vm10, %v8816_v33, %v8806_v22  ;;  %v856_v44 = vsel %vm839_vm10, %v8821_v31, %v8816_v33  ;;  %v10780_v45 = vsel %vm510_vm4, %v875_v35, %v10767_v34  ;;  %v899_v46 = vsel %vm510_vm4, 0.0, %v875_v35  ;;  %v8980_v33 = vld [vmem:[#allocation8 + $0x62c] ss:$16 sps:$4 sm:$0xff]  }
 0x301   : > { %v876_v47 = vrot.slane %v860_v40, 4  ;;  %v10783_v48 = vrot.slane %v864_v19, 4  ;;  %v10785_v49 = vrot.slane %v862_v41, 4  ;;  %v10787_v50 = vrot.slane %v865_v42, 4  ;;  %v8978_v42 = vld [vmem:[#allocation8 + $0x628] ss:$16 sps:$4 sm:$0xff]  }
 0x302   : > { %v858_v51 = vmax.f32 %v10734_v18, %v840_v43  ;;  %v861_v52 = vmax.f32 %v10756_v63, %v856_v44  ;;  %v903_v53 = vsel %vm510_vm4, %v10767_v34, 0.0  ;;  %v10794_v54 = vpack.c.bf16 %v10780_v45, %v899_v46  ;;  %v8983_v43 = vld [vmem:[#allocation8 + $0x644] ss:$16 sps:$4 sm:$0xff]  }
 0x303   : > { %v10798_v55 = vsel %vm510_vm4, %v876_v47, %v10783_v48  ;;  %v900_v56 = vsel %vm510_vm4, 0.0, %v876_v47  ;;  %v904_v57 = vsel %vm510_vm4, %v10783_v48, 0.0  ;;  %v10803_v58 = vpack.c.bf16 %v903_v53, %v903_v53 }
 0x304   : > { %v874_v18 = vrot.slane %v858_v51, 4  ;;  %v877_v60 = vrot.slane %v861_v52, 4  ;;  %v1183_v62 = vrot.slane %v10794_v54, 1  ;;  %v902_v63 = vsel %vm510_vm4, %v10785_v49, 0.0  ;;  %v8986_v52 = vld [vmem:[#allocation8 + $0x64c] ss:$16 sps:$4 sm:$0xff]  }
 0x305   : > { %v1184_v0 = vrot.slane %v10803_v58, 1  ;;  %v10809_v1 = vpack.c.bf16 %v902_v63, %v902_v63  ;;  %v905_v2 = vsel %vm510_vm4, %v10787_v50, 0.0  ;;  %v10814_v3 = vpack.c.bf16 %v10798_v55, %v900_v56 }
 0x306   : > { %v879_v4 = vsel %vm510_vm4, %v874_v18, %v10785_v49  ;;  %v10820_v5 = vsel %vm510_vm4, %v877_v60, %v10787_v50  ;;  %v898_v6 = vsel %vm510_vm4, 0.0, %v874_v18  ;;  %v901_v7 = vsel %vm510_vm4, 0.0, %v877_v60 }
 0x307   : > { %v1185_v8 = vsel %vm474_vm1, %v1183_v62, %v1184_v0  ;;  %v10825_v9 = vpack.c.bf16 %v879_v4, %v898_v6  ;;  %v1181_v10 = vrot.slane %v10809_v1, 1  ;;  %v10829_v11 = vpack.c.bf16 %v10820_v5, %v901_v7  ;;  %v8981_v6 = vld [vmem:[#allocation8 + $0x640] ss:$16 sps:$4 sm:$0xff]   ;;  %v8984_v7 = vld [vmem:[#allocation8 + $0x648] ss:$16 sps:$4 sm:$0xff]  }
 0x308   : > { %1868 = vmatprep.mubr.bf16.mxu0 %v1185_v8  ;;  %1954 = vmatprep.mubr.bf16.mxu1 %v1185_v8  ;;  %v10831_v12 = vpack.c.bf16 %v905_v2, %v905_v2  ;;  %v10833_v13 = vpack.c.bf16 %v904_v57, %v904_v57  ;;  %v1186_v14 = vrot.slane %v10814_v3, 1  ;;  %v10837_v15 = vpack.c.bf16 %v10780_v45, %v875_v35 }
 0x309   : > { %v1180_v22 = vrot.slane %v10825_v9, 1  ;;  %v1189_v23 = vrot.slane %v10829_v11, 1  ;;  %v10841_v24 = vpack.c.bf16 %v879_v4, %v874_v18  ;;  %v10844_v25 = vpack.c.bf16 %v10820_v5, %v877_v60 }
 0x30a   : > { %v1190_v26 = vrot.slane %v10831_v12, 1  ;;  %v1187_v29 = vrot.slane %v10833_v13, 1  ;;  %v10849_v30 = vpack.c.bf16 %v10798_v55, %v876_v47  ;;  %v2953_v31 = vrot.slane %v10794_v54, 2 }
 0x30b   : > { %v1182_v32 = vsel %vm474_vm1, %v1180_v22, %v1181_v10  ;;  %v2954_v35 = vrot.slane %v10803_v58, 2  ;;  %v2950_v36 = vrot.slane %v10825_v9, 2  ;;  %v2951_v37 = vrot.slane %v10809_v1, 2  ;;  %v9007_v22 = vld [vmem:[#allocation8 + $0x6c4] ss:$16 sps:$4 sm:$0xff]  }
 0x30c   : > { %1869 = vmatmul.mubr.bf16.vlgmr.msra.gmra.mrb[0].mxu0 %v1182_v32  ;;  %1955 = vmatmul.mubr.bf16.vlgmr.msra.gmra.mrb[8].mxu1 %v1182_v32  ;;  %v1191_v38 = vsel %vm474_vm1, %v1189_v23, %v1190_v26  ;;  %v10858_v40 = vsel %vm474_vm1, %v1186_v14, %v1187_v29  ;;  %v2959_v19 = vrot.slane %v10829_v11, 2  ;;  %v2960_v41 = vrot.slane %v10831_v12, 2  ;;  %v9004_v14 = vld [vmem:[#allocation8 + $0x6ac] ss:$16 sps:$4 sm:$0xff]   ;;  %v9005_v26 = vld [vmem:[#allocation8 + $0x6c0] ss:$16 sps:$4 sm:$0xff]  }
 0x30d   : > { %1880 = vmatpush1.bf16.msra.mxu0 %v8969_v16  ;;  %1966 = vmatpush1.bf16.msra.mxu1 %v8972_v17  ;;  %v10863_v44 = vsel %vm486_vm3, %v2953_v31, %v2954_v35  ;;  %v10866_v46 = vsel %vm486_vm3, %v2950_v36, %v2951_v37  ;;  %v2956_v47 = vrot.slane %v10814_v3, 2  ;;  %v2957_v51 = vrot.slane %v10833_v13, 2  ;;  %v8999_v16 = vld [vmem:[#allocation8 + $0x6a0] ss:$16 sps:$4 sm:$0xff]   ;;  %v9002_v17 = vld [vmem:[#allocation8 + $0x6a8] ss:$16 sps:$4 sm:$0xff]  }
 0x30e   : > { %1911 = vmatprep.mubr.bf16.mxu0 %v1191_v38  ;;  %1997 = vmatprep.mubr.bf16.mxu1 %v1191_v38  ;;  %v10871_v53 = vsel %vm486_vm3, %v2959_v19, %v2960_v41  ;;  %v3919_v56 = vrot.slane %v10794_v54, 3  ;;  %v3920_v57 = vrot.slane %v10803_v58, 3  ;;  %v3916_v18 = vrot.slane %v10825_v9, 3  ;;  %v9010_v23 = vld [vmem:[#allocation8 + $0x6cc] ss:$16 sps:$4 sm:$0xff]  }
 0x30f   : > { %1881 = vmatprep.subr.bf16.mxu0 %v8977_v27  ;;  %1967 = vmatprep.subr.bf16.mxu1 %v8980_v33  ;;  %v10877_v60 = vsel %vm486_vm3, %v2956_v47, %v2957_v51  ;;  %v10881_v62 = vpack.c.bf16 %v10767_v34, %v10780_v45  ;;  %v10884_v63 = vpack.c.bf16 %v10785_v49, %v879_v4  ;;  %v3917_v54 = vrot.slane %v10809_v1, 3  ;;  %v8989_v1 = vld [vmem:[#allocation8 + $0x664] ss:$16 sps:$4 sm:$0xff]   ;;  %v8992_v4 = vld [vmem:[#allocation8 + $0x66c] ss:$16 sps:$4 sm:$0xff]  }
 0x310   : > { %v10887_v0 = vsel %vm498_vm2, %v3919_v56, %v3920_v57  ;;  %v3925_v58 = vrot.slane %v10829_v11, 3  ;;  %v3926_v2 = vrot.slane %v10831_v12, 3  ;;  %v3922_v8 = vrot.slane %v10814_v3, 3  ;;  %v8993_v11 = vld [vmem:[#allocation8 + $0x680] ss:$16 sps:$4 sm:$0xff]  }
 0x311   : > { %1882 = vmatpush1.bf16.msra.mxu0 %v8975_v39  ;;  %1968 = vmatpush1.bf16.msra.mxu1 %v8978_v42  ;;  %v3923_v34 = vrot.slane %v10833_v13, 3  ;;  %v10896_v45 = vpack.c.bf16 %v10787_v50, %v10820_v5  ;;  %v10900_v49 = vpack.c.bf16 %v10783_v48, %v10798_v55  ;;  %v10903_v9 = vsel %vm498_vm2, %v3916_v18, %v3917_v54  ;;  %v8987_v50 = vld [vmem:[#allocation8 + $0x660] ss:$16 sps:$4 sm:$0xff]   ;;  %v8990_v5 = vld [vmem:[#allocation8 + $0x668] ss:$16 sps:$4 sm:$0xff]  }
 0x312   : > { %1883 = vmatprep.subr.bf16.mxu0 %v8983_v43  ;;  %1969 = vmatprep.subr.bf16.mxu1 %v8986_v52  ;;  %v10906_v10 = vsel %vm498_vm2, %v3925_v58, %v3926_v2  ;;  %v8995_v48 = vld [vmem:[#allocation8 + $0x684] ss:$16 sps:$4 sm:$0xff]   ;;  %v8998_v55 = vld [vmem:[#allocation8 + $0x68c] ss:$16 sps:$4 sm:$0xff]   ;;  %v8996_v12 = vld [vmem:[#allocation8 + $0x688] ss:$16 sps:$4 sm:$0xff]  }
 0x313   : > { %v10909_v3 = vsel %vm498_vm2, %v3922_v8, %v3923_v34  ;;  %v9001_v13 = vld [vmem:[#allocation8 + $0x6a4] ss:$16 sps:$4 sm:$0xff]   ;;  %v9008_v27 = vld [vmem:[#allocation8 + $0x6c8] ss:$16 sps:$4 sm:$0xff]   ;;  %v9016_v31 = vld [vmem:[#allocation8 + $0x6ec] ss:$16 sps:$4 sm:$0xff]  }
 0x314   : > { %v9013_v29 = vld [vmem:[#allocation8 + $0x6e4] ss:$16 sps:$4 sm:$0xff]   ;;  %v9011_v32 = vld [vmem:[#allocation8 + $0x6e0] ss:$16 sps:$4 sm:$0xff]   ;;  %v9014_v33 = vld [vmem:[#allocation8 + $0x6e8] ss:$16 sps:$4 sm:$0xff]  }
 0x315   : > { %1884 = vmatpush1.bf16.msra.mxu0 %v8981_v6  ;;  %1970 = vmatpush1.bf16.msra.mxu1 %v8984_v7  ;;  %v9019_v35 = vld [vmem:[#allocation8 + $0x704] ss:$16 sps:$4 sm:$0xff]   ;;  %v9022_v36 = vld [vmem:[#allocation8 + $0x70c] ss:$16 sps:$4 sm:$0xff]   ;;  %v9017_v37 = vld [vmem:[#allocation8 + $0x700] ss:$16 sps:$4 sm:$0xff]  }
 0x316   : > { %1885 = vmatprep.subr.bf16.mxu0 %v8989_v1  ;;  %1971 = vmatprep.subr.bf16.mxu1 %v8992_v4  ;;  %v9020_v38 = vld [vmem:[#allocation8 + $0x708] ss:$16 sps:$4 sm:$0xff]   ;;  %v9025_v39 = vld [vmem:[#allocation8 + $0x724] ss:$16 sps:$4 sm:$0xff]   ;;  %v9028_v19 = vld [vmem:[#allocation8 + $0x72c] ss:$16 sps:$4 sm:$0xff]  }
 0x317   : > { %v9023_v41 = vld [vmem:[#allocation8 + $0x720] ss:$16 sps:$4 sm:$0xff]   ;;  %v9026_v42 = vld [vmem:[#allocation8 + $0x728] ss:$16 sps:$4 sm:$0xff]   ;;  %v9031_v43 = vld [vmem:[#allocation8 + $0x744] ss:$16 sps:$4 sm:$0xff]  }
 0x318   : > { %v9034_v47 = vld [vmem:[#allocation8 + $0x74c] ss:$16 sps:$4 sm:$0xff]   ;;  %v9029_v51 = vld [vmem:[#allocation8 + $0x740] ss:$16 sps:$4 sm:$0xff]   ;;  %v9032_v52 = vld [vmem:[#allocation8 + $0x748] ss:$16 sps:$4 sm:$0xff]  }
 0x319   : > { %1886 = vmatpush1.bf16.msra.mxu0 %v8987_v50  ;;  %1972 = vmatpush1.bf16.msra.mxu1 %v8990_v5  ;;  %v9037_v56 = vld [vmem:[#allocation8 + $0x764] ss:$16 sps:$4 sm:$0xff]   ;;  %v9040_v57 = vld [vmem:[#allocation8 + $0x76c] ss:$16 sps:$4 sm:$0xff]   ;;  %v9035_v18 = vld [vmem:[#allocation8 + $0x760] ss:$16 sps:$4 sm:$0xff]  }
 0x31a   : > { %1887 = vmatprep.subr.bf16.mxu0 %v8995_v48  ;;  %1973 = vmatprep.subr.bf16.mxu1 %v8998_v55  ;;  %v9038_v54 = vld [vmem:[#allocation8 + $0x768] ss:$16 sps:$4 sm:$0xff]   ;;  %v9043_v58 = vld [vmem:[#allocation8 + $0x784] ss:$16 sps:$4 sm:$0xff]   ;;  %v9046_v2 = vld [vmem:[#allocation8 + $0x78c] ss:$16 sps:$4 sm:$0xff]  }
 0x31b   : > { %v9041_v6 = vld [vmem:[#allocation8 + $0x780] ss:$16 sps:$4 sm:$0xff]   ;;  %v9044_v7 = vld [vmem:[#allocation8 + $0x788] ss:$16 sps:$4 sm:$0xff]   ;;  %v9049_v8 = vld [vmem:[#allocation8 + $0x7a4] ss:$16 sps:$4 sm:$0xff]  }
 0x31c   : > { %v9052_v34 = vld [vmem:[#allocation8 + $0x7ac] ss:$16 sps:$4 sm:$0xff]   ;;  %v9047_v1 = vld [vmem:[#allocation8 + $0x7a0] ss:$16 sps:$4 sm:$0xff]   ;;  %v9050_v4 = vld [vmem:[#allocation8 + $0x7a8] ss:$16 sps:$4 sm:$0xff]  }
 0x31d   : > { %1888 = vmatpush1.bf16.msra.mxu0 %v8993_v11  ;;  %1974 = vmatpush1.bf16.msra.mxu1 %v8996_v12  ;;  %v9055_v50 = vld [vmem:[#allocation8 + $0x7c4] ss:$16 sps:$4 sm:$0xff]   ;;  %v9058_v5 = vld [vmem:[#allocation8 + $0x7cc] ss:$16 sps:$4 sm:$0xff]   ;;  %v9053_v48 = vld [vmem:[#allocation8 + $0x7c0] ss:$16 sps:$4 sm:$0xff]  }
 0x31e   : > { %1889 = vmatprep.subr.bf16.mxu0 %v9001_v13  ;;  %1975 = vmatprep.subr.bf16.mxu1 %v9004_v14  ;;  %v9056_v55 = vld [vmem:[#allocation8 + $0x7c8] ss:$16 sps:$4 sm:$0xff]   ;;  %v9061_v11 = vld [vmem:[#allocation8 + $0x7e4] ss:$16 sps:$4 sm:$0xff]   ;;  %v9064_v12 = vld [vmem:[#allocation8 + $0x7ec] ss:$16 sps:$4 sm:$0xff]  }
 0x31f   : > { %v9059_v13 = vld [vmem:[#allocation8 + $0x7e0] ss:$16 sps:$4 sm:$0xff]   ;;  %v9062_v14 = vld [vmem:[#allocation8 + $0x7e8] ss:$16 sps:$4 sm:$0xff]  }
 0x321   : > { %1890 = vmatpush1.bf16.msra.mxu0 %v8999_v16  ;;  %1976 = vmatpush1.bf16.msra.mxu1 %v9002_v17  ;;  %v9067_v16 = vld [vmem:[#allocation8 + $0x4] ss:$16 sps:$4 sm:$0xff]   ;;  %v9070_v17 = vld [vmem:[#allocation8 + $0xc] ss:$16 sps:$4 sm:$0xff]  }
 0x322   : > { %1891 = vmatprep.subr.bf16.mxu0 %v9007_v22  ;;  %1977 = vmatprep.subr.bf16.mxu1 %v9010_v23  ;;  %v9065_v22 = vld [vmem:[#allocation8] ss:$16 sps:$4 sm:$0xff]   ;;  %v9068_v23 = vld [vmem:[#allocation8 + $0x8] ss:$16 sps:$4 sm:$0xff]  }
 0x325   : > { %1892 = vmatpush1.bf16.msra.mxu0 %v9005_v26  ;;  %1978 = vmatpush1.bf16.msra.mxu1 %v9008_v27  ;;  %v9073_v27 = vld [vmem:[#allocation8 + $0x24] ss:$16 sps:$4 sm:$0xff]   ;;  %v9275_v26 = vld [vmem:[#allocation8 + $0x860] ss:$16 sps:$4 sm:$0xff]  }
 0x326   : > { %1893 = vmatprep.subr.bf16.mxu0 %v9013_v29  ;;  %1979 = vmatprep.subr.bf16.mxu1 %v9016_v31  ;;  %v9076_v29 = vld [vmem:[#allocation8 + $0x2c] ss:$16 sps:$4 sm:$0xff]   ;;  %v9071_v31 = vld [vmem:[#allocation8 + $0x20] ss:$16 sps:$4 sm:$0xff]  }
 0x329   : > { %1894 = vmatpush1.bf16.msra.mxu0 %v9011_v32  ;;  %1980 = vmatpush1.bf16.msra.mxu1 %v9014_v33  ;;  %v9074_v32 = vld [vmem:[#allocation8 + $0x28] ss:$16 sps:$4 sm:$0xff]   ;;  %v9079_v33 = vld [vmem:[#allocation8 + $0x44] ss:$16 sps:$4 sm:$0xff]  }
 0x32a   : > { %1895 = vmatprep.subr.bf16.mxu0 %v9019_v35  ;;  %1981 = vmatprep.subr.bf16.mxu1 %v9022_v36  ;;  %v9082_v35 = vld [vmem:[#allocation8 + $0x4c] ss:$16 sps:$4 sm:$0xff]   ;;  %v9077_v36 = vld [vmem:[#allocation8 + $0x40] ss:$16 sps:$4 sm:$0xff]  }
 0x32d   : > { %1896 = vmatpush1.bf16.msra.mxu0 %v9017_v37  ;;  %1982 = vmatpush1.bf16.msra.mxu1 %v9020_v38  ;;  %v9085_v37 = vld [vmem:[#allocation8 + $0x64] ss:$16 sps:$4 sm:$0xff]   ;;  %v9088_v38 = vld [vmem:[#allocation8 + $0x6c] ss:$16 sps:$4 sm:$0xff]  }
 0x32e   : > { %1897 = vmatprep.subr.bf16.mxu0 %v9025_v39  ;;  %1983 = vmatprep.subr.bf16.mxu1 %v9028_v19  ;;  %v9083_v39 = vld [vmem:[#allocation8 + $0x60] ss:$16 sps:$4 sm:$0xff]   ;;  %v9086_v19 = vld [vmem:[#allocation8 + $0x68] ss:$16 sps:$4 sm:$0xff]  }
 0x331   : > { %1898 = vmatpush1.bf16.msra.mxu0 %v9023_v41  ;;  %1984 = vmatpush1.bf16.msra.mxu1 %v9026_v42  ;;  %v9091_v41 = vld [vmem:[#allocation8 + $0x84] ss:$16 sps:$4 sm:$0xff]   ;;  %v9089_v42 = vld [vmem:[#allocation8 + $0x80] ss:$16 sps:$4 sm:$0xff]  }
 0x332   : > { %1899 = vmatprep.subr.bf16.mxu0 %v9031_v43  ;;  %1985 = vmatprep.subr.bf16.mxu1 %v9034_v47  ;;  %v9092_v43 = vld [vmem:[#allocation8 + $0x88] ss:$16 sps:$4 sm:$0xff]   ;;  %v9097_v47 = vld [vmem:[#allocation8 + $0xa4] ss:$16 sps:$4 sm:$0xff]  }
 0x335   : > { %1900 = vmatpush1.bf16.msra.mxu0 %v9029_v51  ;;  %1986 = vmatpush1.bf16.msra.mxu1 %v9032_v52  ;;  %v9100_v51 = vld [vmem:[#allocation8 + $0xac] ss:$16 sps:$4 sm:$0xff]   ;;  %v9095_v52 = vld [vmem:[#allocation8 + $0xa0] ss:$16 sps:$4 sm:$0xff]  }
 0x336   : > { %1901 = vmatprep.subr.bf16.mxu0 %v9037_v56  ;;  %1987 = vmatprep.subr.bf16.mxu1 %v9040_v57  ;;  %v9098_v56 = vld [vmem:[#allocation8 + $0xa8] ss:$16 sps:$4 sm:$0xff]   ;;  %v9103_v57 = vld [vmem:[#allocation8 + $0xc4] ss:$16 sps:$4 sm:$0xff]  }
 0x339   : > { %1902 = vmatpush1.bf16.msra.mxu0 %v9035_v18  ;;  %1988 = vmatpush1.bf16.msra.mxu1 %v9038_v54  ;;  %v9106_v18 = vld [vmem:[#allocation8 + $0xcc] ss:$16 sps:$4 sm:$0xff]   ;;  %v9101_v54 = vld [vmem:[#allocation8 + $0xc0] ss:$16 sps:$4 sm:$0xff]  }
 0x33a   : > { %1903 = vmatprep.subr.bf16.mxu0 %v9043_v58  ;;  %1989 = vmatprep.subr.bf16.mxu1 %v9046_v2  ;;  %v9104_v58 = vld [vmem:[#allocation8 + $0xc8] ss:$16 sps:$4 sm:$0xff]   ;;  %v9109_v2 = vld [vmem:[#allocation8 + $0xe4] ss:$16 sps:$4 sm:$0xff]  }
 0x33d   : > { %1904 = vmatpush1.bf16.msra.mxu0 %v9041_v6  ;;  %1990 = vmatpush1.bf16.msra.mxu1 %v9044_v7  ;;  %v9112_v6 = vld [vmem:[#allocation8 + $0xec] ss:$16 sps:$4 sm:$0xff]   ;;  %v9107_v7 = vld [vmem:[#allocation8 + $0xe0] ss:$16 sps:$4 sm:$0xff]  }
 0x33e   : > { %1905 = vmatprep.subr.bf16.mxu0 %v9049_v8  ;;  %1991 = vmatprep.subr.bf16.mxu1 %v9052_v34  ;;  %v9110_v8 = vld [vmem:[#allocation8 + $0xe8] ss:$16 sps:$4 sm:$0xff]   ;;  %v9115_v34 = vld [vmem:[#allocation8 + $0x104] ss:$16 sps:$4 sm:$0xff]  }
 0x341   : > { %1906 = vmatpush1.bf16.msra.mxu0 %v9047_v1  ;;  %1992 = vmatpush1.bf16.msra.mxu1 %v9050_v4  ;;  %v9118_v1 = vld [vmem:[#allocation8 + $0x10c] ss:$16 sps:$4 sm:$0xff]   ;;  %v9113_v4 = vld [vmem:[#allocation8 + $0x100] ss:$16 sps:$4 sm:$0xff]  }
 0x342   : > { %1907 = vmatprep.subr.bf16.mxu0 %v9055_v50  ;;  %1993 = vmatprep.subr.bf16.mxu1 %v9058_v5  ;;  %v9116_v50 = vld [vmem:[#allocation8 + $0x108] ss:$16 sps:$4 sm:$0xff]   ;;  %v9121_v5 = vld [vmem:[#allocation8 + $0x124] ss:$16 sps:$4 sm:$0xff]  }
 0x345   : > { %1908 = vmatpush1.bf16.msra.mxu0 %v9053_v48  ;;  %1994 = vmatpush1.bf16.msra.mxu1 %v9056_v55  ;;  %v9124_v48 = vld [vmem:[#allocation8 + $0x12c] ss:$16 sps:$4 sm:$0xff]   ;;  %v9119_v55 = vld [vmem:[#allocation8 + $0x120] ss:$16 sps:$4 sm:$0xff]  }
 0x346   : > { %1909 = vmatprep.subr.bf16.mxu0 %v9061_v11  ;;  %1995 = vmatprep.subr.bf16.mxu1 %v9064_v12  ;;  %v9122_v11 = vld [vmem:[#allocation8 + $0x128] ss:$16 sps:$4 sm:$0xff]   ;;  %v9127_v12 = vld [vmem:[#allocation8 + $0x144] ss:$16 sps:$4 sm:$0xff]  }
 0x349   : > { %1910 = vmatpush1.bf16.msra.mxu0 %v9059_v13  ;;  %1996 = vmatpush1.bf16.msra.mxu1 %v9062_v14  ;;  %v9130_v13 = vld [vmem:[#allocation8 + $0x14c] ss:$16 sps:$4 sm:$0xff]   ;;  %v9125_v14 = vld [vmem:[#allocation8 + $0x140] ss:$16 sps:$4 sm:$0xff]  }
 0x34a   : > { %2648 = vmatprep.subr.bf16.mxu0 %v9067_v16  ;;  %2734 = vmatprep.subr.bf16.mxu1 %v9070_v17  ;;  %v9128_v16 = vld [vmem:[#allocation8 + $0x148] ss:$16 sps:$4 sm:$0xff]   ;;  %v9133_v17 = vld [vmem:[#allocation8 + $0x164] ss:$16 sps:$4 sm:$0xff]  }
 0x34c   : > { %1912 = vmatmul.mubr.bf16.vlgmr.msra.gmra.mrb[0].mxu0 %v10858_v40  ;;  %1998 = vmatmul.mubr.bf16.vlgmr.msra.gmra.mrb[8].mxu1 %v10858_v40  ;;  %v9080_v40 = vld [vmem:[#allocation8 + $0x48] ss:$16 sps:$4 sm:$0xff]  }
 0x34d   : > { %2649 = vmatpush1.bf16.msra.mxu0 %v9065_v22  ;;  %7787 = vmatprep.mubr.msk.bf16.mxu0 %vm10913_vm13, %v10837_v15  ;;  %v9136_v22 = vld [vmem:[#allocation8 + $0x16c] ss:$16 sps:$4 sm:$0xff]  }
 0x34e   : > { %2735 = vmatpush1.bf16.msra.mxu1 %v9068_v23  ;;  %7803 = vmatprep.mubr.msk.bf16.mxu1 %vm10913_vm13, %v10837_v15  ;;  %v9094_v15 = vld [vmem:[#allocation8 + $0x8c] ss:$16 sps:$4 sm:$0xff]   ;;  %v9131_v23 = vld [vmem:[#allocation8 + $0x160] ss:$16 sps:$4 sm:$0xff]  }
 0x34f   : > { %2650 = vmatprep.subr.bf16.mxu0 %v9073_v27  ;;  %2736 = vmatprep.subr.bf16.mxu1 %v9076_v29  ;;  %v9134_v27 = vld [vmem:[#allocation8 + $0x168] ss:$16 sps:$4 sm:$0xff]   ;;  %v9139_v29 = vld [vmem:[#allocation8 + $0x184] ss:$16 sps:$4 sm:$0xff]  }
 0x351   : > { %2651 = vmatpush1.bf16.msra.mxu0 %v9071_v31  ;;  %v9142_v31 = vld [vmem:[#allocation8 + $0x18c] ss:$16 sps:$4 sm:$0xff]  }
 0x352   : > { %2737 = vmatpush1.bf16.msra.mxu1 %v9074_v32  ;;  %2652 = vmatprep.subr.bf16.mxu0 %v9079_v33  ;;  %v9137_v32 = vld [vmem:[#allocation8 + $0x180] ss:$16 sps:$4 sm:$0xff]   ;;  %v9140_v33 = vld [vmem:[#allocation8 + $0x188] ss:$16 sps:$4 sm:$0xff]  }
 0x353   : > { %2738 = vmatprep.subr.bf16.mxu1 %v9082_v35  ;;  %v9145_v35 = vld [vmem:[#allocation8 + $0x1a4] ss:$16 sps:$4 sm:$0xff]  }
 0x355   : > { %2653 = vmatpush1.bf16.msra.mxu0 %v9077_v36  ;;  %v9148_v36 = vld [vmem:[#allocation8 + $0x1ac] ss:$16 sps:$4 sm:$0xff]  }
 0x356   : > { %2739 = vmatpush1.bf16.msra.mxu1 %v9080_v40  ;;  %2654 = vmatprep.subr.bf16.mxu0 %v9085_v37  ;;  %v9143_v40 = vld [vmem:[#allocation8 + $0x1a0] ss:$16 sps:$4 sm:$0xff]   ;;  %v9146_v37 = vld [vmem:[#allocation8 + $0x1a8] ss:$16 sps:$4 sm:$0xff]  }
 0x357   : > { %2740 = vmatprep.subr.bf16.mxu1 %v9088_v38  ;;  %v9151_v38 = vld [vmem:[#allocation8 + $0x1c4] ss:$16 sps:$4 sm:$0xff]  }
 0x359   : > { %2655 = vmatpush1.bf16.msra.mxu0 %v9083_v39  ;;  %v9154_v39 = vld [vmem:[#allocation8 + $0x1cc] ss:$16 sps:$4 sm:$0xff]  }
 0x35a   : > { %2741 = vmatpush1.bf16.msra.mxu1 %v9086_v19  ;;  %2656 = vmatprep.subr.bf16.mxu0 %v9091_v41  ;;  %v9149_v19 = vld [vmem:[#allocation8 + $0x1c0] ss:$16 sps:$4 sm:$0xff]   ;;  %v9152_v41 = vld [vmem:[#allocation8 + $0x1c8] ss:$16 sps:$4 sm:$0xff]  }
 0x35b   : > { %2742 = vmatprep.subr.bf16.mxu1 %v9094_v15  ;;  %v9157_v15 = vld [vmem:[#allocation8 + $0x1e4] ss:$16 sps:$4 sm:$0xff]  }
 0x35d   : > { %2657 = vmatpush1.bf16.msra.mxu0 %v9089_v42  ;;  %v9160_v42 = vld [vmem:[#allocation8 + $0x1ec] ss:$16 sps:$4 sm:$0xff]  }
 0x35e   : > { %2743 = vmatpush1.bf16.msra.mxu1 %v9092_v43  ;;  %2658 = vmatprep.subr.bf16.mxu0 %v9097_v47  ;;  %v9155_v43 = vld [vmem:[#allocation8 + $0x1e0] ss:$16 sps:$4 sm:$0xff]   ;;  %v9158_v47 = vld [vmem:[#allocation8 + $0x1e8] ss:$16 sps:$4 sm:$0xff]  }
 0x35f   : > { %2744 = vmatprep.subr.bf16.mxu1 %v9100_v51  ;;  %v9163_v51 = vld [vmem:[#allocation8 + $0x204] ss:$16 sps:$4 sm:$0xff]  }
 0x361   : > { %2659 = vmatpush1.bf16.msra.mxu0 %v9095_v52  ;;  %v9166_v52 = vld [vmem:[#allocation8 + $0x20c] ss:$16 sps:$4 sm:$0xff]  }
 0x362   : > { %2745 = vmatpush1.bf16.msra.mxu1 %v9098_v56  ;;  %2660 = vmatprep.subr.bf16.mxu0 %v9103_v57  ;;  %v9161_v56 = vld [vmem:[#allocation8 + $0x200] ss:$16 sps:$4 sm:$0xff]   ;;  %v9164_v57 = vld [vmem:[#allocation8 + $0x208] ss:$16 sps:$4 sm:$0xff]  }
 0x363   : > { %2746 = vmatprep.subr.bf16.mxu1 %v9106_v18  ;;  %v9169_v18 = vld [vmem:[#allocation8 + $0x224] ss:$16 sps:$4 sm:$0xff]  }
 0x365   : > { %2661 = vmatpush1.bf16.msra.mxu0 %v9101_v54  ;;  %v9172_v54 = vld [vmem:[#allocation8 + $0x22c] ss:$16 sps:$4 sm:$0xff]  }
 0x366   : > { %2747 = vmatpush1.bf16.msra.mxu1 %v9104_v58  ;;  %2662 = vmatprep.subr.bf16.mxu0 %v9109_v2  ;;  %v9167_v58 = vld [vmem:[#allocation8 + $0x220] ss:$16 sps:$4 sm:$0xff]   ;;  %v9170_v2 = vld [vmem:[#allocation8 + $0x228] ss:$16 sps:$4 sm:$0xff]  }
 0x367   : > { %2748 = vmatprep.subr.bf16.mxu1 %v9112_v6  ;;  %v9175_v6 = vld [vmem:[#allocation8 + $0x244] ss:$16 sps:$4 sm:$0xff]  }
 0x369   : > { %2663 = vmatpush1.bf16.msra.mxu0 %v9107_v7  ;;  %v9178_v7 = vld [vmem:[#allocation8 + $0x24c] ss:$16 sps:$4 sm:$0xff]  }
 0x36a   : > { %2749 = vmatpush1.bf16.msra.mxu1 %v9110_v8  ;;  %2664 = vmatprep.subr.bf16.mxu0 %v9115_v34  ;;  %v9173_v8 = vld [vmem:[#allocation8 + $0x240] ss:$16 sps:$4 sm:$0xff]   ;;  %v9181_v34 = vld [vmem:[#allocation8 + $0x264] ss:$16 sps:$4 sm:$0xff]  }
 0x36b   : > { %2750 = vmatprep.subr.bf16.mxu1 %v9118_v1  ;;  %v9184_v1 = vld [vmem:[#allocation8 + $0x26c] ss:$16 sps:$4 sm:$0xff]  }
 0x36d   : > { %2665 = vmatpush1.bf16.msra.mxu0 %v9113_v4  ;;  %v9179_v4 = vld [vmem:[#allocation8 + $0x260] ss:$16 sps:$4 sm:$0xff]  }
 0x36e   : > { %2751 = vmatpush1.bf16.msra.mxu1 %v9116_v50  ;;  %2666 = vmatprep.subr.bf16.mxu0 %v9121_v5  ;;  %v9182_v50 = vld [vmem:[#allocation8 + $0x268] ss:$16 sps:$4 sm:$0xff]   ;;  %v9187_v5 = vld [vmem:[#allocation8 + $0x284] ss:$16 sps:$4 sm:$0xff]  }
 0x36f   : > { %2752 = vmatprep.subr.bf16.mxu1 %v9124_v48  ;;  %v9190_v48 = vld [vmem:[#allocation8 + $0x28c] ss:$16 sps:$4 sm:$0xff]  }
 0x371   : > { %2667 = vmatpush1.bf16.msra.mxu0 %v9119_v55  ;;  %v9188_v55 = vld [vmem:[#allocation8 + $0x288] ss:$16 sps:$4 sm:$0xff]  }
 0x372   : > { %2753 = vmatpush1.bf16.msra.mxu1 %v9122_v11  ;;  %2668 = vmatprep.subr.bf16.mxu0 %v9127_v12  ;;  %v9193_v11 = vld [vmem:[#allocation8 + $0x2a4] ss:$16 sps:$4 sm:$0xff]   ;;  %v9196_v12 = vld [vmem:[#allocation8 + $0x2ac] ss:$16 sps:$4 sm:$0xff]  }
 0x373   : > { %2754 = vmatprep.subr.bf16.mxu1 %v9130_v13  ;;  %v9191_v13 = vld [vmem:[#allocation8 + $0x2a0] ss:$16 sps:$4 sm:$0xff]  }
 0x375   : > { %2669 = vmatpush1.bf16.msra.mxu0 %v9125_v14  ;;  %v9194_v14 = vld [vmem:[#allocation8 + $0x2a8] ss:$16 sps:$4 sm:$0xff]  }
 0x376   : > { %2755 = vmatpush1.bf16.msra.mxu1 %v9128_v16  ;;  %2670 = vmatprep.subr.bf16.mxu0 %v9133_v17  ;;  %v9199_v16 = vld [vmem:[#allocation8 + $0x2c4] ss:$16 sps:$4 sm:$0xff]   ;;  %v9202_v17 = vld [vmem:[#allocation8 + $0x2cc] ss:$16 sps:$4 sm:$0xff]  }
 0x377   : > { %2756 = vmatprep.subr.bf16.mxu1 %v9136_v22  ;;  %v9197_v22 = vld [vmem:[#allocation8 + $0x2c0] ss:$16 sps:$4 sm:$0xff]  }
 0x379   : > { %2671 = vmatpush1.bf16.msra.mxu0 %v9131_v23  ;;  %v9200_v23 = vld [vmem:[#allocation8 + $0x2c8] ss:$16 sps:$4 sm:$0xff]  }
 0x37a   : > { %2757 = vmatpush1.bf16.msra.mxu1 %v9134_v27  ;;  %2672 = vmatprep.subr.bf16.mxu0 %v9139_v29  ;;  %v9205_v27 = vld [vmem:[#allocation8 + $0x2e4] ss:$16 sps:$4 sm:$0xff]   ;;  %v9208_v29 = vld [vmem:[#allocation8 + $0x2ec] ss:$16 sps:$4 sm:$0xff]  }
 0x37b   : > { %2758 = vmatprep.subr.bf16.mxu1 %v9142_v31  ;;  %v9203_v31 = vld [vmem:[#allocation8 + $0x2e0] ss:$16 sps:$4 sm:$0xff]  }
 0x37d   : > { %2673 = vmatpush1.bf16.msra.mxu0 %v9137_v32  ;;  %v9206_v32 = vld [vmem:[#allocation8 + $0x2e8] ss:$16 sps:$4 sm:$0xff]  }
 0x37e   : > { %2759 = vmatpush1.bf16.msra.mxu1 %v9140_v33  ;;  %2674 = vmatprep.subr.bf16.mxu0 %v9145_v35  ;;  %v9211_v33 = vld [vmem:[#allocation8 + $0x304] ss:$16 sps:$4 sm:$0xff]   ;;  %v9214_v35 = vld [vmem:[#allocation8 + $0x30c] ss:$16 sps:$4 sm:$0xff]  }
 0x37f   : > { %2760 = vmatprep.subr.bf16.mxu1 %v9148_v36  ;;  %v9209_v36 = vld [vmem:[#allocation8 + $0x300] ss:$16 sps:$4 sm:$0xff]  }
 0x381   : > { %2675 = vmatpush1.bf16.msra.mxu0 %v9143_v40  ;;  %v9212_v40 = vld [vmem:[#allocation8 + $0x308] ss:$16 sps:$4 sm:$0xff]  }
 0x382   : > { %2761 = vmatpush1.bf16.msra.mxu1 %v9146_v37  ;;  %2676 = vmatprep.subr.bf16.mxu0 %v9151_v38  ;;  %v9217_v37 = vld [vmem:[#allocation8 + $0x324] ss:$16 sps:$4 sm:$0xff]   ;;  %v9220_v38 = vld [vmem:[#allocation8 + $0x32c] ss:$16 sps:$4 sm:$0xff]  }
 0x383   : > { %2762 = vmatprep.subr.bf16.mxu1 %v9154_v39  ;;  %v9215_v39 = vld [vmem:[#allocation8 + $0x320] ss:$16 sps:$4 sm:$0xff]  }
 0x385   : > { %2677 = vmatpush1.bf16.msra.mxu0 %v9149_v19  ;;  %v9218_v19 = vld [vmem:[#allocation8 + $0x328] ss:$16 sps:$4 sm:$0xff]  }
 0x386   : > { %2763 = vmatpush1.bf16.msra.mxu1 %v9152_v41  ;;  %2678 = vmatprep.subr.bf16.mxu0 %v9157_v15  ;;  %v9223_v41 = vld [vmem:[#allocation8 + $0x344] ss:$16 sps:$4 sm:$0xff]   ;;  %v9226_v15 = vld [vmem:[#allocation8 + $0x34c] ss:$16 sps:$4 sm:$0xff]  }
 0x387   : > { %2764 = vmatprep.subr.bf16.mxu1 %v9160_v42  ;;  %v9221_v42 = vld [vmem:[#allocation8 + $0x340] ss:$16 sps:$4 sm:$0xff]  }
 0x389   : > { %2679 = vmatpush1.bf16.msra.mxu0 %v9155_v43  ;;  %v9224_v43 = vld [vmem:[#allocation8 + $0x348] ss:$16 sps:$4 sm:$0xff]  }
 0x38a   : > { %2765 = vmatpush1.bf16.msra.mxu1 %v9158_v47  ;;  %2691 = vmatprep.subr.bf16.mxu0 %v9163_v51  ;;  %v9229_v47 = vld [vmem:[#allocation8 + $0x364] ss:$16 sps:$4 sm:$0xff]   ;;  %v9232_v51 = vld [vmem:[#allocation8 + $0x36c] ss:$16 sps:$4 sm:$0xff]  }
 0x38b   : > { %2777 = vmatprep.subr.bf16.mxu1 %v9166_v52  ;;  %v9227_v52 = vld [vmem:[#allocation8 + $0x360] ss:$16 sps:$4 sm:$0xff]  }
 0x38c   : > { %7791 = vmatmul.mubr.msk.bf16.vlgmr.msra.gmra.mrb[0].mxu0 %vm10913_vm13, %v10841_v24 }
 0x38d   : > { %7807 = vmatmul.mubr.msk.bf16.vlgmr.msra.gmra.mrb[8].mxu1 %vm10913_vm13, %v10841_v24  ;;  %2692 = vmatpush1.bf16.msra.mxu0 %v9161_v56  ;;  %v9176_v24 = vld [vmem:[#allocation8 + $0x248] ss:$16 sps:$4 sm:$0xff]  }
 0x38e   : > { %7795 = vmatprep.mubr.msk.bf16.mxu0 %vm10913_vm13, %v10844_v25  ;;  %2778 = vmatpush1.bf16.msra.mxu1 %v9164_v57  ;;  %v9230_v56 = vld [vmem:[#allocation8 + $0x368] ss:$16 sps:$4 sm:$0xff]   ;;  %v9235_v57 = vld [vmem:[#allocation8 + $0x384] ss:$16 sps:$4 sm:$0xff]  }
 0x38f   : > { %7811 = vmatprep.mubr.msk.bf16.mxu1 %vm10913_vm13, %v10844_v25  ;;  %2693 = vmatprep.subr.bf16.mxu0 %v9169_v18  ;;  %v9185_v25 = vld [vmem:[#allocation8 + $0x280] ss:$16 sps:$4 sm:$0xff]   ;;  %v9238_v18 = vld [vmem:[#allocation8 + $0x38c] ss:$16 sps:$4 sm:$0xff]  }
 0x390   : > { %2779 = vmatprep.subr.bf16.mxu1 %v9172_v54  ;;  %v9233_v54 = vld [vmem:[#allocation8 + $0x380] ss:$16 sps:$4 sm:$0xff]  }
 0x391   : > { %2694 = vmatpush1.bf16.msra.mxu0 %v9167_v58  ;;  %v9236_v58 = vld [vmem:[#allocation8 + $0x388] ss:$16 sps:$4 sm:$0xff]  }
 0x392   : > { %2780 = vmatpush1.bf16.msra.mxu1 %v9170_v2  ;;  %2695 = vmatprep.subr.bf16.mxu0 %v9175_v6  ;;  %v9241_v2 = vld [vmem:[#allocation8 + $0x3a4] ss:$16 sps:$4 sm:$0xff]   ;;  %v9244_v6 = vld [vmem:[#allocation8 + $0x3ac] ss:$16 sps:$4 sm:$0xff]  }
 0x393   : > { %2781 = vmatprep.subr.bf16.mxu1 %v9178_v7  ;;  %v9239_v7 = vld [vmem:[#allocation8 + $0x3a0] ss:$16 sps:$4 sm:$0xff]  }
 0x395   : > { %2696 = vmatpush1.bf16.msra.mxu0 %v9173_v8  ;;  %v9242_v8 = vld [vmem:[#allocation8 + $0x3a8] ss:$16 sps:$4 sm:$0xff]  }
 0x396   : > { %2782 = vmatpush1.bf16.msra.mxu1 %v9176_v24  ;;  %2697 = vmatprep.subr.bf16.mxu0 %v9181_v34  ;;  %v9247_v24 = vld [vmem:[#allocation8 + $0x3c4] ss:$16 sps:$4 sm:$0xff]   ;;  %v9250_v34 = vld [vmem:[#allocation8 + $0x3cc] ss:$16 sps:$4 sm:$0xff]  }
 0x397   : > { %2783 = vmatprep.subr.bf16.mxu1 %v9184_v1  ;;  %v9245_v1 = vld [vmem:[#allocation8 + $0x3c0] ss:$16 sps:$4 sm:$0xff]  }
 0x399   : > { %2698 = vmatpush1.bf16.msra.mxu0 %v9179_v4  ;;  %v9248_v4 = vld [vmem:[#allocation8 + $0x3c8] ss:$16 sps:$4 sm:$0xff]  }
 0x39a   : > { %2784 = vmatpush1.bf16.msra.mxu1 %v9182_v50  ;;  %2699 = vmatprep.subr.bf16.mxu0 %v9187_v5  ;;  %v9253_v50 = vld [vmem:[#allocation8 + $0x3e4] ss:$16 sps:$4 sm:$0xff]   ;;  %v9256_v5 = vld [vmem:[#allocation8 + $0x3ec] ss:$16 sps:$4 sm:$0xff]  }
 0x39b   : > { %2785 = vmatprep.subr.bf16.mxu1 %v9190_v48  ;;  %v9251_v48 = vld [vmem:[#allocation8 + $0x3e0] ss:$16 sps:$4 sm:$0xff]  }
 0x39d   : > { %2700 = vmatpush1.bf16.msra.mxu0 %v9185_v25  ;;  %v9254_v25 = vld [vmem:[#allocation8 + $0x3e8] ss:$16 sps:$4 sm:$0xff]  }
 0x39e   : > { %2786 = vmatpush1.bf16.msra.mxu1 %v9188_v55  ;;  %2701 = vmatprep.subr.bf16.mxu0 %v9193_v11  ;;  %v9259_v55 = vld [vmem:[#allocation8 + $0x804] ss:$16 sps:$4 sm:$0xff]   ;;  %v9262_v11 = vld [vmem:[#allocation8 + $0x80c] ss:$16 sps:$4 sm:$0xff]  }
 0x39f   : > { %2787 = vmatprep.subr.bf16.mxu1 %v9196_v12  ;;  %v9257_v12 = vld [vmem:[#allocation8 + $0x800] ss:$16 sps:$4 sm:$0xff]  }
 0x3a1   : > { %2702 = vmatpush1.bf16.msra.mxu0 %v9191_v13  ;;  %v9260_v13 = vld [vmem:[#allocation8 + $0x808] ss:$16 sps:$4 sm:$0xff]  }
 0x3a2   : > { %2788 = vmatpush1.bf16.msra.mxu1 %v9194_v14  ;;  %2703 = vmatprep.subr.bf16.mxu0 %v9199_v16  ;;  %v9265_v14 = vld [vmem:[#allocation8 + $0x824] ss:$16 sps:$4 sm:$0xff]   ;;  %v9268_v16 = vld [vmem:[#allocation8 + $0x82c] ss:$16 sps:$4 sm:$0xff]  }
 0x3a3   : > { %2789 = vmatprep.subr.bf16.mxu1 %v9202_v17  ;;  %v9263_v17 = vld [vmem:[#allocation8 + $0x820] ss:$16 sps:$4 sm:$0xff]  }
 0x3a5   : > { %2704 = vmatpush1.bf16.msra.mxu0 %v9197_v22  ;;  %v9266_v22 = vld [vmem:[#allocation8 + $0x828] ss:$16 sps:$4 sm:$0xff]  }
 0x3a6   : > { %2790 = vmatpush1.bf16.msra.mxu1 %v9200_v23  ;;  %2705 = vmatprep.subr.bf16.mxu0 %v9205_v27  ;;  %v9271_v23 = vld [vmem:[#allocation8 + $0x844] ss:$16 sps:$4 sm:$0xff]   ;;  %v9274_v27 = vld [vmem:[#allocation8 + $0x84c] ss:$16 sps:$4 sm:$0xff]  }
 0x3a7   : > { %2791 = vmatprep.subr.bf16.mxu1 %v9208_v29  ;;  %v9269_v29 = vld [vmem:[#allocation8 + $0x840] ss:$16 sps:$4 sm:$0xff]  }
 0x3a9   : > { %2706 = vmatpush1.bf16.msra.mxu0 %v9203_v31  ;;  %v9272_v31 = vld [vmem:[#allocation8 + $0x848] ss:$16 sps:$4 sm:$0xff]  }
 0x3aa   : > { %2792 = vmatpush1.bf16.msra.mxu1 %v9206_v32  ;;  %2707 = vmatprep.subr.bf16.mxu0 %v9211_v33  ;;  %v9277_v32 = vld [vmem:[#allocation8 + $0x864] ss:$16 sps:$4 sm:$0xff]   ;;  %v9278_v33 = vld [vmem:[#allocation8 + $0x868] ss:$16 sps:$4 sm:$0xff]  }
 0x3ab   : > { %2793 = vmatprep.subr.bf16.mxu1 %v9214_v35  ;;  %v9283_v35 = vld [vmem:[#allocation8 + $0x884] ss:$16 sps:$4 sm:$0xff]  }
 0x3ad   : > { %2708 = vmatpush1.bf16.msra.mxu0 %v9209_v36  ;;  %v9286_v36 = vld [vmem:[#allocation8 + $0x88c] ss:$16 sps:$4 sm:$0xff]  }
 0x3ae   : > { %2794 = vmatpush1.bf16.msra.mxu1 %v9212_v40  ;;  %2709 = vmatprep.subr.bf16.mxu0 %v9217_v37  ;;  %v9284_v40 = vld [vmem:[#allocation8 + $0x888] ss:$16 sps:$4 sm:$0xff]   ;;  %v9289_v37 = vld [vmem:[#allocation8 + $0x8a4] ss:$16 sps:$4 sm:$0xff]  }
 0x3af   : > { %2795 = vmatprep.subr.bf16.mxu1 %v9220_v38  ;;  %v9292_v38 = vld [vmem:[#allocation8 + $0x8ac] ss:$16 sps:$4 sm:$0xff]  }
 0x3b1   : > { %2710 = vmatpush1.bf16.msra.mxu0 %v9215_v39  ;;  %v9287_v39 = vld [vmem:[#allocation8 + $0x8a0] ss:$16 sps:$4 sm:$0xff]  }
 0x3b2   : > { %2796 = vmatpush1.bf16.msra.mxu1 %v9218_v19  ;;  %2711 = vmatprep.subr.bf16.mxu0 %v9223_v41  ;;  %v9290_v19 = vld [vmem:[#allocation8 + $0x8a8] ss:$16 sps:$4 sm:$0xff]   ;;  %v9295_v41 = vld [vmem:[#allocation8 + $0x8c4] ss:$16 sps:$4 sm:$0xff]  }
 0x3b3   : > { %2797 = vmatprep.subr.bf16.mxu1 %v9226_v15  ;;  %v9298_v15 = vld [vmem:[#allocation8 + $0x8cc] ss:$16 sps:$4 sm:$0xff]  }
 0x3b5   : > { %2712 = vmatpush1.bf16.msra.mxu0 %v9221_v42  ;;  %v9293_v42 = vld [vmem:[#allocation8 + $0x8c0] ss:$16 sps:$4 sm:$0xff]  }
 0x3b6   : > { %2798 = vmatpush1.bf16.msra.mxu1 %v9224_v43  ;;  %2713 = vmatprep.subr.bf16.mxu0 %v9229_v47  ;;  %v9296_v43 = vld [vmem:[#allocation8 + $0x8c8] ss:$16 sps:$4 sm:$0xff]   ;;  %v9301_v47 = vld [vmem:[#allocation8 + $0x8e4] ss:$16 sps:$4 sm:$0xff]  }
 0x3b7   : > { %2799 = vmatprep.subr.bf16.mxu1 %v9232_v51  ;;  %v9304_v51 = vld [vmem:[#allocation8 + $0x8ec] ss:$16 sps:$4 sm:$0xff]  }
 0x3b9   : > { %2714 = vmatpush1.bf16.msra.mxu0 %v9227_v52  ;;  %v9299_v52 = vld [vmem:[#allocation8 + $0x8e0] ss:$16 sps:$4 sm:$0xff]  }
 0x3ba   : > { %2800 = vmatpush1.bf16.msra.mxu1 %v9230_v56  ;;  %2715 = vmatprep.subr.bf16.mxu0 %v9235_v57  ;;  %v9302_v56 = vld [vmem:[#allocation8 + $0x8e8] ss:$16 sps:$4 sm:$0xff]   ;;  %v9307_v57 = vld [vmem:[#allocation8 + $0x904] ss:$16 sps:$4 sm:$0xff]  }
 0x3bb   : > { %2801 = vmatprep.subr.bf16.mxu1 %v9238_v18  ;;  %v9310_v18 = vld [vmem:[#allocation8 + $0x90c] ss:$16 sps:$4 sm:$0xff]  }
 0x3bd   : > { %2716 = vmatpush1.bf16.msra.mxu0 %v9233_v54  ;;  %v9305_v54 = vld [vmem:[#allocation8 + $0x900] ss:$16 sps:$4 sm:$0xff]  }
 0x3be   : > { %2802 = vmatpush1.bf16.msra.mxu1 %v9236_v58  ;;  %2717 = vmatprep.subr.bf16.mxu0 %v9241_v2  ;;  %v9308_v58 = vld [vmem:[#allocation8 + $0x908] ss:$16 sps:$4 sm:$0xff]   ;;  %v9313_v2 = vld [vmem:[#allocation8 + $0x924] ss:$16 sps:$4 sm:$0xff]  }
 0x3bf   : > { %2803 = vmatprep.subr.bf16.mxu1 %v9244_v6  ;;  %v9316_v6 = vld [vmem:[#allocation8 + $0x92c] ss:$16 sps:$4 sm:$0xff]  }
 0x3c1   : > { %2718 = vmatpush1.bf16.msra.mxu0 %v9239_v7  ;;  %v9311_v7 = vld [vmem:[#allocation8 + $0x920] ss:$16 sps:$4 sm:$0xff]  }
 0x3c2   : > { %2804 = vmatpush1.bf16.msra.mxu1 %v9242_v8  ;;  %2719 = vmatprep.subr.bf16.mxu0 %v9247_v24  ;;  %v9314_v8 = vld [vmem:[#allocation8 + $0x928] ss:$16 sps:$4 sm:$0xff]   ;;  %v9319_v24 = vld [vmem:[#allocation8 + $0x944] ss:$16 sps:$4 sm:$0xff]  }
 0x3c3   : > { %2805 = vmatprep.subr.bf16.mxu1 %v9250_v34  ;;  %v9322_v34 = vld [vmem:[#allocation8 + $0x94c] ss:$16 sps:$4 sm:$0xff]  }
 0x3c5   : > { %2720 = vmatpush1.bf16.msra.mxu0 %v9245_v1  ;;  %v9317_v1 = vld [vmem:[#allocation8 + $0x940] ss:$16 sps:$4 sm:$0xff]  }
 0x3c6   : > { %2806 = vmatpush1.bf16.msra.mxu1 %v9248_v4  ;;  %2721 = vmatprep.subr.bf16.mxu0 %v9253_v50  ;;  %v9320_v4 = vld [vmem:[#allocation8 + $0x948] ss:$16 sps:$4 sm:$0xff]   ;;  %v9325_v50 = vld [vmem:[#allocation8 + $0x964] ss:$16 sps:$4 sm:$0xff]  }
 0x3c7   : > { %2807 = vmatprep.subr.bf16.mxu1 %v9256_v5  ;;  %v9328_v5 = vld [vmem:[#allocation8 + $0x96c] ss:$16 sps:$4 sm:$0xff]  }
 0x3c9   : > { %2722 = vmatpush1.bf16.msra.mxu0 %v9251_v48  ;;  %v9323_v48 = vld [vmem:[#allocation8 + $0x960] ss:$16 sps:$4 sm:$0xff]  }
 0x3ca   : > { %2808 = vmatpush1.bf16.msra.mxu1 %v9254_v25  ;;  %3606 = vmatprep.subr.bf16.mxu0 %v9259_v55  ;;  %v9326_v25 = vld [vmem:[#allocation8 + $0x968] ss:$16 sps:$4 sm:$0xff]   ;;  %v9331_v55 = vld [vmem:[#allocation8 + $0x984] ss:$16 sps:$4 sm:$0xff]  }
 0x3cb   : > { %3692 = vmatprep.subr.bf16.mxu1 %v9262_v11  ;;  %v9334_v11 = vld [vmem:[#allocation8 + $0x98c] ss:$16 sps:$4 sm:$0xff]  }
 0x3cc   : > { %7799 = vmatmul.mubr.msk.bf16.vlgmr.msra.gmra.mrb[0].mxu0 %vm10913_vm13, %v10849_v30 }
 0x3cd   : > { %7815 = vmatmul.mubr.msk.bf16.vlgmr.msra.gmra.mrb[8].mxu1 %vm10913_vm13, %v10849_v30  ;;  %3607 = vmatpush1.bf16.msra.mxu0 %v9257_v12  ;;  %v9280_v30 = vld [vmem:[#allocation8 + $0x86c] ss:$16 sps:$4 sm:$0xff]   ;;  %v9329_v12 = vld [vmem:[#allocation8 + $0x980] ss:$16 sps:$4 sm:$0xff]  }
 0x3ce   : > { %3638 = vmatprep.mubr.bf16.mxu0 %v10863_v44  ;;  %3693 = vmatpush1.bf16.msra.mxu1 %v9260_v13  ;;  %v9332_v13 = vld [vmem:[#allocation8 + $0x988] ss:$16 sps:$4 sm:$0xff]  }
 0x3cf   : > { %3724 = vmatprep.mubr.bf16.mxu1 %v10863_v44  ;;  %3608 = vmatprep.subr.bf16.mxu0 %v9265_v14  ;;  %v9281_v44 = vld [vmem:[#allocation8 + $0x880] ss:$16 sps:$4 sm:$0xff]   ;;  %v9337_v14 = vld [vmem:[#allocation8 + $0x9a4] ss:$16 sps:$4 sm:$0xff]  }
 0x3d0   : > { %3694 = vmatprep.subr.bf16.mxu1 %v9268_v16  ;;  %v9340_v16 = vld [vmem:[#allocation8 + $0x9ac] ss:$16 sps:$4 sm:$0xff]  }
 0x3d1   : > { %3609 = vmatpush1.bf16.msra.mxu0 %v9263_v17  ;;  %v9335_v17 = vld [vmem:[#allocation8 + $0x9a0] ss:$16 sps:$4 sm:$0xff]  }
 0x3d2   : > { %3695 = vmatpush1.bf16.msra.mxu1 %v9266_v22  ;;  %3610 = vmatprep.subr.bf16.mxu0 %v9271_v23  ;;  %v9338_v22 = vld [vmem:[#allocation8 + $0x9a8] ss:$16 sps:$4 sm:$0xff]   ;;  %v9343_v23 = vld [vmem:[#allocation8 + $0x9c4] ss:$16 sps:$4 sm:$0xff]  }
 0x3d3   : > { %3696 = vmatprep.subr.bf16.mxu1 %v9274_v27  ;;  %v9346_v27 = vld [vmem:[#allocation8 + $0x9cc] ss:$16 sps:$4 sm:$0xff]  }
 0x3d5   : > { %3611 = vmatpush1.bf16.msra.mxu0 %v9269_v29  ;;  %v9341_v29 = vld [vmem:[#allocation8 + $0x9c0] ss:$16 sps:$4 sm:$0xff]  }
 0x3d6   : > { %3697 = vmatpush1.bf16.msra.mxu1 %v9272_v31  ;;  %3612 = vmatprep.subr.bf16.mxu0 %v9277_v32  ;;  %v9344_v31 = vld [vmem:[#allocation8 + $0x9c8] ss:$16 sps:$4 sm:$0xff]   ;;  %v9349_v32 = vld [vmem:[#allocation8 + $0x9e4] ss:$16 sps:$4 sm:$0xff]  }
 0x3d7   : > { %3698 = vmatprep.subr.bf16.mxu1 %v9280_v30  ;;  %v9352_v30 = vld [vmem:[#allocation8 + $0x9ec] ss:$16 sps:$4 sm:$0xff]  }
 0x3d9   : > { %3613 = vmatpush1.bf16.msra.mxu0 %v9275_v26  ;;  %v9347_v26 = vld [vmem:[#allocation8 + $0x9e0] ss:$16 sps:$4 sm:$0xff]  }
 0x3da   : > { %3699 = vmatpush1.bf16.msra.mxu1 %v9278_v33  ;;  %3614 = vmatprep.subr.bf16.mxu0 %v9283_v35  ;;  %v9350_v33 = vld [vmem:[#allocation8 + $0x9e8] ss:$16 sps:$4 sm:$0xff]   ;;  %v9355_v35 = vld [vmem:[#allocation8 + $0xa04] ss:$16 sps:$4 sm:$0xff]  }
 0x3db   : > { %3700 = vmatprep.subr.bf16.mxu1 %v9286_v36  ;;  %v9358_v36 = vld [vmem:[#allocation8 + $0xa0c] ss:$16 sps:$4 sm:$0xff]  }
 0x3dd   : > { %3615 = vmatpush1.bf16.msra.mxu0 %v9281_v44  ;;  %v9353_v44 = vld [vmem:[#allocation8 + $0xa00] ss:$16 sps:$4 sm:$0xff]  }
 0x3de   : > { %3701 = vmatpush1.bf16.msra.mxu1 %v9284_v40  ;;  %3616 = vmatprep.subr.bf16.mxu0 %v9289_v37  ;;  %v9356_v40 = vld [vmem:[#allocation8 + $0xa08] ss:$16 sps:$4 sm:$0xff]   ;;  %v9361_v37 = vld [vmem:[#allocation8 + $0xa24] ss:$16 sps:$4 sm:$0xff]  }
 0x3df   : > { %3702 = vmatprep.subr.bf16.mxu1 %v9292_v38  ;;  %v9364_v38 = vld [vmem:[#allocation8 + $0xa2c] ss:$16 sps:$4 sm:$0xff]  }
 0x3e1   : > { %3617 = vmatpush1.bf16.msra.mxu0 %v9287_v39  ;;  %v9359_v39 = vld [vmem:[#allocation8 + $0xa20] ss:$16 sps:$4 sm:$0xff]  }
 0x3e2   : > { %3703 = vmatpush1.bf16.msra.mxu1 %v9290_v19  ;;  %3618 = vmatprep.subr.bf16.mxu0 %v9295_v41  ;;  %v9362_v19 = vld [vmem:[#allocation8 + $0xa28] ss:$16 sps:$4 sm:$0xff]   ;;  %v9367_v41 = vld [vmem:[#allocation8 + $0xa44] ss:$16 sps:$4 sm:$0xff]  }
 0x3e3   : > { %3704 = vmatprep.subr.bf16.mxu1 %v9298_v15  ;;  %v9370_v15 = vld [vmem:[#allocation8 + $0xa4c] ss:$16 sps:$4 sm:$0xff]  }
 0x3e5   : > { %3619 = vmatpush1.bf16.msra.mxu0 %v9293_v42  ;;  %v9365_v42 = vld [vmem:[#allocation8 + $0xa40] ss:$16 sps:$4 sm:$0xff]  }
 0x3e6   : > { %3705 = vmatpush1.bf16.msra.mxu1 %v9296_v43  ;;  %3620 = vmatprep.subr.bf16.mxu0 %v9301_v47  ;;  %v9368_v43 = vld [vmem:[#allocation8 + $0xa48] ss:$16 sps:$4 sm:$0xff]   ;;  %v9373_v47 = vld [vmem:[#allocation8 + $0xa64] ss:$16 sps:$4 sm:$0xff]  }
 0x3e7   : > { %3706 = vmatprep.subr.bf16.mxu1 %v9304_v51  ;;  %v9371_v51 = vld [vmem:[#allocation8 + $0xa60] ss:$16 sps:$4 sm:$0xff]  }
 0x3e9   : > { %3621 = vmatpush1.bf16.msra.mxu0 %v9299_v52  ;;  %v9374_v52 = vld [vmem:[#allocation8 + $0xa68] ss:$16 sps:$4 sm:$0xff]  }
 0x3ea   : > { %3707 = vmatpush1.bf16.msra.mxu1 %v9302_v56  ;;  %3622 = vmatprep.subr.bf16.mxu0 %v9307_v57  ;;  %v9379_v56 = vld [vmem:[#allocation8 + $0xa84] ss:$16 sps:$4 sm:$0xff]   ;;  %v9382_v57 = vld [vmem:[#allocation8 + $0xa8c] ss:$16 sps:$4 sm:$0xff]  }
 0x3eb   : > { %3708 = vmatprep.subr.bf16.mxu1 %v9310_v18  ;;  %v9380_v18 = vld [vmem:[#allocation8 + $0xa88] ss:$16 sps:$4 sm:$0xff]  }
 0x3ed   : > { %3623 = vmatpush1.bf16.msra.mxu0 %v9305_v54  ;;  %v9385_v54 = vld [vmem:[#allocation8 + $0xaa4] ss:$16 sps:$4 sm:$0xff]  }
 0x3ee   : > { %3709 = vmatpush1.bf16.msra.mxu1 %v9308_v58  ;;  %3624 = vmatprep.subr.bf16.mxu0 %v9313_v2  ;;  %v9388_v58 = vld [vmem:[#allocation8 + $0xaac] ss:$16 sps:$4 sm:$0xff]   ;;  %v9383_v2 = vld [vmem:[#allocation8 + $0xaa0] ss:$16 sps:$4 sm:$0xff]  }
 0x3ef   : > { %3710 = vmatprep.subr.bf16.mxu1 %v9316_v6  ;;  %v9386_v6 = vld [vmem:[#allocation8 + $0xaa8] ss:$16 sps:$4 sm:$0xff]  }
 0x3f1   : > { %3625 = vmatpush1.bf16.msra.mxu0 %v9311_v7  ;;  %v9391_v7 = vld [vmem:[#allocation8 + $0xac4] ss:$16 sps:$4 sm:$0xff]  }
 0x3f2   : > { %3711 = vmatpush1.bf16.msra.mxu1 %v9314_v8  ;;  %3626 = vmatprep.subr.bf16.mxu0 %v9319_v24  ;;  %v9394_v8 = vld [vmem:[#allocation8 + $0xacc] ss:$16 sps:$4 sm:$0xff]   ;;  %v9389_v24 = vld [vmem:[#allocation8 + $0xac0] ss:$16 sps:$4 sm:$0xff]  }
 0x3f3   : > { %3712 = vmatprep.subr.bf16.mxu1 %v9322_v34  ;;  %v9392_v34 = vld [vmem:[#allocation8 + $0xac8] ss:$16 sps:$4 sm:$0xff]  }
 0x3f5   : > { %3627 = vmatpush1.bf16.msra.mxu0 %v9317_v1  ;;  %v9397_v1 = vld [vmem:[#allocation8 + $0xae4] ss:$16 sps:$4 sm:$0xff]  }
 0x3f6   : > { %3713 = vmatpush1.bf16.msra.mxu1 %v9320_v4  ;;  %3628 = vmatprep.subr.bf16.mxu0 %v9325_v50  ;;  %v9400_v4 = vld [vmem:[#allocation8 + $0xaec] ss:$16 sps:$4 sm:$0xff]   ;;  %v9395_v50 = vld [vmem:[#allocation8 + $0xae0] ss:$16 sps:$4 sm:$0xff]  }
 0x3f7   : > { %3714 = vmatprep.subr.bf16.mxu1 %v9328_v5  ;;  %v9398_v5 = vld [vmem:[#allocation8 + $0xae8] ss:$16 sps:$4 sm:$0xff]  }
 0x3f9   : > { %3629 = vmatpush1.bf16.msra.mxu0 %v9323_v48  ;;  %v9403_v48 = vld [vmem:[#allocation8 + $0xb04] ss:$16 sps:$4 sm:$0xff]  }
 0x3fa   : > { %3715 = vmatpush1.bf16.msra.mxu1 %v9326_v25  ;;  %3630 = vmatprep.subr.bf16.mxu0 %v9331_v55  ;;  %v9406_v25 = vld [vmem:[#allocation8 + $0xb0c] ss:$16 sps:$4 sm:$0xff]   ;;  %v9401_v55 = vld [vmem:[#allocation8 + $0xb00] ss:$16 sps:$4 sm:$0xff]  }
 0x3fb   : > { %3716 = vmatprep.subr.bf16.mxu1 %v9334_v11  ;;  %v9404_v11 = vld [vmem:[#allocation8 + $0xb08] ss:$16 sps:$4 sm:$0xff]  }
 0x3fd   : > { %3631 = vmatpush1.bf16.msra.mxu0 %v9329_v12  ;;  %v9409_v12 = vld [vmem:[#allocation8 + $0xb24] ss:$16 sps:$4 sm:$0xff]  }
 0x3fe   : > { %3717 = vmatpush1.bf16.msra.mxu1 %v9332_v13  ;;  %3632 = vmatprep.subr.bf16.mxu0 %v9337_v14  ;;  %v9412_v13 = vld [vmem:[#allocation8 + $0xb2c] ss:$16 sps:$4 sm:$0xff]   ;;  %v9407_v14 = vld [vmem:[#allocation8 + $0xb20] ss:$16 sps:$4 sm:$0xff]  }
 0x3ff   : > { %3718 = vmatprep.subr.bf16.mxu1 %v9340_v16  ;;  %v9410_v16 = vld [vmem:[#allocation8 + $0xb28] ss:$16 sps:$4 sm:$0xff]  }
 0x401   : > { %3633 = vmatpush1.bf16.msra.mxu0 %v9335_v17  ;;  %v9415_v17 = vld [vmem:[#allocation8 + $0xb44] ss:$16 sps:$4 sm:$0xff]  }
 0x402   : > { %3719 = vmatpush1.bf16.msra.mxu1 %v9338_v22  ;;  %3634 = vmatprep.subr.bf16.mxu0 %v9343_v23  ;;  %v9418_v22 = vld [vmem:[#allocation8 + $0xb4c] ss:$16 sps:$4 sm:$0xff]   ;;  %v9413_v23 = vld [vmem:[#allocation8 + $0xb40] ss:$16 sps:$4 sm:$0xff]  }
 0x403   : > { %3720 = vmatprep.subr.bf16.mxu1 %v9346_v27  ;;  %v9416_v27 = vld [vmem:[#allocation8 + $0xb48] ss:$16 sps:$4 sm:$0xff]  }
 0x405   : > { %3635 = vmatpush1.bf16.msra.mxu0 %v9341_v29  ;;  %v9421_v29 = vld [vmem:[#allocation8 + $0xb64] ss:$16 sps:$4 sm:$0xff]  }
 0x406   : > { %3721 = vmatpush1.bf16.msra.mxu1 %v9344_v31  ;;  %3636 = vmatprep.subr.bf16.mxu0 %v9349_v32  ;;  %v9424_v31 = vld [vmem:[#allocation8 + $0xb6c] ss:$16 sps:$4 sm:$0xff]   ;;  %v9419_v32 = vld [vmem:[#allocation8 + $0xb60] ss:$16 sps:$4 sm:$0xff]  }
 0x407   : > { %3722 = vmatprep.subr.bf16.mxu1 %v9352_v30  ;;  %v9422_v30 = vld [vmem:[#allocation8 + $0xb68] ss:$16 sps:$4 sm:$0xff]  }
 0x409   : > { %3637 = vmatpush1.bf16.msra.mxu0 %v9347_v26  ;;  %v9427_v26 = vld [vmem:[#allocation8 + $0xb84] ss:$16 sps:$4 sm:$0xff]  }
 0x40a   : > { %3723 = vmatpush1.bf16.msra.mxu1 %v9350_v33  ;;  %3649 = vmatprep.subr.bf16.mxu0 %v9355_v35  ;;  %v9430_v33 = vld [vmem:[#allocation8 + $0xb8c] ss:$16 sps:$4 sm:$0xff]   ;;  %v9425_v35 = vld [vmem:[#allocation8 + $0xb80] ss:$16 sps:$4 sm:$0xff]  }
 0x40b   : > { %3735 = vmatprep.subr.bf16.mxu1 %v9358_v36  ;;  %v9428_v36 = vld [vmem:[#allocation8 + $0xb88] ss:$16 sps:$4 sm:$0xff]  }
 0x40c   : > { %3639 = vmatmul.mubr.bf16.vlgmr.msra.gmra.mrb[0].mxu0 %v10866_v46 }
 0x40d   : > { %3725 = vmatmul.mubr.bf16.vlgmr.msra.gmra.mrb[8].mxu1 %v10866_v46  ;;  %3650 = vmatpush1.bf16.msra.mxu0 %v9353_v44  ;;  %v9376_v46 = vld [vmem:[#allocation8 + $0xa6c] ss:$16 sps:$4 sm:$0xff]   ;;  %v9433_v44 = vld [vmem:[#allocation8 + $0xba4] ss:$16 sps:$4 sm:$0xff]  }
 0x40e   : > { %3681 = vmatprep.mubr.bf16.mxu0 %v10871_v53  ;;  %3736 = vmatpush1.bf16.msra.mxu1 %v9356_v40  ;;  %v9436_v40 = vld [vmem:[#allocation8 + $0xbac] ss:$16 sps:$4 sm:$0xff]  }
 0x40f   : > { %3767 = vmatprep.mubr.bf16.mxu1 %v10871_v53  ;;  %3651 = vmatprep.subr.bf16.mxu0 %v9361_v37  ;;  %v9377_v53 = vld [vmem:[#allocation8 + $0xa80] ss:$16 sps:$4 sm:$0xff]  }
 0x410   : > { %3737 = vmatprep.subr.bf16.mxu1 %v9364_v38  ;;  %v9431_v37 = vld [vmem:[#allocation8 + $0xba0] ss:$16 sps:$4 sm:$0xff]   ;;  %v9434_v38 = vld [vmem:[#allocation8 + $0xba8] ss:$16 sps:$4 sm:$0xff]  }
 0x411   : > { %3652 = vmatpush1.bf16.msra.mxu0 %v9359_v39  ;;  %v9439_v39 = vld [vmem:[#allocation8 + $0xbc4] ss:$16 sps:$4 sm:$0xff]  }
 0x412   : > { %3738 = vmatpush1.bf16.msra.mxu1 %v9362_v19  ;;  %3653 = vmatprep.subr.bf16.mxu0 %v9367_v41  ;;  %v9442_v19 = vld [vmem:[#allocation8 + $0xbcc] ss:$16 sps:$4 sm:$0xff]   ;;  %v9437_v41 = vld [vmem:[#allocation8 + $0xbc0] ss:$16 sps:$4 sm:$0xff]  }
 0x413   : > { %3739 = vmatprep.subr.bf16.mxu1 %v9370_v15  ;;  %v9440_v15 = vld [vmem:[#allocation8 + $0xbc8] ss:$16 sps:$4 sm:$0xff]  }
 0x415   : > { %3654 = vmatpush1.bf16.msra.mxu0 %v9365_v42  ;;  %v9445_v42 = vld [vmem:[#allocation8 + $0xbe4] ss:$16 sps:$4 sm:$0xff]  }
 0x416   : > { %3740 = vmatpush1.bf16.msra.mxu1 %v9368_v43  ;;  %3655 = vmatprep.subr.bf16.mxu0 %v9373_v47  ;;  %v9448_v43 = vld [vmem:[#allocation8 + $0xbec] ss:$16 sps:$4 sm:$0xff]   ;;  %v9443_v47 = vld [vmem:[#allocation8 + $0xbe0] ss:$16 sps:$4 sm:$0xff]  }
 0x417   : > { %3741 = vmatprep.subr.bf16.mxu1 %v9376_v46  ;;  %v9446_v46 = vld [vmem:[#allocation8 + $0xbe8] ss:$16 sps:$4 sm:$0xff]  }
 0x419   : > { %3656 = vmatpush1.bf16.msra.mxu0 %v9371_v51  ;;  %v9451_v51 = vld [vmem:[#allocation8 + $0xc04] ss:$16 sps:$4 sm:$0xff]  }
 0x41a   : > { %3742 = vmatpush1.bf16.msra.mxu1 %v9374_v52  ;;  %3657 = vmatprep.subr.bf16.mxu0 %v9379_v56  ;;  %v9454_v52 = vld [vmem:[#allocation8 + $0xc0c] ss:$16 sps:$4 sm:$0xff]   ;;  %v9449_v56 = vld [vmem:[#allocation8 + $0xc00] ss:$16 sps:$4 sm:$0xff]  }
 0x41b   : > { %3743 = vmatprep.subr.bf16.mxu1 %v9382_v57  ;;  %v9452_v57 = vld [vmem:[#allocation8 + $0xc08] ss:$16 sps:$4 sm:$0xff]  }
 0x41d   : > { %3658 = vmatpush1.bf16.msra.mxu0 %v9377_v53  ;;  %v9457_v53 = vld [vmem:[#allocation8 + $0xc24] ss:$16 sps:$4 sm:$0xff]  }
 0x41e   : > { %3744 = vmatpush1.bf16.msra.mxu1 %v9380_v18  ;;  %3659 = vmatprep.subr.bf16.mxu0 %v9385_v54  ;;  %v9460_v18 = vld [vmem:[#allocation8 + $0xc2c] ss:$16 sps:$4 sm:$0xff]   ;;  %v9455_v54 = vld [vmem:[#allocation8 + $0xc20] ss:$16 sps:$4 sm:$0xff]  }
 0x41f   : > { %3745 = vmatprep.subr.bf16.mxu1 %v9388_v58  ;;  %v9458_v58 = vld [vmem:[#allocation8 + $0xc28] ss:$16 sps:$4 sm:$0xff]  }
 0x421   : > { %3660 = vmatpush1.bf16.msra.mxu0 %v9383_v2  ;;  %v9463_v2 = vld [vmem:[#allocation8 + $0xc44] ss:$16 sps:$4 sm:$0xff]  }
 0x422   : > { %3746 = vmatpush1.bf16.msra.mxu1 %v9386_v6  ;;  %3661 = vmatprep.subr.bf16.mxu0 %v9391_v7  ;;  %v9466_v6 = vld [vmem:[#allocation8 + $0xc4c] ss:$16 sps:$4 sm:$0xff]   ;;  %v9461_v7 = vld [vmem:[#allocation8 + $0xc40] ss:$16 sps:$4 sm:$0xff]  }
 0x423   : > { %3747 = vmatprep.subr.bf16.mxu1 %v9394_v8  ;;  %v9464_v8 = vld [vmem:[#allocation8 + $0xc48] ss:$16 sps:$4 sm:$0xff]  }
 0x425   : > { %3662 = vmatpush1.bf16.msra.mxu0 %v9389_v24  ;;  %v9469_v24 = vld [vmem:[#allocation8 + $0xc64] ss:$16 sps:$4 sm:$0xff]  }
 0x426   : > { %3748 = vmatpush1.bf16.msra.mxu1 %v9392_v34  ;;  %3663 = vmatprep.subr.bf16.mxu0 %v9397_v1  ;;  %v9467_v34 = vld [vmem:[#allocation8 + $0xc60] ss:$16 sps:$4 sm:$0xff]   ;;  %v9470_v1 = vld [vmem:[#allocation8 + $0xc68] ss:$16 sps:$4 sm:$0xff]  }
 0x427   : > { %3749 = vmatprep.subr.bf16.mxu1 %v9400_v4  ;;  %v9475_v4 = vld [vmem:[#allocation8 + $0xc84] ss:$16 sps:$4 sm:$0xff]  }
 0x429   : > { %3664 = vmatpush1.bf16.msra.mxu0 %v9395_v50  ;;  %v9478_v50 = vld [vmem:[#allocation8 + $0xc8c] ss:$16 sps:$4 sm:$0xff]  }
 0x42a   : > { %3750 = vmatpush1.bf16.msra.mxu1 %v9398_v5  ;;  %3665 = vmatprep.subr.bf16.mxu0 %v9403_v48  ;;  %v9476_v5 = vld [vmem:[#allocation8 + $0xc88] ss:$16 sps:$4 sm:$0xff]   ;;  %v9481_v48 = vld [vmem:[#allocation8 + $0xca4] ss:$16 sps:$4 sm:$0xff]  }
 0x42b   : > { %3751 = vmatprep.subr.bf16.mxu1 %v9406_v25  ;;  %v9484_v25 = vld [vmem:[#allocation8 + $0xcac] ss:$16 sps:$4 sm:$0xff]  }
 0x42d   : > { %3666 = vmatpush1.bf16.msra.mxu0 %v9401_v55  ;;  %v9479_v55 = vld [vmem:[#allocation8 + $0xca0] ss:$16 sps:$4 sm:$0xff]  }
 0x42e   : > { %3752 = vmatpush1.bf16.msra.mxu1 %v9404_v11  ;;  %3667 = vmatprep.subr.bf16.mxu0 %v9409_v12  ;;  %v9482_v11 = vld [vmem:[#allocation8 + $0xca8] ss:$16 sps:$4 sm:$0xff]   ;;  %v9487_v12 = vld [vmem:[#allocation8 + $0xcc4] ss:$16 sps:$4 sm:$0xff]  }
 0x42f   : > { %3753 = vmatprep.subr.bf16.mxu1 %v9412_v13  ;;  %v9490_v13 = vld [vmem:[#allocation8 + $0xccc] ss:$16 sps:$4 sm:$0xff]  }
 0x431   : > { %3668 = vmatpush1.bf16.msra.mxu0 %v9407_v14  ;;  %v9485_v14 = vld [vmem:[#allocation8 + $0xcc0] ss:$16 sps:$4 sm:$0xff]  }
 0x432   : > { %3754 = vmatpush1.bf16.msra.mxu1 %v9410_v16  ;;  %3669 = vmatprep.subr.bf16.mxu0 %v9415_v17  ;;  %v9488_v16 = vld [vmem:[#allocation8 + $0xcc8] ss:$16 sps:$4 sm:$0xff]   ;;  %v9493_v17 = vld [vmem:[#allocation8 + $0xce4] ss:$16 sps:$4 sm:$0xff]  }
 0x433   : > { %3755 = vmatprep.subr.bf16.mxu1 %v9418_v22  ;;  %v9496_v22 = vld [vmem:[#allocation8 + $0xcec] ss:$16 sps:$4 sm:$0xff]  }
 0x435   : > { %3670 = vmatpush1.bf16.msra.mxu0 %v9413_v23  ;;  %v9491_v23 = vld [vmem:[#allocation8 + $0xce0] ss:$16 sps:$4 sm:$0xff]  }
 0x436   : > { %3756 = vmatpush1.bf16.msra.mxu1 %v9416_v27  ;;  %3671 = vmatprep.subr.bf16.mxu0 %v9421_v29  ;;  %v9494_v27 = vld [vmem:[#allocation8 + $0xce8] ss:$16 sps:$4 sm:$0xff]   ;;  %v9499_v29 = vld [vmem:[#allocation8 + $0xd04] ss:$16 sps:$4 sm:$0xff]  }
 0x437   : > { %3757 = vmatprep.subr.bf16.mxu1 %v9424_v31  ;;  %v9502_v31 = vld [vmem:[#allocation8 + $0xd0c] ss:$16 sps:$4 sm:$0xff]  }
 0x439   : > { %3672 = vmatpush1.bf16.msra.mxu0 %v9419_v32  ;;  %v9497_v32 = vld [vmem:[#allocation8 + $0xd00] ss:$16 sps:$4 sm:$0xff]  }
 0x43a   : > { %3758 = vmatpush1.bf16.msra.mxu1 %v9422_v30  ;;  %3673 = vmatprep.subr.bf16.mxu0 %v9427_v26  ;;  %v9500_v30 = vld [vmem:[#allocation8 + $0xd08] ss:$16 sps:$4 sm:$0xff]   ;;  %v9505_v26 = vld [vmem:[#allocation8 + $0xd24] ss:$16 sps:$4 sm:$0xff]  }
 0x43b   : > { %3759 = vmatprep.subr.bf16.mxu1 %v9430_v33  ;;  %v9508_v33 = vld [vmem:[#allocation8 + $0xd2c] ss:$16 sps:$4 sm:$0xff]  }
 0x43d   : > { %3674 = vmatpush1.bf16.msra.mxu0 %v9425_v35  ;;  %v9503_v35 = vld [vmem:[#allocation8 + $0xd20] ss:$16 sps:$4 sm:$0xff]  }
 0x43e   : > { %3760 = vmatpush1.bf16.msra.mxu1 %v9428_v36  ;;  %3675 = vmatprep.subr.bf16.mxu0 %v9433_v44  ;;  %v9506_v36 = vld [vmem:[#allocation8 + $0xd28] ss:$16 sps:$4 sm:$0xff]   ;;  %v9511_v44 = vld [vmem:[#allocation8 + $0xd44] ss:$16 sps:$4 sm:$0xff]  }
 0x43f   : > { %3761 = vmatprep.subr.bf16.mxu1 %v9436_v40  ;;  %v9514_v40 = vld [vmem:[#allocation8 + $0xd4c] ss:$16 sps:$4 sm:$0xff]  }
 0x441   : > { %3676 = vmatpush1.bf16.msra.mxu0 %v9431_v37  ;;  %v9509_v37 = vld [vmem:[#allocation8 + $0xd40] ss:$16 sps:$4 sm:$0xff]  }
 0x442   : > { %3762 = vmatpush1.bf16.msra.mxu1 %v9434_v38  ;;  %3677 = vmatprep.subr.bf16.mxu0 %v9439_v39  ;;  %v9512_v38 = vld [vmem:[#allocation8 + $0xd48] ss:$16 sps:$4 sm:$0xff]   ;;  %v9517_v39 = vld [vmem:[#allocation8 + $0xd64] ss:$16 sps:$4 sm:$0xff]  }
 0x443   : > { %3763 = vmatprep.subr.bf16.mxu1 %v9442_v19  ;;  %v9520_v19 = vld [vmem:[#allocation8 + $0xd6c] ss:$16 sps:$4 sm:$0xff]  }
 0x445   : > { %3678 = vmatpush1.bf16.msra.mxu0 %v9437_v41  ;;  %v9515_v41 = vld [vmem:[#allocation8 + $0xd60] ss:$16 sps:$4 sm:$0xff]  }
 0x446   : > { %3764 = vmatpush1.bf16.msra.mxu1 %v9440_v15  ;;  %3679 = vmatprep.subr.bf16.mxu0 %v9445_v42  ;;  %v9518_v15 = vld [vmem:[#allocation8 + $0xd68] ss:$16 sps:$4 sm:$0xff]   ;;  %v9523_v42 = vld [vmem:[#allocation8 + $0xd84] ss:$16 sps:$4 sm:$0xff]  }
 0x447   : > { %3765 = vmatprep.subr.bf16.mxu1 %v9448_v43  ;;  %v9526_v43 = vld [vmem:[#allocation8 + $0xd8c] ss:$16 sps:$4 sm:$0xff]  }
 0x449   : > { %3680 = vmatpush1.bf16.msra.mxu0 %v9443_v47  ;;  %v9521_v47 = vld [vmem:[#allocation8 + $0xd80] ss:$16 sps:$4 sm:$0xff]  }
 0x44a   : > { %3766 = vmatpush1.bf16.msra.mxu1 %v9446_v46  ;;  %4572 = vmatprep.subr.bf16.mxu0 %v9451_v51  ;;  %v9524_v46 = vld [vmem:[#allocation8 + $0xd88] ss:$16 sps:$4 sm:$0xff]   ;;  %v9529_v51 = vld [vmem:[#allocation8 + $0xda4] ss:$16 sps:$4 sm:$0xff]  }
 0x44b   : > { %4658 = vmatprep.subr.bf16.mxu1 %v9454_v52  ;;  %v9532_v52 = vld [vmem:[#allocation8 + $0xdac] ss:$16 sps:$4 sm:$0xff]  }
 0x44c   : > { %3682 = vmatmul.mubr.bf16.vlgmr.msra.gmra.mrb[0].mxu0 %v10877_v60 }
 0x44d   : > { %3768 = vmatmul.mubr.bf16.vlgmr.msra.gmra.mrb[8].mxu1 %v10877_v60  ;;  %4573 = vmatpush1.bf16.msra.mxu0 %v9449_v56  ;;  %v9472_v60 = vld [vmem:[#allocation8 + $0xc6c] ss:$16 sps:$4 sm:$0xff]   ;;  %v9527_v56 = vld [vmem:[#allocation8 + $0xda0] ss:$16 sps:$4 sm:$0xff]  }
 0x44e   : > { %4604 = vmatprep.mubr.bf16.mxu0 %v10887_v0  ;;  %4659 = vmatpush1.bf16.msra.mxu1 %v9452_v57  ;;  %v9530_v57 = vld [vmem:[#allocation8 + $0xda8] ss:$16 sps:$4 sm:$0xff]  }
 0x44f   : > { %4690 = vmatprep.mubr.bf16.mxu1 %v10887_v0  ;;  %4574 = vmatprep.subr.bf16.mxu0 %v9457_v53  ;;  %v9473_v0 = vld [vmem:[#allocation8 + $0xc80] ss:$16 sps:$4 sm:$0xff]   ;;  %v9535_v53 = vld [vmem:[#allocation8 + $0xdc4] ss:$16 sps:$4 sm:$0xff]  }
 0x450   : > { %4660 = vmatprep.subr.bf16.mxu1 %v9460_v18  ;;  %v9538_v18 = vld [vmem:[#allocation8 + $0xdcc] ss:$16 sps:$4 sm:$0xff]  }
 0x451   : > { %4575 = vmatpush1.bf16.msra.mxu0 %v9455_v54  ;;  %v9533_v54 = vld [vmem:[#allocation8 + $0xdc0] ss:$16 sps:$4 sm:$0xff]  }
 0x452   : > { %4661 = vmatpush1.bf16.msra.mxu1 %v9458_v58  ;;  %4576 = vmatprep.subr.bf16.mxu0 %v9463_v2  ;;  %v9536_v58 = vld [vmem:[#allocation8 + $0xdc8] ss:$16 sps:$4 sm:$0xff]   ;;  %v9541_v2 = vld [vmem:[#allocation8 + $0xde4] ss:$16 sps:$4 sm:$0xff]  }
 0x453   : > { %4662 = vmatprep.subr.bf16.mxu1 %v9466_v6  ;;  %v9544_v6 = vld [vmem:[#allocation8 + $0xdec] ss:$16 sps:$4 sm:$0xff]  }
 0x455   : > { %4577 = vmatpush1.bf16.msra.mxu0 %v9461_v7  ;;  %v9539_v7 = vld [vmem:[#allocation8 + $0xde0] ss:$16 sps:$4 sm:$0xff]  }
 0x456   : > { %4663 = vmatpush1.bf16.msra.mxu1 %v9464_v8  ;;  %4578 = vmatprep.subr.bf16.mxu0 %v9469_v24  ;;  %v9542_v8 = vld [vmem:[#allocation8 + $0xde8] ss:$16 sps:$4 sm:$0xff]   ;;  %v9547_v24 = vld [vmem:[#allocation8 + $0xe04] ss:$16 sps:$4 sm:$0xff]  }
 0x457   : > { %4664 = vmatprep.subr.bf16.mxu1 %v9472_v60  ;;  %v9550_v60 = vld [vmem:[#allocation8 + $0xe0c] ss:$16 sps:$4 sm:$0xff]  }
 0x459   : > { %4579 = vmatpush1.bf16.msra.mxu0 %v9467_v34  ;;  %v9545_v34 = vld [vmem:[#allocation8 + $0xe00] ss:$16 sps:$4 sm:$0xff]  }
 0x45a   : > { %4665 = vmatpush1.bf16.msra.mxu1 %v9470_v1  ;;  %4580 = vmatprep.subr.bf16.mxu0 %v9475_v4  ;;  %v9548_v1 = vld [vmem:[#allocation8 + $0xe08] ss:$16 sps:$4 sm:$0xff]   ;;  %v9553_v4 = vld [vmem:[#allocation8 + $0xe24] ss:$16 sps:$4 sm:$0xff]  }
 0x45b   : > { %4666 = vmatprep.subr.bf16.mxu1 %v9478_v50  ;;  %v9556_v50 = vld [vmem:[#allocation8 + $0xe2c] ss:$16 sps:$4 sm:$0xff]  }
 0x45d   : > { %4581 = vmatpush1.bf16.msra.mxu0 %v9473_v0  ;;  %v9551_v0 = vld [vmem:[#allocation8 + $0xe20] ss:$16 sps:$4 sm:$0xff]  }
 0x45e   : > { %4667 = vmatpush1.bf16.msra.mxu1 %v9476_v5  ;;  %4582 = vmatprep.subr.bf16.mxu0 %v9481_v48  ;;  %v9554_v5 = vld [vmem:[#allocation8 + $0xe28] ss:$16 sps:$4 sm:$0xff]   ;;  %v9559_v48 = vld [vmem:[#allocation8 + $0xe44] ss:$16 sps:$4 sm:$0xff]  }
 0x45f   : > { %4668 = vmatprep.subr.bf16.mxu1 %v9484_v25  ;;  %v9562_v25 = vld [vmem:[#allocation8 + $0xe4c] ss:$16 sps:$4 sm:$0xff]  }
 0x461   : > { %4583 = vmatpush1.bf16.msra.mxu0 %v9479_v55  ;;  %v9557_v55 = vld [vmem:[#allocation8 + $0xe40] ss:$16 sps:$4 sm:$0xff]  }
 0x462   : > { %4669 = vmatpush1.bf16.msra.mxu1 %v9482_v11  ;;  %4584 = vmatprep.subr.bf16.mxu0 %v9487_v12  ;;  %v9560_v11 = vld [vmem:[#allocation8 + $0xe48] ss:$16 sps:$4 sm:$0xff]   ;;  %v9565_v12 = vld [vmem:[#allocation8 + $0xe64] ss:$16 sps:$4 sm:$0xff]  }
 0x463   : > { %4670 = vmatprep.subr.bf16.mxu1 %v9490_v13  ;;  %v9563_v13 = vld [vmem:[#allocation8 + $0xe60] ss:$16 sps:$4 sm:$0xff]  }
 0x465   : > { %4585 = vmatpush1.bf16.msra.mxu0 %v9485_v14  ;;  %v9566_v14 = vld [vmem:[#allocation8 + $0xe68] ss:$16 sps:$4 sm:$0xff]  }
 0x466   : > { %4671 = vmatpush1.bf16.msra.mxu1 %v9488_v16  ;;  %4586 = vmatprep.subr.bf16.mxu0 %v9493_v17  ;;  %v9571_v16 = vld [vmem:[#allocation8 + $0xe84] ss:$16 sps:$4 sm:$0xff]   ;;  %v9574_v17 = vld [vmem:[#allocation8 + $0xe8c] ss:$16 sps:$4 sm:$0xff]  }
 0x467   : > { %4672 = vmatprep.subr.bf16.mxu1 %v9496_v22  ;;  %v9572_v22 = vld [vmem:[#allocation8 + $0xe88] ss:$16 sps:$4 sm:$0xff]  }
 0x469   : > { %4587 = vmatpush1.bf16.msra.mxu0 %v9491_v23  ;;  %v9577_v23 = vld [vmem:[#allocation8 + $0xea4] ss:$16 sps:$4 sm:$0xff]  }
 0x46a   : > { %4673 = vmatpush1.bf16.msra.mxu1 %v9494_v27  ;;  %4588 = vmatprep.subr.bf16.mxu0 %v9499_v29  ;;  %v9580_v27 = vld [vmem:[#allocation8 + $0xeac] ss:$16 sps:$4 sm:$0xff]   ;;  %v9575_v29 = vld [vmem:[#allocation8 + $0xea0] ss:$16 sps:$4 sm:$0xff]  }
 0x46b   : > { %4674 = vmatprep.subr.bf16.mxu1 %v9502_v31  ;;  %v9578_v31 = vld [vmem:[#allocation8 + $0xea8] ss:$16 sps:$4 sm:$0xff]  }
 0x46d   : > { %4589 = vmatpush1.bf16.msra.mxu0 %v9497_v32  ;;  %v9583_v32 = vld [vmem:[#allocation8 + $0xec4] ss:$16 sps:$4 sm:$0xff]  }
 0x46e   : > { %4675 = vmatpush1.bf16.msra.mxu1 %v9500_v30  ;;  %4590 = vmatprep.subr.bf16.mxu0 %v9505_v26  ;;  %v9586_v30 = vld [vmem:[#allocation8 + $0xecc] ss:$16 sps:$4 sm:$0xff]   ;;  %v9581_v26 = vld [vmem:[#allocation8 + $0xec0] ss:$16 sps:$4 sm:$0xff]  }
 0x46f   : > { %4676 = vmatprep.subr.bf16.mxu1 %v9508_v33  ;;  %v9584_v33 = vld [vmem:[#allocation8 + $0xec8] ss:$16 sps:$4 sm:$0xff]  }
 0x471   : > { %4591 = vmatpush1.bf16.msra.mxu0 %v9503_v35  ;;  %v9589_v35 = vld [vmem:[#allocation8 + $0xee4] ss:$16 sps:$4 sm:$0xff]  }
 0x472   : > { %4677 = vmatpush1.bf16.msra.mxu1 %v9506_v36  ;;  %4592 = vmatprep.subr.bf16.mxu0 %v9511_v44  ;;  %v9592_v36 = vld [vmem:[#allocation8 + $0xeec] ss:$16 sps:$4 sm:$0xff]   ;;  %v9587_v44 = vld [vmem:[#allocation8 + $0xee0] ss:$16 sps:$4 sm:$0xff]  }
 0x473   : > { %4678 = vmatprep.subr.bf16.mxu1 %v9514_v40  ;;  %v9590_v40 = vld [vmem:[#allocation8 + $0xee8] ss:$16 sps:$4 sm:$0xff]  }
 0x475   : > { %4593 = vmatpush1.bf16.msra.mxu0 %v9509_v37  ;;  %v9595_v37 = vld [vmem:[#allocation8 + $0xf04] ss:$16 sps:$4 sm:$0xff]  }
 0x476   : > { %4679 = vmatpush1.bf16.msra.mxu1 %v9512_v38  ;;  %4594 = vmatprep.subr.bf16.mxu0 %v9517_v39  ;;  %v9598_v38 = vld [vmem:[#allocation8 + $0xf0c] ss:$16 sps:$4 sm:$0xff]   ;;  %v9593_v39 = vld [vmem:[#allocation8 + $0xf00] ss:$16 sps:$4 sm:$0xff]  }
 0x477   : > { %4680 = vmatprep.subr.bf16.mxu1 %v9520_v19  ;;  %v9596_v19 = vld [vmem:[#allocation8 + $0xf08] ss:$16 sps:$4 sm:$0xff]  }
 0x479   : > { %4595 = vmatpush1.bf16.msra.mxu0 %v9515_v41  ;;  %v9601_v41 = vld [vmem:[#allocation8 + $0xf24] ss:$16 sps:$4 sm:$0xff]  }
 0x47a   : > { %4681 = vmatpush1.bf16.msra.mxu1 %v9518_v15  ;;  %4596 = vmatprep.subr.bf16.mxu0 %v9523_v42  ;;  %v9604_v15 = vld [vmem:[#allocation8 + $0xf2c] ss:$16 sps:$4 sm:$0xff]   ;;  %v9599_v42 = vld [vmem:[#allocation8 + $0xf20] ss:$16 sps:$4 sm:$0xff]  }
 0x47b   : > { %4682 = vmatprep.subr.bf16.mxu1 %v9526_v43  ;;  %v9602_v43 = vld [vmem:[#allocation8 + $0xf28] ss:$16 sps:$4 sm:$0xff]  }
 0x47d   : > { %4597 = vmatpush1.bf16.msra.mxu0 %v9521_v47  ;;  %v9607_v47 = vld [vmem:[#allocation8 + $0xf44] ss:$16 sps:$4 sm:$0xff]  }
 0x47e   : > { %4683 = vmatpush1.bf16.msra.mxu1 %v9524_v46  ;;  %4598 = vmatprep.subr.bf16.mxu0 %v9529_v51  ;;  %v9610_v46 = vld [vmem:[#allocation8 + $0xf4c] ss:$16 sps:$4 sm:$0xff]   ;;  %v9605_v51 = vld [vmem:[#allocation8 + $0xf40] ss:$16 sps:$4 sm:$0xff]  }
 0x47f   : > { %4684 = vmatprep.subr.bf16.mxu1 %v9532_v52  ;;  %v9608_v52 = vld [vmem:[#allocation8 + $0xf48] ss:$16 sps:$4 sm:$0xff]  }
 0x481   : > { %4599 = vmatpush1.bf16.msra.mxu0 %v9527_v56  ;;  %v9613_v56 = vld [vmem:[#allocation8 + $0xf64] ss:$16 sps:$4 sm:$0xff]  }
 0x482   : > { %4685 = vmatpush1.bf16.msra.mxu1 %v9530_v57  ;;  %4600 = vmatprep.subr.bf16.mxu0 %v9535_v53  ;;  %v9616_v57 = vld [vmem:[#allocation8 + $0xf6c] ss:$16 sps:$4 sm:$0xff]   ;;  %v9611_v53 = vld [vmem:[#allocation8 + $0xf60] ss:$16 sps:$4 sm:$0xff]  }
 0x483   : > { %4686 = vmatprep.subr.bf16.mxu1 %v9538_v18  ;;  %v9614_v18 = vld [vmem:[#allocation8 + $0xf68] ss:$16 sps:$4 sm:$0xff]  }
 0x485   : > { %4601 = vmatpush1.bf16.msra.mxu0 %v9533_v54  ;;  %v9619_v54 = vld [vmem:[#allocation8 + $0xf84] ss:$16 sps:$4 sm:$0xff]  }
 0x486   : > { %4687 = vmatpush1.bf16.msra.mxu1 %v9536_v58  ;;  %4602 = vmatprep.subr.bf16.mxu0 %v9541_v2  ;;  %v9622_v58 = vld [vmem:[#allocation8 + $0xf8c] ss:$16 sps:$4 sm:$0xff]   ;;  %v9617_v2 = vld [vmem:[#allocation8 + $0xf80] ss:$16 sps:$4 sm:$0xff]  }
 0x487   : > { %4688 = vmatprep.subr.bf16.mxu1 %v9544_v6  ;;  %v9620_v6 = vld [vmem:[#allocation8 + $0xf88] ss:$16 sps:$4 sm:$0xff]  }
 0x489   : > { %4603 = vmatpush1.bf16.msra.mxu0 %v9539_v7  ;;  %v9625_v7 = vld [vmem:[#allocation8 + $0xfa4] ss:$16 sps:$4 sm:$0xff]  }
 0x48a   : > { %4689 = vmatpush1.bf16.msra.mxu1 %v9542_v8  ;;  %4615 = vmatprep.subr.bf16.mxu0 %v9547_v24  ;;  %v9628_v8 = vld [vmem:[#allocation8 + $0xfac] ss:$16 sps:$4 sm:$0xff]   ;;  %v9623_v24 = vld [vmem:[#allocation8 + $0xfa0] ss:$16 sps:$4 sm:$0xff]  }
 0x48b   : > { %4701 = vmatprep.subr.bf16.mxu1 %v9550_v60  ;;  %v9626_v60 = vld [vmem:[#allocation8 + $0xfa8] ss:$16 sps:$4 sm:$0xff]  }
 0x48c   : > { %4605 = vmatmul.mubr.bf16.vlgmr.msra.gmra.mrb[0].mxu0 %v10903_v9 }
 0x48d   : > { %4691 = vmatmul.mubr.bf16.vlgmr.msra.gmra.mrb[8].mxu1 %v10903_v9  ;;  %4616 = vmatpush1.bf16.msra.mxu0 %v9545_v34  ;;  %v9568_v9 = vld [vmem:[#allocation8 + $0xe6c] ss:$16 sps:$4 sm:$0xff]   ;;  %v9631_v34 = vld [vmem:[#allocation8 + $0xfc4] ss:$16 sps:$4 sm:$0xff]  }
 0x48e   : > { %4647 = vmatprep.mubr.bf16.mxu0 %v10906_v10  ;;  %4702 = vmatpush1.bf16.msra.mxu1 %v9548_v1  ;;  %v9634_v1 = vld [vmem:[#allocation8 + $0xfcc] ss:$16 sps:$4 sm:$0xff]  }
 0x48f   : > { %4733 = vmatprep.mubr.bf16.mxu1 %v10906_v10  ;;  %4617 = vmatprep.subr.bf16.mxu0 %v9553_v4  ;;  %v9569_v10 = vld [vmem:[#allocation8 + $0xe80] ss:$16 sps:$4 sm:$0xff]  }
 0x490   : > { %4703 = vmatprep.subr.bf16.mxu1 %v9556_v50  ;;  %v9629_v4 = vld [vmem:[#allocation8 + $0xfc0] ss:$16 sps:$4 sm:$0xff]   ;;  %v9632_v50 = vld [vmem:[#allocation8 + $0xfc8] ss:$16 sps:$4 sm:$0xff]  }
 0x491   : > { %4618 = vmatpush1.bf16.msra.mxu0 %v9551_v0  ;;  %v9637_v0 = vld [vmem:[#allocation8 + $0xfe4] ss:$16 sps:$4 sm:$0xff]  }
 0x492   : > { %4704 = vmatpush1.bf16.msra.mxu1 %v9554_v5  ;;  %4619 = vmatprep.subr.bf16.mxu0 %v9559_v48  ;;  %v9640_v5 = vld [vmem:[#allocation8 + $0xfec] ss:$16 sps:$4 sm:$0xff]   ;;  %v9635_v48 = vld [vmem:[#allocation8 + $0xfe0] ss:$16 sps:$4 sm:$0xff]  }
 0x493   : > { %4705 = vmatprep.subr.bf16.mxu1 %v9562_v25  ;;  %v9638_v25 = vld [vmem:[#allocation8 + $0xfe8] ss:$16 sps:$4 sm:$0xff]  }
 0x495   : > { %4620 = vmatpush1.bf16.msra.mxu0 %v9557_v55  ;;  %v9643_v55 = vld [vmem:[#allocation8 + $0x1004] ss:$16 sps:$4 sm:$0xff]  }
 0x496   : > { %4706 = vmatpush1.bf16.msra.mxu1 %v9560_v11  ;;  %4621 = vmatprep.subr.bf16.mxu0 %v9565_v12  ;;  %v9646_v11 = vld [vmem:[#allocation8 + $0x100c] ss:$16 sps:$4 sm:$0xff]   ;;  %v9641_v12 = vld [vmem:[#allocation8 + $0x1000] ss:$16 sps:$4 sm:$0xff]  }
 0x497   : > { %4707 = vmatprep.subr.bf16.mxu1 %v9568_v9  ;;  %v9644_v9 = vld [vmem:[#allocation8 + $0x1008] ss:$16 sps:$4 sm:$0xff]  }
 0x499   : > { %4622 = vmatpush1.bf16.msra.mxu0 %v9563_v13  ;;  %v9843_v13 = vld [vmem:[#allocation11 + $0x10] sm:$0xff]  }
 0x49a   : > { %4708 = vmatpush1.bf16.msra.mxu1 %v9566_v14  ;;  %4623 = vmatprep.subr.bf16.mxu0 %v9571_v16  ;;  %v9649_v14 = vld [vmem:[#allocation8 + $0x1024] ss:$16 sps:$4 sm:$0xff]   ;;  %v9652_v16 = vld [vmem:[#allocation8 + $0x102c] ss:$16 sps:$4 sm:$0xff]  }
 0x49b   : > { %4709 = vmatprep.subr.bf16.mxu1 %v9574_v17  ;;  %v9647_v17 = vld [vmem:[#allocation8 + $0x1020] ss:$16 sps:$4 sm:$0xff]  }
 0x49d   : > { %4624 = vmatpush1.bf16.msra.mxu0 %v9569_v10  ;;  %v9650_v10 = vld [vmem:[#allocation8 + $0x1028] ss:$16 sps:$4 sm:$0xff]  }
 0x49e   : > { %4710 = vmatpush1.bf16.msra.mxu1 %v9572_v22  ;;  %4625 = vmatprep.subr.bf16.mxu0 %v9577_v23  ;;  %v9655_v22 = vld [vmem:[#allocation8 + $0x1044] ss:$16 sps:$4 sm:$0xff]   ;;  %v9658_v23 = vld [vmem:[#allocation8 + $0x104c] ss:$16 sps:$4 sm:$0xff]  }
 0x49f   : > { %4711 = vmatprep.subr.bf16.mxu1 %v9580_v27  ;;  %v9653_v27 = vld [vmem:[#allocation8 + $0x1040] ss:$16 sps:$4 sm:$0xff]  }
 0x4a1   : > { %4626 = vmatpush1.bf16.msra.mxu0 %v9575_v29  ;;  %v9661_v29 = vld [vmem:[#allocation8 + $0x1064] ss:$16 sps:$4 sm:$0xff]  }
 0x4a2   : > { %4712 = vmatpush1.bf16.msra.mxu1 %v9578_v31  ;;  %4627 = vmatprep.subr.bf16.mxu0 %v9583_v32  ;;  %v9664_v31 = vld [vmem:[#allocation8 + $0x106c] ss:$16 sps:$4 sm:$0xff]   ;;  %v9659_v32 = vld [vmem:[#allocation8 + $0x1060] ss:$16 sps:$4 sm:$0xff]  }
 0x4a3   : > { %4713 = vmatprep.subr.bf16.mxu1 %v9586_v30  ;;  %v9662_v30 = vld [vmem:[#allocation8 + $0x1068] ss:$16 sps:$4 sm:$0xff]  }
 0x4a5   : > { %4628 = vmatpush1.bf16.msra.mxu0 %v9581_v26  ;;  %v9667_v26 = vld [vmem:[#allocation8 + $0x1084] ss:$16 sps:$4 sm:$0xff]  }
 0x4a6   : > { %4714 = vmatpush1.bf16.msra.mxu1 %v9584_v33  ;;  %4629 = vmatprep.subr.bf16.mxu0 %v9589_v35  ;;  %v9670_v33 = vld [vmem:[#allocation8 + $0x108c] ss:$16 sps:$4 sm:$0xff]   ;;  %v9668_v35 = vld [vmem:[#allocation8 + $0x1088] ss:$16 sps:$4 sm:$0xff]  }
 0x4a7   : > { %4715 = vmatprep.subr.bf16.mxu1 %v9592_v36  ;;  %v9673_v36 = vld [vmem:[#allocation8 + $0x10a4] ss:$16 sps:$4 sm:$0xff]  }
 0x4a9   : > { %4630 = vmatpush1.bf16.msra.mxu0 %v9587_v44  ;;  %v9676_v44 = vld [vmem:[#allocation8 + $0x10ac] ss:$16 sps:$4 sm:$0xff]  }
 0x4aa   : > { %4716 = vmatpush1.bf16.msra.mxu1 %v9590_v40  ;;  %4631 = vmatprep.subr.bf16.mxu0 %v9595_v37  ;;  %v9671_v40 = vld [vmem:[#allocation8 + $0x10a0] ss:$16 sps:$4 sm:$0xff]   ;;  %v9674_v37 = vld [vmem:[#allocation8 + $0x10a8] ss:$16 sps:$4 sm:$0xff]  }
 0x4ab   : > { %4717 = vmatprep.subr.bf16.mxu1 %v9598_v38  ;;  %v9679_v38 = vld [vmem:[#allocation8 + $0x10c4] ss:$16 sps:$4 sm:$0xff]  }
 0x4ad   : > { %4632 = vmatpush1.bf16.msra.mxu0 %v9593_v39  ;;  %v9682_v39 = vld [vmem:[#allocation8 + $0x10cc] ss:$16 sps:$4 sm:$0xff]  }
 0x4ae   : > { %4718 = vmatpush1.bf16.msra.mxu1 %v9596_v19  ;;  %4633 = vmatprep.subr.bf16.mxu0 %v9601_v41  ;;  %v9677_v19 = vld [vmem:[#allocation8 + $0x10c0] ss:$16 sps:$4 sm:$0xff]   ;;  %v9680_v41 = vld [vmem:[#allocation8 + $0x10c8] ss:$16 sps:$4 sm:$0xff]  }
 0x4af   : > { %4719 = vmatprep.subr.bf16.mxu1 %v9604_v15  ;;  %v9685_v15 = vld [vmem:[#allocation8 + $0x10e4] ss:$16 sps:$4 sm:$0xff]  }
 0x4b1   : > { %4634 = vmatpush1.bf16.msra.mxu0 %v9599_v42  ;;  %v9688_v42 = vld [vmem:[#allocation8 + $0x10ec] ss:$16 sps:$4 sm:$0xff]  }
 0x4b2   : > { %4720 = vmatpush1.bf16.msra.mxu1 %v9602_v43  ;;  %4635 = vmatprep.subr.bf16.mxu0 %v9607_v47  ;;  %v9683_v43 = vld [vmem:[#allocation8 + $0x10e0] ss:$16 sps:$4 sm:$0xff]   ;;  %v9686_v47 = vld [vmem:[#allocation8 + $0x10e8] ss:$16 sps:$4 sm:$0xff]  }
 0x4b3   : > { %4721 = vmatprep.subr.bf16.mxu1 %v9610_v46  ;;  %v9691_v46 = vld [vmem:[#allocation8 + $0x1104] ss:$16 sps:$4 sm:$0xff]  }
 0x4b5   : > { %4636 = vmatpush1.bf16.msra.mxu0 %v9605_v51  ;;  %v9694_v51 = vld [vmem:[#allocation8 + $0x110c] ss:$16 sps:$4 sm:$0xff]  }
 0x4b6   : > { %4722 = vmatpush1.bf16.msra.mxu1 %v9608_v52  ;;  %4637 = vmatprep.subr.bf16.mxu0 %v9613_v56  ;;  %v9689_v52 = vld [vmem:[#allocation8 + $0x1100] ss:$16 sps:$4 sm:$0xff]   ;;  %v9692_v56 = vld [vmem:[#allocation8 + $0x1108] ss:$16 sps:$4 sm:$0xff]  }
 0x4b7   : > { %4723 = vmatprep.subr.bf16.mxu1 %v9616_v57  ;;  %v9697_v57 = vld [vmem:[#allocation8 + $0x1124] ss:$16 sps:$4 sm:$0xff]  }
 0x4b9   : > { %4638 = vmatpush1.bf16.msra.mxu0 %v9611_v53  ;;  %v9700_v53 = vld [vmem:[#allocation8 + $0x112c] ss:$16 sps:$4 sm:$0xff]  }
 0x4ba   : > { %4724 = vmatpush1.bf16.msra.mxu1 %v9614_v18  ;;  %4639 = vmatprep.subr.bf16.mxu0 %v9619_v54  ;;  %v9695_v18 = vld [vmem:[#allocation8 + $0x1120] ss:$16 sps:$4 sm:$0xff]   ;;  %v9698_v54 = vld [vmem:[#allocation8 + $0x1128] ss:$16 sps:$4 sm:$0xff]  }
 0x4bb   : > { %4725 = vmatprep.subr.bf16.mxu1 %v9622_v58  ;;  %v9703_v58 = vld [vmem:[#allocation8 + $0x1144] ss:$16 sps:$4 sm:$0xff]  }
 0x4bd   : > { %4640 = vmatpush1.bf16.msra.mxu0 %v9617_v2  ;;  %v9706_v2 = vld [vmem:[#allocation8 + $0x114c] ss:$16 sps:$4 sm:$0xff]  }
 0x4be   : > { %4726 = vmatpush1.bf16.msra.mxu1 %v9620_v6  ;;  %4641 = vmatprep.subr.bf16.mxu0 %v9625_v7  ;;  %v9701_v6 = vld [vmem:[#allocation8 + $0x1140] ss:$16 sps:$4 sm:$0xff]   ;;  %v9704_v7 = vld [vmem:[#allocation8 + $0x1148] ss:$16 sps:$4 sm:$0xff]  }
 0x4bf   : > { %4727 = vmatprep.subr.bf16.mxu1 %v9628_v8  ;;  %v9709_v8 = vld [vmem:[#allocation8 + $0x1164] ss:$16 sps:$4 sm:$0xff]  }
 0x4c1   : > { %4642 = vmatpush1.bf16.msra.mxu0 %v9623_v24  ;;  %v9712_v24 = vld [vmem:[#allocation8 + $0x116c] ss:$16 sps:$4 sm:$0xff]  }
 0x4c2   : > { %4728 = vmatpush1.bf16.msra.mxu1 %v9626_v60  ;;  %4643 = vmatprep.subr.bf16.mxu0 %v9631_v34  ;;  %v9707_v60 = vld [vmem:[#allocation8 + $0x1160] ss:$16 sps:$4 sm:$0xff]   ;;  %v9710_v34 = vld [vmem:[#allocation8 + $0x1168] ss:$16 sps:$4 sm:$0xff]  }
 0x4c3   : > { %4729 = vmatprep.subr.bf16.mxu1 %v9634_v1  ;;  %v9715_v1 = vld [vmem:[#allocation8 + $0x1184] ss:$16 sps:$4 sm:$0xff]  }
 0x4c5   : > { %4644 = vmatpush1.bf16.msra.mxu0 %v9629_v4  ;;  %v9718_v4 = vld [vmem:[#allocation8 + $0x118c] ss:$16 sps:$4 sm:$0xff]  }
 0x4c6   : > { %4730 = vmatpush1.bf16.msra.mxu1 %v9632_v50  ;;  %4645 = vmatprep.subr.bf16.mxu0 %v9637_v0  ;;  %v9713_v50 = vld [vmem:[#allocation8 + $0x1180] ss:$16 sps:$4 sm:$0xff]   ;;  %v9716_v0 = vld [vmem:[#allocation8 + $0x1188] ss:$16 sps:$4 sm:$0xff]  }
 0x4c7   : > { %4731 = vmatprep.subr.bf16.mxu1 %v9640_v5  ;;  %v9721_v5 = vld [vmem:[#allocation8 + $0x11a4] ss:$16 sps:$4 sm:$0xff]  }
 0x4c9   : > { %4646 = vmatpush1.bf16.msra.mxu0 %v9635_v48  ;;  %v9724_v48 = vld [vmem:[#allocation8 + $0x11ac] ss:$16 sps:$4 sm:$0xff]  }
 0x4ca   : > { %4732 = vmatpush1.bf16.msra.mxu1 %v9638_v25  ;;  %5525 = vmatprep.subr.bf16.mxu0 %v9643_v55  ;;  %v9719_v25 = vld [vmem:[#allocation8 + $0x11a0] ss:$16 sps:$4 sm:$0xff]   ;;  %v9722_v55 = vld [vmem:[#allocation8 + $0x11a8] ss:$16 sps:$4 sm:$0xff]  }
 0x4cb   : > { %5611 = vmatprep.subr.bf16.mxu1 %v9646_v11  ;;  %v9727_v11 = vld [vmem:[#allocation8 + $0x11c4] ss:$16 sps:$4 sm:$0xff]  }
 0x4cc   : > { %4648 = vmatmul.mubr.bf16.vlgmr.msra.gmra.mrb[0].mxu0 %v10909_v3 }
 0x4cd   : > { %4734 = vmatmul.mubr.bf16.vlgmr.msra.gmra.mrb[8].mxu1 %v10909_v3  ;;  %5526 = vmatpush1.bf16.msra.mxu0 %v9641_v12  ;;  %v9656_v3 = vld [vmem:[#allocation8 + $0x1048] ss:$16 sps:$4 sm:$0xff]   ;;  %v9730_v12 = vld [vmem:[#allocation8 + $0x11cc] ss:$16 sps:$4 sm:$0xff]  }
 0x4ce   : > { %8202 = vmatprep.mubr.msk.bf16.mxu0 %vm10959_vm14, %v10881_v62  ;;  %5612 = vmatpush1.bf16.msra.mxu1 %v9644_v9  ;;  %v9725_v9 = vld [vmem:[#allocation8 + $0x11c0] ss:$16 sps:$4 sm:$0xff]  }
 0x4cf   : > { %8214 = vmatprep.mubr.msk.bf16.mxu1 %vm10959_vm14, %v10881_v62  ;;  %5527 = vmatprep.subr.bf16.mxu0 %v9649_v14  ;;  %v9665_v62 = vld [vmem:[#allocation8 + $0x1080] ss:$16 sps:$4 sm:$0xff]   ;;  %v9728_v14 = vld [vmem:[#allocation8 + $0x11c8] ss:$16 sps:$4 sm:$0xff]  }
 0x4d0   : > { %5613 = vmatprep.subr.bf16.mxu1 %v9652_v16  ;;  %v9733_v16 = vld [vmem:[#allocation8 + $0x11e4] ss:$16 sps:$4 sm:$0xff]  }
 0x4d1   : > { %5528 = vmatpush1.bf16.msra.mxu0 %v9647_v17  ;;  %v9736_v17 = vld [vmem:[#allocation8 + $0x11ec] ss:$16 sps:$4 sm:$0xff]  }
 0x4d2   : > { %5614 = vmatpush1.bf16.msra.mxu1 %v9650_v10  ;;  %5529 = vmatprep.subr.bf16.mxu0 %v9655_v22  ;;  %v9731_v10 = vld [vmem:[#allocation8 + $0x11e0] ss:$16 sps:$4 sm:$0xff]   ;;  %v9734_v22 = vld [vmem:[#allocation8 + $0x11e8] ss:$16 sps:$4 sm:$0xff]  }
 0x4d3   : > { %5615 = vmatprep.subr.bf16.mxu1 %v9658_v23  ;;  %v9739_v23 = vld [vmem:[#allocation8 + $0x1204] ss:$16 sps:$4 sm:$0xff]  }
 0x4d5   : > { %5530 = vmatpush1.bf16.msra.mxu0 %v9653_v27  ;;  %v9742_v27 = vld [vmem:[#allocation8 + $0x120c] ss:$16 sps:$4 sm:$0xff]  }
 0x4d6   : > { %5616 = vmatpush1.bf16.msra.mxu1 %v9656_v3  ;;  %5531 = vmatprep.subr.bf16.mxu0 %v9661_v29  ;;  %v9737_v3 = vld [vmem:[#allocation8 + $0x1200] ss:$16 sps:$4 sm:$0xff]   ;;  %v9740_v29 = vld [vmem:[#allocation8 + $0x1208] ss:$16 sps:$4 sm:$0xff]  }
 0x4d7   : > { %5617 = vmatprep.subr.bf16.mxu1 %v9664_v31  ;;  %v9745_v31 = vld [vmem:[#allocation8 + $0x1224] ss:$16 sps:$4 sm:$0xff]  }
 0x4d9   : > { %5532 = vmatpush1.bf16.msra.mxu0 %v9659_v32  ;;  %v9748_v32 = vld [vmem:[#allocation8 + $0x122c] ss:$16 sps:$4 sm:$0xff]  }
 0x4da   : > { %5618 = vmatpush1.bf16.msra.mxu1 %v9662_v30  ;;  %5533 = vmatprep.subr.bf16.mxu0 %v9667_v26  ;;  %v9743_v30 = vld [vmem:[#allocation8 + $0x1220] ss:$16 sps:$4 sm:$0xff]   ;;  %v9746_v26 = vld [vmem:[#allocation8 + $0x1228] ss:$16 sps:$4 sm:$0xff]  }
 0x4db   : > { %5619 = vmatprep.subr.bf16.mxu1 %v9670_v33  ;;  %v9751_v33 = vld [vmem:[#allocation8 + $0x1244] ss:$16 sps:$4 sm:$0xff]  }
 0x4dd   : > { %5534 = vmatpush1.bf16.msra.mxu0 %v9665_v62  ;;  %v9754_v62 = vld [vmem:[#allocation8 + $0x124c] ss:$16 sps:$4 sm:$0xff]  }
 0x4de   : > { %5620 = vmatpush1.bf16.msra.mxu1 %v9668_v35  ;;  %5535 = vmatprep.subr.bf16.mxu0 %v9673_v36  ;;  %v9749_v35 = vld [vmem:[#allocation8 + $0x1240] ss:$16 sps:$4 sm:$0xff]   ;;  %v9757_v36 = vld [vmem:[#allocation8 + $0x1264] ss:$16 sps:$4 sm:$0xff]  }
 0x4df   : > { %5621 = vmatprep.subr.bf16.mxu1 %v9676_v44  ;;  %v9760_v44 = vld [vmem:[#allocation8 + $0x126c] ss:$16 sps:$4 sm:$0xff]  }
 0x4e1   : > { %5536 = vmatpush1.bf16.msra.mxu0 %v9671_v40  ;;  %v9755_v40 = vld [vmem:[#allocation8 + $0x1260] ss:$16 sps:$4 sm:$0xff]  }
 0x4e2   : > { %5622 = vmatpush1.bf16.msra.mxu1 %v9674_v37  ;;  %5537 = vmatprep.subr.bf16.mxu0 %v9679_v38  ;;  %v9758_v37 = vld [vmem:[#allocation8 + $0x1268] ss:$16 sps:$4 sm:$0xff]   ;;  %v9763_v38 = vld [vmem:[#allocation8 + $0x1284] ss:$16 sps:$4 sm:$0xff]  }
 0x4e3   : > { %5623 = vmatprep.subr.bf16.mxu1 %v9682_v39  ;;  %v9766_v39 = vld [vmem:[#allocation8 + $0x128c] ss:$16 sps:$4 sm:$0xff]  }
 0x4e5   : > { %5538 = vmatpush1.bf16.msra.mxu0 %v9677_v19  ;;  %v9764_v19 = vld [vmem:[#allocation8 + $0x1288] ss:$16 sps:$4 sm:$0xff]  }
 0x4e6   : > { %5624 = vmatpush1.bf16.msra.mxu1 %v9680_v41  ;;  %5539 = vmatprep.subr.bf16.mxu0 %v9685_v15  ;;  %v9769_v41 = vld [vmem:[#allocation8 + $0x12a4] ss:$16 sps:$4 sm:$0xff]   ;;  %v9772_v15 = vld [vmem:[#allocation8 + $0x12ac] ss:$16 sps:$4 sm:$0xff]  }
 0x4e7   : > { %5625 = vmatprep.subr.bf16.mxu1 %v9688_v42  ;;  %v9767_v42 = vld [vmem:[#allocation8 + $0x12a0] ss:$16 sps:$4 sm:$0xff]  }
 0x4e9   : > { %5540 = vmatpush1.bf16.msra.mxu0 %v9683_v43  ;;  %v9770_v43 = vld [vmem:[#allocation8 + $0x12a8] ss:$16 sps:$4 sm:$0xff]  }
 0x4ea   : > { %5626 = vmatpush1.bf16.msra.mxu1 %v9686_v47  ;;  %5541 = vmatprep.subr.bf16.mxu0 %v9691_v46  ;;  %v9775_v47 = vld [vmem:[#allocation8 + $0x12c4] ss:$16 sps:$4 sm:$0xff]   ;;  %v9778_v46 = vld [vmem:[#allocation8 + $0x12cc] ss:$16 sps:$4 sm:$0xff]  }
 0x4eb   : > { %5627 = vmatprep.subr.bf16.mxu1 %v9694_v51  ;;  %v9773_v51 = vld [vmem:[#allocation8 + $0x12c0] ss:$16 sps:$4 sm:$0xff]  }
 0x4ed   : > { %5542 = vmatpush1.bf16.msra.mxu0 %v9689_v52  ;;  %v9776_v52 = vld [vmem:[#allocation8 + $0x12c8] ss:$16 sps:$4 sm:$0xff]  }
 0x4ee   : > { %5628 = vmatpush1.bf16.msra.mxu1 %v9692_v56  ;;  %5543 = vmatprep.subr.bf16.mxu0 %v9697_v57  ;;  %v9781_v56 = vld [vmem:[#allocation8 + $0x12e4] ss:$16 sps:$4 sm:$0xff]   ;;  %v9784_v57 = vld [vmem:[#allocation8 + $0x12ec] ss:$16 sps:$4 sm:$0xff]  }
 0x4ef   : > { %5629 = vmatprep.subr.bf16.mxu1 %v9700_v53  ;;  %v9779_v53 = vld [vmem:[#allocation8 + $0x12e0] ss:$16 sps:$4 sm:$0xff]  }
 0x4f1   : > { %5544 = vmatpush1.bf16.msra.mxu0 %v9695_v18  ;;  %v9782_v18 = vld [vmem:[#allocation8 + $0x12e8] ss:$16 sps:$4 sm:$0xff]  }
 0x4f2   : > { %5630 = vmatpush1.bf16.msra.mxu1 %v9698_v54  ;;  %5545 = vmatprep.subr.bf16.mxu0 %v9703_v58  ;;  %v9787_v54 = vld [vmem:[#allocation8 + $0x1304] ss:$16 sps:$4 sm:$0xff]   ;;  %v9790_v58 = vld [vmem:[#allocation8 + $0x130c] ss:$16 sps:$4 sm:$0xff]  }
 0x4f3   : > { %5631 = vmatprep.subr.bf16.mxu1 %v9706_v2  ;;  %v9785_v2 = vld [vmem:[#allocation8 + $0x1300] ss:$16 sps:$4 sm:$0xff]  }
 0x4f5   : > { %5546 = vmatpush1.bf16.msra.mxu0 %v9701_v6  ;;  %v9788_v6 = vld [vmem:[#allocation8 + $0x1308] ss:$16 sps:$4 sm:$0xff]  }
 0x4f6   : > { %5632 = vmatpush1.bf16.msra.mxu1 %v9704_v7  ;;  %5547 = vmatprep.subr.bf16.mxu0 %v9709_v8  ;;  %v9793_v7 = vld [vmem:[#allocation8 + $0x1324] ss:$16 sps:$4 sm:$0xff]   ;;  %v9796_v8 = vld [vmem:[#allocation8 + $0x132c] ss:$16 sps:$4 sm:$0xff]  }
 0x4f7   : > { %5633 = vmatprep.subr.bf16.mxu1 %v9712_v24  ;;  %v9791_v24 = vld [vmem:[#allocation8 + $0x1320] ss:$16 sps:$4 sm:$0xff]  }
 0x4f9   : > { %5548 = vmatpush1.bf16.msra.mxu0 %v9707_v60  ;;  %v9794_v60 = vld [vmem:[#allocation8 + $0x1328] ss:$16 sps:$4 sm:$0xff]  }
 0x4fa   : > { %5634 = vmatpush1.bf16.msra.mxu1 %v9710_v34  ;;  %5549 = vmatprep.subr.bf16.mxu0 %v9715_v1  ;;  %v9799_v34 = vld [vmem:[#allocation8 + $0x1344] ss:$16 sps:$4 sm:$0xff]   ;;  %v9802_v1 = vld [vmem:[#allocation8 + $0x134c] ss:$16 sps:$4 sm:$0xff]  }
 0x4fb   : > { %5635 = vmatprep.subr.bf16.mxu1 %v9718_v4  ;;  %v9797_v4 = vld [vmem:[#allocation8 + $0x1340] ss:$16 sps:$4 sm:$0xff]  }
 0x4fd   : > { %5550 = vmatpush1.bf16.msra.mxu0 %v9713_v50  ;;  %v9800_v50 = vld [vmem:[#allocation8 + $0x1348] ss:$16 sps:$4 sm:$0xff]  }
 0x4fe   : > { %5636 = vmatpush1.bf16.msra.mxu1 %v9716_v0  ;;  %5551 = vmatprep.subr.bf16.mxu0 %v9721_v5  ;;  %v9805_v0 = vld [vmem:[#allocation8 + $0x1364] ss:$16 sps:$4 sm:$0xff]   ;;  %v9808_v5 = vld [vmem:[#allocation8 + $0x136c] ss:$16 sps:$4 sm:$0xff]  }
 0x4ff   : > { %5637 = vmatprep.subr.bf16.mxu1 %v9724_v48  ;;  %v9803_v48 = vld [vmem:[#allocation8 + $0x1360] ss:$16 sps:$4 sm:$0xff]  }
 0x501   : > { %5552 = vmatpush1.bf16.msra.mxu0 %v9719_v25  ;;  %v9806_v25 = vld [vmem:[#allocation8 + $0x1368] ss:$16 sps:$4 sm:$0xff]  }
 0x502   : > { %5638 = vmatpush1.bf16.msra.mxu1 %v9722_v55  ;;  %5553 = vmatprep.subr.bf16.mxu0 %v9727_v11  ;;  %v9811_v55 = vld [vmem:[#allocation8 + $0x1384] ss:$16 sps:$4 sm:$0xff]   ;;  %v9814_v11 = vld [vmem:[#allocation8 + $0x138c] ss:$16 sps:$4 sm:$0xff]  }
 0x503   : > { %5639 = vmatprep.subr.bf16.mxu1 %v9730_v12  ;;  %v9809_v12 = vld [vmem:[#allocation8 + $0x1380] ss:$16 sps:$4 sm:$0xff]  }
 0x505   : > { %5554 = vmatpush1.bf16.msra.mxu0 %v9725_v9  ;;  %v9812_v9 = vld [vmem:[#allocation8 + $0x1388] ss:$16 sps:$4 sm:$0xff]  }
 0x506   : > { %5640 = vmatpush1.bf16.msra.mxu1 %v9728_v14  ;;  %5555 = vmatprep.subr.bf16.mxu0 %v9733_v16  ;;  %v9817_v14 = vld [vmem:[#allocation8 + $0x13a4] ss:$16 sps:$4 sm:$0xff]   ;;  %v9820_v16 = vld [vmem:[#allocation8 + $0x13ac] ss:$16 sps:$4 sm:$0xff]  }
 0x507   : > { %5641 = vmatprep.subr.bf16.mxu1 %v9736_v17  ;;  %v9815_v17 = vld [vmem:[#allocation8 + $0x13a0] ss:$16 sps:$4 sm:$0xff]  }
 0x509   : > { %5556 = vmatpush1.bf16.msra.mxu0 %v9731_v10  ;;  %v9818_v10 = vld [vmem:[#allocation8 + $0x13a8] ss:$16 sps:$4 sm:$0xff]  }
 0x50a   : > { %5642 = vmatpush1.bf16.msra.mxu1 %v9734_v22  ;;  %5568 = vmatprep.subr.bf16.mxu0 %v9739_v23  ;;  %v9823_v22 = vld [vmem:[#allocation8 + $0x13c4] ss:$16 sps:$4 sm:$0xff]   ;;  %v9826_v23 = vld [vmem:[#allocation8 + $0x13cc] ss:$16 sps:$4 sm:$0xff]  }
 0x50b   : > { %5654 = vmatprep.subr.bf16.mxu1 %v9742_v27  ;;  %v9821_v27 = vld [vmem:[#allocation8 + $0x13c0] ss:$16 sps:$4 sm:$0xff]  }
 0x50c   : > { %8205 = vmatmul.mubr.msk.bf16.vlgmr.msra.gmra.mrb[0].mxu0 %vm10959_vm14, %v10884_v63 }
 0x50d   : > { %8217 = vmatmul.mubr.msk.bf16.vlgmr.msra.gmra.mrb[8].mxu1 %vm10959_vm14, %v10884_v63  ;;  %5569 = vmatpush1.bf16.msra.mxu0 %v9737_v3  ;;  %v9752_v63 = vld [vmem:[#allocation8 + $0x1248] ss:$16 sps:$4 sm:$0xff]  }
 0x50e   : > { %8208 = vmatprep.mubr.msk.bf16.mxu0 %vm10959_vm14, %v10896_v45  ;;  %5655 = vmatpush1.bf16.msra.mxu1 %v9740_v29  ;;  %v9824_v3 = vld [vmem:[#allocation8 + $0x13c8] ss:$16 sps:$4 sm:$0xff]   ;;  %v9829_v29 = vld [vmem:[#allocation8 + $0x13e4] ss:$16 sps:$4 sm:$0xff]  }
 0x50f   : > { %8220 = vmatprep.mubr.msk.bf16.mxu1 %vm10959_vm14, %v10896_v45  ;;  %5570 = vmatprep.subr.bf16.mxu0 %v9745_v31  ;;  %v9761_v45 = vld [vmem:[#allocation8 + $0x1280] ss:$16 sps:$4 sm:$0xff]   ;;  %v9832_v31 = vld [vmem:[#allocation8 + $0x13ec] ss:$16 sps:$4 sm:$0xff]  }
 0x510   : > { %5656 = vmatprep.subr.bf16.mxu1 %v9748_v32  ;;  %v9827_v32 = vld [vmem:[#allocation8 + $0x13e0] ss:$16 sps:$4 sm:$0xff]  }
 0x511   : > { %5571 = vmatpush1.bf16.msra.mxu0 %v9743_v30  ;;  %v9830_v30 = vld [vmem:[#allocation8 + $0x13e8] ss:$16 sps:$4 sm:$0xff]  }
 0x512   : > { %5657 = vmatpush1.bf16.msra.mxu1 %v9746_v26  ;;  %5572 = vmatprep.subr.bf16.mxu0 %v9751_v33  ;;  %v9833_v26 = vld [vmem:[#allocation11 + $0x40] sm:$0xff]  }
 0x513   : > { %5658 = vmatprep.subr.bf16.mxu1 %v9754_v62  ;;  %v9834_v33 = vld [vmem:[#allocation11 + $0xc0] sm:$0xff]  }
 0x514   : > { %v9835_v62 = vld [vmem:[#allocation11] sm:$0xff]  }
 0x515   : > { %5573 = vmatpush1.bf16.msra.mxu0 %v9749_v35  ;;  %v9836_v35 = vld [vmem:[#allocation11 + $0x80] sm:$0xff]  }
 0x516   : > { %5659 = vmatpush1.bf16.msra.mxu1 %v9752_v63  ;;  %5574 = vmatprep.subr.bf16.mxu0 %v9757_v36  ;;  %v9837_v63 = vld [vmem:[#allocation11 + $0x48] sm:$0xff]  }
 0x517   : > { %5660 = vmatprep.subr.bf16.mxu1 %v9760_v44  ;;  %v9838_v36 = vld [vmem:[#allocation11 + $0xc8] sm:$0xff]  }
 0x518   : > { %v9839_v44 = vld [vmem:[#allocation11 + $0x8] sm:$0xff]  }
 0x519   : > { %5575 = vmatpush1.bf16.msra.mxu0 %v9755_v40  ;;  %v9840_v40 = vld [vmem:[#allocation11 + $0x88] sm:$0xff]  }
 0x51a   : > { %5661 = vmatpush1.bf16.msra.mxu1 %v9758_v37  ;;  %5576 = vmatprep.subr.bf16.mxu0 %v9763_v38  ;;  %v9841_v37 = vld [vmem:[#allocation11 + $0x50] sm:$0xff]  }
 0x51b   : > { %5662 = vmatprep.subr.bf16.mxu1 %v9766_v39  ;;  %v9842_v38 = vld [vmem:[#allocation11 + $0xd0] sm:$0xff]   ;;  %v9845_v39 = vld [vmem:[#allocation11 + $0x58] sm:$0xff]  }
 0x51d   : > { %5577 = vmatpush1.bf16.msra.mxu0 %v9761_v45  ;;  %v9846_v45 = vld [vmem:[#allocation11 + $0xd8] sm:$0xff]  }
 0x51e   : > { %5663 = vmatpush1.bf16.msra.mxu1 %v9764_v19  ;;  %5578 = vmatprep.subr.bf16.mxu0 %v9769_v41  ;;  %v9847_v19 = vld [vmem:[#allocation11 + $0x18] sm:$0xff]  }
 0x51f   : > { %5664 = vmatprep.subr.bf16.mxu1 %v9772_v15  ;;  %v9848_v41 = vld [vmem:[#allocation11 + $0x98] sm:$0xff]   ;;  %v9849_v15 = vld [vmem:[#allocation11 + $0x60] sm:$0xff]  }
 0x521   : > { %5579 = vmatpush1.bf16.msra.mxu0 %v9767_v42  ;;  %v9850_v42 = vld [vmem:[#allocation11 + $0xe0] sm:$0xff]  }
 0x522   : > { %5665 = vmatpush1.bf16.msra.mxu1 %v9770_v43  ;;  %5580 = vmatprep.subr.bf16.mxu0 %v9775_v47  ;;  %v9851_v43 = vld [vmem:[#allocation11 + $0x20] sm:$0xff]  }
 0x523   : > { %5666 = vmatprep.subr.bf16.mxu1 %v9778_v46  ;;  %v9852_v47 = vld [vmem:[#allocation11 + $0xa0] sm:$0xff]   ;;  %v9853_v46 = vld [vmem:[#allocation11 + $0x68] sm:$0xff]  }
 0x525   : > { %5581 = vmatpush1.bf16.msra.mxu0 %v9773_v51  ;;  %v9854_v51 = vld [vmem:[#allocation11 + $0xe8] sm:$0xff]  }
 0x526   : > { %5667 = vmatpush1.bf16.msra.mxu1 %v9776_v52  ;;  %5582 = vmatprep.subr.bf16.mxu0 %v9781_v56  ;;  %v9855_v52 = vld [vmem:[#allocation11 + $0x28] sm:$0xff]  }
 0x527   : > { %5668 = vmatprep.subr.bf16.mxu1 %v9784_v57  ;;  %v9856_v56 = vld [vmem:[#allocation11 + $0xa8] sm:$0xff]   ;;  %v9857_v57 = vld [vmem:[#allocation11 + $0x70] sm:$0xff]  }
 0x529   : > { %5583 = vmatpush1.bf16.msra.mxu0 %v9779_v53  ;;  %v9858_v53 = vld [vmem:[#allocation11 + $0xf0] sm:$0xff]  }
 0x52a   : > { %5669 = vmatpush1.bf16.msra.mxu1 %v9782_v18  ;;  %5584 = vmatprep.subr.bf16.mxu0 %v9787_v54  ;;  %v5705_v18 = vld [vmem:[#allocation10] sm:$0xf] }
 0x52b   : > { %5670 = vmatprep.subr.bf16.mxu1 %v9790_v58  ;;  %v5710_v54 = vrot.slane %v5705_v18, %v559_v59  ;;  %v5718_v58 = vrot.slane %v5705_v18, %v567_v20 }
 0x52d   : > { %5585 = vmatpush1.bf16.msra.mxu0 %v9785_v2  ;;  %v5714_v2 = vrot.slane %v5705_v18, %v563_v61 }
 0x52e   : > { %5671 = vmatpush1.bf16.msra.mxu1 %v9788_v6  ;;  %5586 = vmatprep.subr.bf16.mxu0 %v9793_v7  ;;  %v5722_v6 = vrot.slane %v5705_v18, %v571_v21 }
 0x52f   : > { %5672 = vmatprep.subr.bf16.mxu1 %v9796_v8 }
 0x531   : > { %5587 = vmatpush1.bf16.msra.mxu0 %v9791_v24 }
 0x532   : > { %5673 = vmatpush1.bf16.msra.mxu1 %v9794_v60  ;;  %5588 = vmatprep.subr.bf16.mxu0 %v9799_v34 }
 0x533   : > { %5674 = vmatprep.subr.bf16.mxu1 %v9802_v1 }
 0x535   : > { %5589 = vmatpush1.bf16.msra.mxu0 %v9797_v4 }
 0x536   : > { %5675 = vmatpush1.bf16.msra.mxu1 %v9800_v50  ;;  %5590 = vmatprep.subr.bf16.mxu0 %v9805_v0 }
 0x537   : > { %5676 = vmatprep.subr.bf16.mxu1 %v9808_v5 }
 0x539   : > { %5591 = vmatpush1.bf16.msra.mxu0 %v9803_v48 }
 0x53a   : > { %5677 = vmatpush1.bf16.msra.mxu1 %v9806_v25  ;;  %5592 = vmatprep.subr.bf16.mxu0 %v9811_v55 }
 0x53b   : > { %5678 = vmatprep.subr.bf16.mxu1 %v9814_v11 }
 0x53d   : > { %5593 = vmatpush1.bf16.msra.mxu0 %v9809_v12 }
 0x53e   : > { %5679 = vmatpush1.bf16.msra.mxu1 %v9812_v9  ;;  %5594 = vmatprep.subr.bf16.mxu0 %v9817_v14 }
 0x53f   : > { %5680 = vmatprep.subr.bf16.mxu1 %v9820_v16 }
 0x541   : > { %5595 = vmatpush1.bf16.msra.mxu0 %v9815_v17 }
 0x542   : > { %5681 = vmatpush1.bf16.msra.mxu1 %v9818_v10  ;;  %5596 = vmatprep.subr.bf16.mxu0 %v9823_v22 }
 0x543   : > { %5682 = vmatprep.subr.bf16.mxu1 %v9826_v23  ;;  %v9859_v23 = vld [vmem:[#allocation11 + $0x30] sm:$0xff]  }
 0x545   : > { %5597 = vmatpush1.bf16.msra.mxu0 %v9821_v27  ;;  %v9860_v27 = vld [vmem:[#allocation11 + $0xb0] sm:$0xff]  }
 0x546   : > { %5683 = vmatpush1.bf16.msra.mxu1 %v9824_v3  ;;  %5598 = vmatprep.subr.bf16.mxu0 %v9829_v29  ;;  %v9861_v3 = vld [vmem:[#allocation11 + $0x78] sm:$0xff]  }
 0x547   : > { %5684 = vmatprep.subr.bf16.mxu1 %v9832_v31 }
 0x549   : > { %5599 = vmatpush1.bf16.msra.mxu0 %v9827_v32  ;;  %v9862_v32 = vld [vmem:[#allocation11 + $0xf8] sm:$0xff]  }
 0x54a   : > { %5685 = vmatpush1.bf16.msra.mxu1 %v9830_v30  ;;  %8364 = vmatprep.subr.bf16.mxu0 %v9833_v26 }
 0x54b   : > { %8386 = vmatprep.subr.bf16.mxu1 %v9834_v33 }
 0x54c   : > { %8211 = vmatmul.mubr.msk.bf16.vlgmr.msra.gmra.mrb[0].mxu0 %vm10959_vm14, %v10900_v49 }
 0x54d   : > { %8223 = vmatmul.mubr.msk.bf16.vlgmr.msra.gmra.mrb[8].mxu1 %vm10959_vm14, %v10900_v49  ;;  %8365 = vmatpush3.bf16.msra.mxu0 %v9835_v62  ;;  %v9844_v49 = vld [vmem:[#allocation11 + $0x90] sm:$0xff]  }
 0x54e   : > { %8387 = vmatpush3.bf16.msra.mxu1 %v9836_v35  ;;  %8366 = vmatprep.subr.bf16.mxu0 %v9837_v63 }
 0x54f   : > { %8388 = vmatprep.subr.bf16.mxu1 %v9838_v36 }
 0x551   : > { %8367 = vmatpush3.bf16.msra.mxu0 %v9839_v44 }
 0x552   : > { %8389 = vmatpush3.bf16.msra.mxu1 %v9840_v40  ;;  %8368 = vmatprep.subr.bf16.mxu0 %v9841_v37 }
 0x553   : > { %8390 = vmatprep.subr.bf16.mxu1 %v9842_v38  ;;  %v9863_v38 = vld [vmem:[#allocation11 + $0x38] sm:$0xff]  }
 0x555   : > { %8369 = vmatpush3.bf16.msra.mxu0 %v9843_v13  ;;  %v9864_v13 = vld [vmem:[#allocation11 + $0xb8] sm:$0xff]  }
 0x556   : > { %8391 = vmatpush3.bf16.msra.mxu1 %v9844_v49  ;;  %8370 = vmatprep.subr.bf16.mxu0 %v9845_v39 }
 0x557   : > { %8392 = vmatprep.subr.bf16.mxu1 %v9846_v45 }
 0x559   : > { %8371 = vmatpush3.bf16.msra.mxu0 %v9847_v19 }
 0x55a   : > { %8393 = vmatpush3.bf16.msra.mxu1 %v9848_v41  ;;  %8372 = vmatprep.subr.bf16.mxu0 %v9849_v15  ;;  %v9865_v41 = vld [vmem:[#allocation11 + $0x140] sm:$0xff]  }
 0x55b   : > { %8394 = vmatprep.subr.bf16.mxu1 %v9850_v42  ;;  %v9866_v15 = vld [vmem:[#allocation11 + $0x1c0] sm:$0xff]  }
 0x55d   : > { %8373 = vmatpush3.bf16.msra.mxu0 %v9851_v43 }
 0x55e   : > { %8395 = vmatpush3.bf16.msra.mxu1 %v9852_v47  ;;  %8374 = vmatprep.subr.bf16.mxu0 %v9853_v46 }
 0x55f   : > { %8396 = vmatprep.subr.bf16.mxu1 %v9854_v51 }
 0x561   : > { %8375 = vmatpush3.bf16.msra.mxu0 %v9855_v52 }
 0x562   : > { %8397 = vmatpush3.bf16.msra.mxu1 %v9856_v56  ;;  %8376 = vmatprep.subr.bf16.mxu0 %v9857_v57 }
 0x563   : > { %8398 = vmatprep.subr.bf16.mxu1 %v9858_v53 }
 0x565   : > { %8377 = vmatpush3.bf16.msra.mxu0 %v9859_v23  ;;  %v9876_v23 = vld [vmem:[#allocation11 + $0x190] sm:$0xff]  }
 0x566   : > { %8399 = vmatpush3.bf16.msra.mxu1 %v9860_v27  ;;  %8378 = vmatprep.subr.bf16.mxu0 %v9861_v3  ;;  %v9878_v27 = vld [vmem:[#allocation11 + $0x1d8] sm:$0xff]   ;;  %v9875_v3 = vld [vmem:[#allocation11 + $0x110] sm:$0xff]  }
 0x567   : > { %8400 = vmatprep.subr.bf16.mxu1 %v9862_v32  ;;  %v9882_v32 = vld [vmem:[#allocation11 + $0x1e0] sm:$0xff]  }
 0x569   : > { %8379 = vmatpush3.bf16.msra.mxu0 %v9863_v38  ;;  %v9887_v38 = vld [vmem:[#allocation11 + $0x128] sm:$0xff]  }
 0x56a   : > { %8401 = vmatpush3.bf16.msra.mxu1 %v9864_v13  ;;  %8408 = vmatprep.subr.bf16.mxu0 %v9865_v41 }
 0x56b   : > { %8430 = vmatprep.subr.bf16.mxu1 %v9866_v15  ;;  %v9894_v15 = vld [vmem:[#allocation11 + $0x1f8] sm:$0xff]  }
 0x61f   : > { %v5602_v7 = vpop.f32.mrb[0].mxu0 }
 0x620   : > { %v5727_v8 = vadd.f32 %v5710_v54, %v5602_v7  ;;  %v5688_v24 = vpop.f32.mrb[8].mxu1  ;;  %v5604_v60 = vpop.f32.mrb[1].mxu0 }
 0x621   : > { %v5729_v34 = vadd.f32 %v5718_v58, %v5688_v24  ;;  %v5728_v1 = vadd.f32 %v5714_v2, %v5604_v60  ;;  %v5690_v4 = vpop.f32.mrb[9].mxu1  ;;  %v5606_v50 = vpop.f32.mrb[2].mxu0 }
 0x622   : > { %v5735_v0 = vmax.f32 %v5727_v8, 0.0  ;;  %v5730_v5 = vadd.f32 %v5722_v6, %v5690_v4  ;;  %v5731_v59 = vadd.f32 %v5710_v54, %v5606_v50  ;;  %v5692_v48 = vpop.f32.mrb[10].mxu1  ;;  %v5608_v25 = vpop.f32.mrb[3].mxu0 }
 0x623   : > { %v5733_v20 = vadd.f32 %v5718_v58, %v5692_v48  ;;  %v5732_v55 = vadd.f32 %v5714_v2, %v5608_v25  ;;  %v5694_v11 = vpop.f32.mrb[11].mxu1  ;;  %v5737_v21 = vmax.f32 %v5729_v34, 0.0  ;;  %v5736_v9 = vmax.f32 %v5728_v1, 0.0  ;;  %v9868_v48 = vld [vmem:[#allocation11 + $0x180] sm:$0xff]  }
 0x624   : > { %v5738_v61 = vmax.f32 %v5730_v5, 0.0  ;;  %v5739_v12 = vmax.f32 %v5731_v59, 0.0  ;;  %v5734_v28 = vadd.f32 %v5722_v6, %v5694_v11  ;;  %v5751_v17 = vrot.slane %v5735_v0, 2 }
 0x625   : > { %v5741_v14 = vmax.f32 %v5733_v20, 0.0  ;;  %v5740_v16 = vmax.f32 %v5732_v55, 0.0  ;;  %v5757_v62 = vrot.slane %v5737_v21, 2  ;;  %v5754_v35 = vrot.slane %v5736_v9, 2 }
 0x626   : > { %v5752_v10 = vrot.slane %v5739_v12, 2  ;;  %v5742_v22 = vmax.f32 %v5734_v28, 0.0  ;;  %v5760_v30 = vrot.slane %v5738_v61, 2 }
 0x627   : > { %v5758_v29 = vrot.slane %v5741_v14, 2  ;;  %v5755_v31 = vrot.slane %v5740_v16, 2 }
 0x628   : > { %v5761_v26 = vrot.slane %v5742_v22, 2  ;;  %v5753_v33 = vsel %vm486_vm3, %v5751_v17, %v5752_v10  ;;  %v5771_v36 = vsel %vm486_vm3, %v5752_v10, 0.0  ;;  %v9874_v17 = vld [vmem:[#allocation11 + $0x1d0] sm:$0xff]   ;;  %v9871_v10 = vld [vmem:[#allocation11 + $0x108] sm:$0xff]  }
 0x629   : > { %v5775_v63 = vmax.f32 %v5735_v0, %v5753_v33  ;;  %v5773_v44 = vsel %vm486_vm3, %v5758_v29, 0.0  ;;  %v5772_v49 = vsel %vm486_vm3, %v5755_v31, 0.0  ;;  %v5756_v45 = vsel %vm486_vm3, %v5754_v35, %v5755_v31  ;;  %v9880_v31 = vld [vmem:[#allocation11 + $0x198] sm:$0xff]   ;;  %v9884_v33 = vld [vmem:[#allocation11 + $0x1a0] sm:$0xff]  }
 0x62a   : > { %v5774_v40 = vsel %vm486_vm3, %v5761_v26, 0.0  ;;  %v5762_v37 = vsel %vm486_vm3, %v5760_v30, %v5761_v26  ;;  %v5759_v19 = vsel %vm486_vm3, %v5757_v62, %v5758_v29  ;;  %v5776_v42 = vmax.f32 %v5736_v9, %v5756_v45  ;;  %v9869_v9 = vld [vmem:[#allocation11 + $0x148] sm:$0xff]   ;;  %v9877_v29 = vld [vmem:[#allocation11 + $0x158] sm:$0xff]   ;;  %v9881_v26 = vld [vmem:[#allocation11 + $0x160] sm:$0xff]  }
 0x62b   : > { %v5778_v39 = vmax.f32 %v5738_v61, %v5762_v37  ;;  %v5777_v43 = vmax.f32 %v5737_v21, %v5759_v19  ;;  %v11005_v47 = vmax.f32 %v5739_v12, %v5771_v36  ;;  %v11007_v46 = vmax.f32 %v5742_v22, %v5774_v40  ;;  %v9867_v61 = vld [vmem:[#allocation11 + $0x100] sm:$0xff]   ;;  %v9870_v12 = vld [vmem:[#allocation11 + $0x1c8] sm:$0xff]   ;;  %v9873_v22 = vld [vmem:[#allocation11 + $0x150] sm:$0xff]  }
 0x62c   : > { %v11009_v52 = vmax.f32 %v5741_v14, %v5773_v44  ;;  %v11011_v56 = vmax.f32 %v5740_v16, %v5772_v49  ;;  %v9872_v14 = vld [vmem:[#allocation11 + $0x188] sm:$0xff]   ;;  %v9879_v30 = vld [vmem:[#allocation11 + $0x118] sm:$0xff]   ;;  %v9883_v35 = vld [vmem:[#allocation11 + $0x120] sm:$0xff]  }
 0x62d   : > { %v8828_v51 = vpack.i.bf16 %v5778_v39, %v5775_v63  ;;  %v8823_v57 = vpack.i.bf16 %v5777_v43, %v5776_v42  ;;  %v8838_v53 = vpack.i.bf16 %v11007_v46, %v11005_v47  ;;  %v9886_v62 = vld [vmem:[#allocation11 + $0x1e8] sm:$0xff]   ;;  %v9890_v40 = vld [vmem:[#allocation11 + $0x1f0] sm:$0xff]  }
 0x62e   : > { %v8833_v18 = vpack.i.bf16 %v11009_v52, %v11011_v56  ;;  %v9888_v44 = vld [vmem:[#allocation11 + $0x1a8] sm:$0xff]   ;;  %v9892_v45 = vld [vmem:[#allocation11 + $0x1b0] sm:$0xff]  }
 0x62f   : > { %8829 = vrot.lane.b32.xlu1 %v8828_v51, %s10326_s3  ;;  %8824 = vrot.lane.b32.xlu0 %v8823_v57, %s10326_s3  ;;  %v9893_v51 = vld [vmem:[#allocation11 + $0x178] sm:$0xff]  }
 0x630   : > { %v9896_v57 = vld [vmem:[#allocation11 + $0x1b8] sm:$0xff]  }
 0x633   : > { %8839 = vrot.lane.b32.xlu1 %v8838_v53, %s10326_s3  ;;  %8834 = vrot.lane.b32.xlu0 %v8833_v18, %s10326_s3 }
 0x6a1   : > { %v8830_v54 = vpop.permute.xlu1 %8829  ;;  %v8825_v6 = vpop.permute.xlu0 %8824 }
 0x6a2   : > { %v8832_v58 = vunpack.i.h.bf16 %v8830_v54  ;;  %v8831_v2 = vunpack.i.l.bf16 %v8830_v54  ;;  %v8827_v7 = vunpack.i.h.bf16 %v8825_v6  ;;  %v8826_v8 = vunpack.i.l.bf16 %v8825_v6  ;;  %v9898_v54 = vld [vmem:[#allocation11 + $0x2c0] sm:$0xff]  }
 0x6a4   : > { %v5823_v24 = vsel %vm531_vm8, %v8832_v58, %v8831_v2  ;;  %v5809_v60 = vsel %vm531_vm8, %v8827_v7, %v8832_v58  ;;  %v5807_v34 = vsel %vm531_vm8, %v8831_v2, %v8826_v8  ;;  %v5808_v1 = vsel %vm531_vm8, %v8826_v8, %v8827_v7  ;;  %v9895_v58 = vld [vmem:[#allocation11 + $0x138] sm:$0xff]   ;;  %v9897_v7 = vld [vmem:[#allocation11 + $0x240] sm:$0xff]  }
 0x6a5   : > { %v5828_v4 = vmax.f32 %v5778_v39, %v5823_v24  ;;  %v11025_v50 = vmax.f32 %v5777_v43, %v5809_v60  ;;  %v11027_v0 = vmax.f32 %v5775_v63, %v5807_v34  ;;  %v5826_v5 = vmax.f32 %v5776_v42, %v5808_v1  ;;  %v9885_v63 = vld [vmem:[#allocation11 + $0x168] sm:$0xff]   ;;  %v11033_v36 = vpop.permute.xlu1 %8839  ;;  %v11035_v37 = vpop.permute.xlu0 %8834  ;;  %v9889_v39 = vld [vmem:[#allocation11 + $0x170] sm:$0xff]   ;;  %v9900_v24 = vld [vmem:[#allocation11 + $0x280] sm:$0xff]  }
 0x6a6   : > { %v8842_v13 = vunpack.i.h.bf16 %v11033_v36  ;;  %v8841_v49 = vunpack.i.l.bf16 %v11033_v36  ;;  %v8837_v19 = vunpack.i.h.bf16 %v11035_v37  ;;  %v8836_v41 = vunpack.i.l.bf16 %v11035_v37  ;;  %v9891_v42 = vld [vmem:[#allocation11 + $0x130] sm:$0xff]   ;;  %v9902_v34 = vld [vmem:[#allocation11 + $0x2c8] sm:$0xff]   ;;  %v9899_v1 = vld [vmem:[#allocation11 + $0x200] sm:$0xff]  }
 0x6a7   : > { %v5860_v59 = vpack.c.bf16 %v5828_v4, %v5828_v4  ;;  %v5857_v25 = vpack.c.bf16 %v11027_v0, %v11027_v0  ;;  %v5859_v20 = vpack.c.bf16 %v11025_v50, %v11025_v50  ;;  %v5840_v55 = vrot.slane %v5828_v4, 4  ;;  %v9929_v37 = vld [vmem:[#allocation11 + $0x340] sm:$0xff]  }
 0x6a8   : > { %v5858_v11 = vpack.c.bf16 %v5826_v5, %v5826_v5  ;;  %v5838_v28 = vrot.slane %v5826_v5, 4  ;;  %v5824_v43 = vsel %vm531_vm8, %v8842_v13, %v8841_v49  ;;  %v5811_v53 = vsel %vm531_vm8, %v8836_v41, %v8837_v19  ;;  %v9906_v5 = vld [vmem:[#allocation11 + $0x2d0] sm:$0xff]  }
 0x6a9   : > { %6970 = vmatprep.mubr.bf16.mxu1 %v5860_v59  ;;  %v5864_v21 = vpack.c.bf16 %v5840_v55, %v5840_v55  ;;  %v5839_v18 = vrot.slane %v11025_v50, 4  ;;  %v11053_v2 = vmax.f32 %v11007_v46, %v5824_v43  ;;  %v5837_v6 = vrot.slane %v11027_v0, 4  ;;  %v9901_v46 = vld [vmem:[#allocation11 + $0x248] sm:$0xff]   ;;  %v9907_v55 = vld [vmem:[#allocation11 + $0x210] sm:$0xff]  }
 0x6aa   : > { %6971 = vmatmul.mubr.bf16.vlgmr.msra.gmra.mrb[12].mxu1 %v5859_v20  ;;  %6930 = vmatprep.mubr.bf16.mxu0 %v5858_v11  ;;  %v5862_v16 = vpack.c.bf16 %v5838_v28, %v5838_v28  ;;  %v11057_v8 = vmax.f32 %v11011_v56, %v5811_v53  ;;  %v9904_v56 = vld [vmem:[#allocation11 + $0x288] sm:$0xff]   ;;  %v9910_v20 = vld [vmem:[#allocation11 + $0x2d8] sm:$0xff]   ;;  %v9937_v43 = vld [vmem:[#allocation11 + $0x350] sm:$0xff]  }
 0x6ab   : > { %8431 = vmatpush3.bf16.msra.mxu1 %v9868_v48  ;;  %6931 = vmatmul.mubr.bf16.vlgmr.msra.gmra.mrb[4].mxu0 %v5857_v25  ;;  %v5863_v60 = vpack.c.bf16 %v5839_v18, %v5839_v18  ;;  %v5868_v4 = vpack.c.bf16 %v11053_v2, %v11053_v2  ;;  %v5861_v50 = vpack.c.bf16 %v5837_v6, %v5837_v6  ;;  %v9903_v59 = vld [vmem:[#allocation11 + $0x208] sm:$0xff]   ;;  %v9905_v48 = vld [vmem:[#allocation11 + $0x250] sm:$0xff]   ;;  %v9909_v11 = vld [vmem:[#allocation11 + $0x258] sm:$0xff]  }
 0x6ac   : > { %7050 = vmatprep.mubr.bf16.mxu1 %v5864_v21  ;;  %8409 = vmatpush3.bf16.msra.mxu0 %v9867_v61  ;;  %v5866_v0 = vpack.c.bf16 %v11057_v8, %v11057_v8  ;;  %v9908_v25 = vld [vmem:[#allocation11 + $0x290] sm:$0xff]   ;;  %v9912_v61 = vld [vmem:[#allocation11 + $0x298] sm:$0xff]   ;;  %v9913_v21 = vld [vmem:[#allocation11 + $0x260] sm:$0xff]   ;;  %v5850_v36 = vrot.slane %v11057_v8, 4 }
 0x6ad   : > { %8432 = vmatprep.subr.bf16.mxu1 %v9870_v12  ;;  %7010 = vmatprep.mubr.bf16.mxu0 %v5862_v16  ;;  %v9914_v12 = vld [vmem:[#allocation11 + $0x2e0] sm:$0xff]   ;;  %v9911_v28 = vld [vmem:[#allocation11 + $0x218] sm:$0xff]   ;;  %v9939_v53 = vld [vmem:[#allocation11 + $0x310] sm:$0xff]  }
 0x6ae   : > { %8410 = vmatprep.subr.bf16.mxu0 %v9869_v9  ;;  %v9916_v9 = vld [vmem:[#allocation11 + $0x2a0] sm:$0xff]   ;;  %v9941_v18 = vld [vmem:[#allocation11 + $0x358] sm:$0xff]   ;;  %v9950_v8 = vld [vmem:[#allocation11 + $0x3e8] sm:$0xff]  }
 0x6af   : > { %8433 = vmatpush3.bf16.msra.mxu1 %v9872_v14  ;;  %v9918_v14 = vld [vmem:[#allocation11 + $0x2e8] sm:$0xff]   ;;  %v9915_v16 = vld [vmem:[#allocation11 + $0x220] sm:$0xff]  }
 0x6b0   : > { %8434 = vmatprep.subr.bf16.mxu1 %v9874_v17  ;;  %8411 = vmatpush3.bf16.msra.mxu0 %v9871_v10  ;;  %v9917_v17 = vld [vmem:[#allocation11 + $0x268] sm:$0xff]   ;;  %v9945_v6 = vld [vmem:[#allocation11 + $0x360] sm:$0xff]  }
 0x6b1   : > { %8412 = vmatprep.subr.bf16.mxu0 %v9873_v22  ;;  %v9920_v10 = vld [vmem:[#allocation11 + $0x2a8] sm:$0xff]   ;;  %v9922_v22 = vld [vmem:[#allocation11 + $0x2f0] sm:$0xff]  }
 0x6b3   : > { %8435 = vmatpush3.bf16.msra.mxu1 %v9876_v23  ;;  %v9919_v23 = vld [vmem:[#allocation11 + $0x228] sm:$0xff]  }
 0x6b4   : > { %8436 = vmatprep.subr.bf16.mxu1 %v9878_v27  ;;  %8413 = vmatpush3.bf16.msra.mxu0 %v9875_v3  ;;  %v9921_v27 = vld [vmem:[#allocation11 + $0x270] sm:$0xff]  }
 0x6b5   : > { %8414 = vmatprep.subr.bf16.mxu0 %v9877_v29  ;;  %v9924_v3 = vld [vmem:[#allocation11 + $0x2b0] sm:$0xff]   ;;  %v9926_v29 = vld [vmem:[#allocation11 + $0x2f8] sm:$0xff]  }
 0x6b7   : > { %8437 = vmatpush3.bf16.msra.mxu1 %v9880_v31  ;;  %v5812_v31 = vsel %vm531_vm8, %v8837_v19, %v8842_v13  ;;  %v5870_v19 = vpack.c.bf16 %v5850_v36, %v5850_v36 }
 0x6b8   : > { %8438 = vmatprep.subr.bf16.mxu1 %v9882_v32  ;;  %8415 = vmatpush3.bf16.msra.mxu0 %v9879_v30  ;;  %v9923_v32 = vld [vmem:[#allocation11 + $0x230] sm:$0xff]   ;;  %v9925_v30 = vld [vmem:[#allocation11 + $0x278] sm:$0xff]  }
 0x6b9   : > { %8416 = vmatprep.subr.bf16.mxu0 %v9881_v26  ;;  %v5810_v26 = vsel %vm531_vm8, %v8841_v49, %v8836_v41  ;;  %v9931_v49 = vld [vmem:[#allocation11 + $0x300] sm:$0xff]   ;;  %v9936_v41 = vld [vmem:[#allocation11 + $0x388] sm:$0xff]  }
 0x6bb   : > { %8439 = vmatpush3.bf16.msra.mxu1 %v9884_v33  ;;  %v9928_v33 = vld [vmem:[#allocation11 + $0x2b8] sm:$0xff]  }
 0x6bc   : > { %8440 = vmatprep.subr.bf16.mxu1 %v9886_v62  ;;  %8417 = vmatpush3.bf16.msra.mxu0 %v9883_v35  ;;  %v11074_v62 = vmax.f32 %v11009_v52, %v5812_v31  ;;  %v9930_v35 = vld [vmem:[#allocation11 + $0x3c0] sm:$0xff]   ;;  %v9934_v52 = vld [vmem:[#allocation11 + $0x3c8] sm:$0xff]  }
 0x6bd   : > { %8418 = vmatprep.subr.bf16.mxu0 %v9885_v63  ;;  %v9927_v63 = vld [vmem:[#allocation11 + $0x238] sm:$0xff]   ;;  %v6129_v31 = vld [vmem:[#allocation13] sm:$0x1] }
 0x6be   : > { %v5867_v13 = vpack.c.bf16 %v11074_v62, %v11074_v62 }
 0x6bf   : > { %8441 = vmatpush3.bf16.msra.mxu1 %v9888_v44  ;;  %v5852_v44 = vrot.slane %v11053_v2, 4  ;;  %v9943_v2 = vld [vmem:[#allocation11 + $0x318] sm:$0xff]  }
 0x6c0   : > { %8442 = vmatprep.subr.bf16.mxu1 %v9890_v40  ;;  %8419 = vmatpush3.bf16.msra.mxu0 %v9887_v38  ;;  %v11078_v40 = vmax.f32 %v11005_v47, %v5810_v26  ;;  %v9932_v38 = vld [vmem:[#allocation11 + $0x380] sm:$0xff]   ;;  %v9933_v47 = vld [vmem:[#allocation11 + $0x348] sm:$0xff]  }
 0x6c1   : > { %8420 = vmatprep.subr.bf16.mxu0 %v9889_v39  ;;  %v5872_v39 = vpack.c.bf16 %v5852_v44, %v5852_v44 }
 0x6c3   : > { %8443 = vmatpush3.bf16.msra.mxu1 %v9892_v45  ;;  %v5865_v45 = vpack.c.bf16 %v11078_v40, %v11078_v40 }
 0x6c4   : > { %8444 = vmatprep.subr.bf16.mxu1 %v9894_v15  ;;  %8421 = vmatpush3.bf16.msra.mxu0 %v9891_v42  ;;  %v9938_v15 = vld [vmem:[#allocation11 + $0x3d0] sm:$0xff]   ;;  %v9935_v42 = vld [vmem:[#allocation11 + $0x308] sm:$0xff]  }
 0x6c5   : > { %8422 = vmatprep.subr.bf16.mxu0 %v9893_v51  ;;  %v9940_v51 = vld [vmem:[#allocation11 + $0x390] sm:$0xff]  }
 0x6c7   : > { %8445 = vmatpush3.bf16.msra.mxu1 %v9896_v57  ;;  %v9942_v57 = vld [vmem:[#allocation11 + $0x3d8] sm:$0xff]  }
 0x6c8   : > { %8474 = vmatprep.subr.bf16.mxu1 %v9898_v54  ;;  %8423 = vmatpush3.bf16.msra.mxu0 %v9895_v58  ;;  %v9944_v54 = vld [vmem:[#allocation11 + $0x398] sm:$0xff]   ;;  %v9946_v58 = vld [vmem:[#allocation11 + $0x3e0] sm:$0xff]  }
 0x6c9   : > { %8452 = vmatprep.subr.bf16.mxu0 %v9897_v7  ;;  %v9948_v7 = vld [vmem:[#allocation11 + $0x3a0] sm:$0xff]  }
 0x6ca   : > { %7051 = vmatmul.mubr.bf16.vlgmr.msra.gmra.mrb[16].mxu1 %v5863_v60  ;;  %v9949_v60 = vld [vmem:[#allocation11 + $0x368] sm:$0xff]  }
 0x6cb   : > { %8475 = vmatpush3.bf16.msra.mxu1 %v9900_v24  ;;  %7130 = vmatprep.mubr.bf16.mxu1 %v5868_v4  ;;  %v9947_v24 = vld [vmem:[#allocation11 + $0x320] sm:$0xff]   ;;  %v9951_v4 = vld [vmem:[#allocation11 + $0x328] sm:$0xff]  }
 0x6cc   : > { %7011 = vmatmul.mubr.bf16.vlgmr.msra.gmra.mrb[8].mxu0 %v5861_v50  ;;  %8476 = vmatprep.subr.bf16.mxu1 %v9902_v34  ;;  %v9952_v34 = vld [vmem:[#allocation11 + $0x3a8] sm:$0xff]   ;;  %v9953_v50 = vld [vmem:[#allocation11 + $0x370] sm:$0xff]  }
 0x6cd   : > { %8453 = vmatpush3.bf16.msra.mxu0 %v9899_v1  ;;  %7090 = vmatprep.mubr.bf16.mxu0 %v5866_v0  ;;  %v9954_v1 = vld [vmem:[#allocation11 + $0x3f0] sm:$0xff]   ;;  %v9958_v0 = vld [vmem:[#allocation11 + $0x3f8] sm:$0xff]  }
 0x6ce   : > { %8454 = vmatprep.subr.bf16.mxu0 %v9901_v46  ;;  %v9956_v46 = vld [vmem:[#allocation11 + $0x3b0] sm:$0xff]  }
 0x6cf   : > { %8477 = vmatpush3.bf16.msra.mxu1 %v9904_v56  ;;  %v9955_v56 = vld [vmem:[#allocation11 + $0x330] sm:$0xff]  }
 0x6d0   : > { %8478 = vmatprep.subr.bf16.mxu1 %v9906_v5  ;;  %v9957_v5 = vld [vmem:[#allocation11 + $0x378] sm:$0xff]  }
 0x6d1   : > { %8455 = vmatpush3.bf16.msra.mxu0 %v9903_v59  ;;  %v9960_v59 = vld [vmem:[#allocation11 + $0x3b8] sm:$0xff]  }
 0x6d2   : > { %8456 = vmatprep.subr.bf16.mxu0 %v9905_v48  ;;  %v5851_v48 = vrot.slane %v11074_v62, 4 }
 0x6d3   : > { %8479 = vmatpush3.bf16.msra.mxu1 %v9908_v25  ;;  %v9959_v25 = vld [vmem:[#allocation11 + $0x338] sm:$0xff]  }
 0x6d4   : > { %8480 = vmatprep.subr.bf16.mxu1 %v9910_v20  ;;  %v5849_v20 = vrot.slane %v11078_v40, 4 }
 0x6d5   : > { %8457 = vmatpush3.bf16.msra.mxu0 %v9907_v55  ;;  %v5871_v55 = vpack.c.bf16 %v5851_v48, %v5851_v48 }
 0x6d6   : > { %8458 = vmatprep.subr.bf16.mxu0 %v9909_v11  ;;  %v5869_v11 = vpack.c.bf16 %v5849_v20, %v5849_v20 }
 0x6d7   : > { %8481 = vmatpush3.bf16.msra.mxu1 %v9912_v61  ;;  %v9961_v61 = vld [vmem:[#allocation14] sm:$0xff]  }
 0x6d8   : > { %8482 = vmatprep.subr.bf16.mxu1 %v9914_v12  ;;  %v10329_v12 = vmov 0.0  }
 0x6d9   : > { %8459 = vmatpush3.bf16.msra.mxu0 %v9911_v28  ;;  %v9962_v28 = vld [vmem:[#allocation14 + $0x8] sm:$0xff]  }
 0x6da   : > { %8460 = vmatprep.subr.bf16.mxu0 %v9913_v21  ;;  %v9963_v21 = vld [vmem:[#allocation14 + $0x10] sm:$0xff]  }
 0x6db   : > { %8483 = vmatpush3.bf16.msra.mxu1 %v9916_v9  ;;  %v9964_v9 = vld [vmem:[#allocation14 + $0x18] sm:$0xff]  }
 0x6dc   : > { %8484 = vmatprep.subr.bf16.mxu1 %v9918_v14  ;;  %v9965_v14 = vld [vmem:[#allocation14 + $0x20] sm:$0xff]  }
 0x6dd   : > { %8461 = vmatpush3.bf16.msra.mxu0 %v9915_v16  ;;  %v9966_v16 = vld [vmem:[#allocation14 + $0x28] sm:$0xff]  }
 0x6de   : > { %8462 = vmatprep.subr.bf16.mxu0 %v9917_v17  ;;  %v9967_v17 = vld [vmem:[#allocation14 + $0x30] sm:$0xff]  }
 0x6df   : > { %8485 = vmatpush3.bf16.msra.mxu1 %v9920_v10  ;;  %v9968_v10 = vld [vmem:[#allocation14 + $0x38] sm:$0xff]  }
 0x6e0   : > { %8486 = vmatprep.subr.bf16.mxu1 %v9922_v22 }
 0x6e1   : > { %8463 = vmatpush3.bf16.msra.mxu0 %v9919_v23 }
 0x6e2   : > { %8464 = vmatprep.subr.bf16.mxu0 %v9921_v27 }
 0x6e3   : > { %8487 = vmatpush3.bf16.msra.mxu1 %v9924_v3 }
 0x6e4   : > { %8488 = vmatprep.subr.bf16.mxu1 %v9926_v29 }
 0x6e5   : > { %8465 = vmatpush3.bf16.msra.mxu0 %v9923_v32 }
 0x6e6   : > { %8466 = vmatprep.subr.bf16.mxu0 %v9925_v30 }
 0x6e7   : > { %8489 = vmatpush3.bf16.msra.mxu1 %v9928_v33 }
 0x6e8   : > { %8518 = vmatprep.subr.bf16.mxu1 %v9930_v35 }
 0x6e9   : > { %8467 = vmatpush3.bf16.msra.mxu0 %v9927_v63 }
 0x6ea   : > { %7131 = vmatmul.mubr.bf16.vlgmr.msra.gmra.mrb[20].mxu1 %v5867_v13  ;;  %8496 = vmatprep.subr.bf16.mxu0 %v9929_v37 }
 0x6eb   : > { %8519 = vmatpush3.bf16.msra.mxu1 %v9932_v38  ;;  %7210 = vmatprep.mubr.bf16.mxu1 %v5872_v39 }
 0x6ec   : > { %7091 = vmatmul.mubr.bf16.vlgmr.msra.gmra.mrb[12].mxu0 %v5865_v45  ;;  %8520 = vmatprep.subr.bf16.mxu1 %v9934_v52 }
 0x6ed   : > { %8497 = vmatpush3.bf16.msra.mxu0 %v9931_v49  ;;  %7170 = vmatprep.mubr.bf16.mxu0 %v5870_v19 }
 0x6ee   : > { %8498 = vmatprep.subr.bf16.mxu0 %v9933_v47 }
 0x6ef   : > { %8521 = vmatpush3.bf16.msra.mxu1 %v9936_v41 }
 0x6f0   : > { %8522 = vmatprep.subr.bf16.mxu1 %v9938_v15 }
 0x6f1   : > { %8499 = vmatpush3.bf16.msra.mxu0 %v9935_v42 }
 0x6f2   : > { %8500 = vmatprep.subr.bf16.mxu0 %v9937_v43 }
 0x6f3   : > { %8523 = vmatpush3.bf16.msra.mxu1 %v9940_v51 }
 0x6f4   : > { %8524 = vmatprep.subr.bf16.mxu1 %v9942_v57 }
 0x6f5   : > { %8501 = vmatpush3.bf16.msra.mxu0 %v9939_v53 }
 0x6f6   : > { %8502 = vmatprep.subr.bf16.mxu0 %v9941_v18 }
 0x6f7   : > { %8525 = vmatpush3.bf16.msra.mxu1 %v9944_v54 }
 0x6f8   : > { %8526 = vmatprep.subr.bf16.mxu1 %v9946_v58 }
 0x6f9   : > { %8503 = vmatpush3.bf16.msra.mxu0 %v9943_v2 }
 0x6fa   : > { %8504 = vmatprep.subr.bf16.mxu0 %v9945_v6 }
 0x6fb   : > { %8527 = vmatpush3.bf16.msra.mxu1 %v9948_v7 }
 0x6fc   : > { %8528 = vmatprep.subr.bf16.mxu1 %v9950_v8 }
 0x6fd   : > { %8505 = vmatpush3.bf16.msra.mxu0 %v9947_v24 }
 0x6fe   : > { %8506 = vmatprep.subr.bf16.mxu0 %v9949_v60 }
 0x6ff   : > { %8529 = vmatpush3.bf16.msra.mxu1 %v9952_v34 }
 0x700   : > { %8530 = vmatprep.subr.bf16.mxu1 %v9954_v1 }
 0x701   : > { %8507 = vmatpush3.bf16.msra.mxu0 %v9951_v4 }
 0x702   : > { %8508 = vmatprep.subr.bf16.mxu0 %v9953_v50 }
 0x703   : > { %8531 = vmatpush3.bf16.msra.mxu1 %v9956_v46 }
 0x704   : > { %8532 = vmatprep.subr.bf16.mxu1 %v9958_v0 }
 0x705   : > { %8509 = vmatpush3.bf16.msra.mxu0 %v9955_v56 }
 0x706   : > { %8510 = vmatprep.subr.bf16.mxu0 %v9957_v5 }
 0x707   : > { %8533 = vmatpush3.bf16.msra.mxu1 %v9960_v59 }
 0x709   : > { %8511 = vmatpush3.bf16.msra.mxu0 %v9959_v25  ;;  %v7236_v25 = vld [vmem:[#allocation16] sm:$0x1] }
 0x70a   : > { %7211 = vmatmul.mubr.bf16.vlgmr.msra.gmra.mrb[24].mxu1 %v5871_v55  ;;  %8549 = vmatprep.subr.bf16.mxu0 %v10329_v12 }
 0x70c   : > { %7171 = vmatmul.mubr.bf16.vlgmr.msra.gmra.mrb[16].mxu0 %v5869_v11 }
 0x70d   : > { %8550 = vmatpush3.bf16.msra.mxu0 %v9961_v61  ;;  %8565 = vmatprep.mubr.msk.bf16.mxu0 %vm10330_vm15, %v10329_v12 }
 0x70e   : > { %8551 = vmatprep.subr.bf16.mxu0 %v10329_v12 }
 0x711   : > { %8552 = vmatpush3.bf16.msra.mxu0 %v9962_v28 }
 0x712   : > { %8553 = vmatprep.subr.bf16.mxu0 %v10329_v12 }
 0x715   : > { %8554 = vmatpush3.bf16.msra.mxu0 %v9963_v21 }
 0x716   : > { %8555 = vmatprep.subr.bf16.mxu0 %v10329_v12 }
 0x719   : > { %8556 = vmatpush3.bf16.msra.mxu0 %v9964_v9 }
 0x71a   : > { %8557 = vmatprep.subr.bf16.mxu0 %v10329_v12 }
 0x71d   : > { %8558 = vmatpush3.bf16.msra.mxu0 %v9965_v14 }
 0x71e   : > { %8559 = vmatprep.subr.bf16.mxu0 %v10329_v12 }
 0x721   : > { %8560 = vmatpush3.bf16.msra.mxu0 %v9966_v16 }
 0x722   : > { %8561 = vmatprep.subr.bf16.mxu0 %v10329_v12 }
 0x725   : > { %8562 = vmatpush3.bf16.msra.mxu0 %v9967_v17 }
 0x726   : > { %8563 = vmatprep.subr.bf16.mxu0 %v10329_v12 }
 0x729   : > { %8564 = vmatpush3.bf16.msra.mxu0 %v9968_v10 }
 0x77d   : > { %v8402_v22 = vpop.f32.mrb[12].mxu1 }
 0x77e   : > { %v8403_v23 = vpop.f32.mrb[13].mxu1  ;;  %v8380_v27 = vpop.f32.mrb[4].mxu0 }
 0x77f   : > { %v8404_v3 = vadd.f32 %v8403_v23, %v8402_v22  ;;  %v8405_v29 = vpop.f32.mrb[14].mxu1  ;;  %v8381_v32 = vpop.f32.mrb[5].mxu0 }
 0x780   : > { %v8406_v30 = vpop.f32.mrb[15].mxu1  ;;  %v8382_v26 = vadd.f32 %v8381_v32, %v8380_v27  ;;  %v8383_v33 = vpop.f32.mrb[6].mxu0 }
 0x781   : > { %v8384_v62 = vpop.f32.mrb[7].mxu0 }
 0x782   : > { %v6933_v35 = vadd.f32 %v8382_v26, %v6129_v31 }
 0x784   : > { %v6973_v63 = vadd.f32 %v8404_v3, %v6933_v35 }
 0x79d   : > { %v8446_v44 = vpop.f32.mrb[16].mxu1 }
 0x79e   : > { %v8447_v40 = vpop.f32.mrb[17].mxu1 }
 0x79f   : > { %v8424_v37 = vpop.f32.mrb[8].mxu0  ;;  %v8448_v36 = vadd.f32 %v8447_v40, %v8446_v44  ;;  %v8449_v38 = vpop.f32.mrb[18].mxu1 }
 0x7a0   : > { %v8425_v13 = vpop.f32.mrb[9].mxu0  ;;  %v8450_v52 = vpop.f32.mrb[19].mxu1 }
 0x7a1   : > { %v8426_v49 = vadd.f32 %v8425_v13, %v8424_v37  ;;  %v8427_v39 = vpop.f32.mrb[10].mxu0 }
 0x7a2   : > { %v8428_v45 = vpop.f32.mrb[11].mxu0 }
 0x7a3   : > { %v7013_v47 = vadd.f32 %v8426_v49, %v6973_v63 }
 0x7a5   : > { %v7053_v19 = vadd.f32 %v8448_v36, %v7013_v47 }
 0x7bd   : > { %v8490_v41 = vpop.f32.mrb[20].mxu1 }
 0x7be   : > { %v8491_v15 = vpop.f32.mrb[21].mxu1 }
 0x7bf   : > { %v8468_v42 = vpop.f32.mrb[12].mxu0  ;;  %v8492_v43 = vadd.f32 %v8491_v15, %v8490_v41  ;;  %v8493_v51 = vpop.f32.mrb[22].mxu1 }
 0x7c0   : > { %v8469_v57 = vpop.f32.mrb[13].mxu0  ;;  %v8494_v53 = vpop.f32.mrb[23].mxu1 }
 0x7c1   : > { %v8470_v18 = vadd.f32 %v8469_v57, %v8468_v42  ;;  %v8471_v54 = vpop.f32.mrb[14].mxu0 }
 0x7c2   : > { %v8472_v58 = vpop.f32.mrb[15].mxu0 }
 0x7c3   : > { %v7093_v2 = vadd.f32 %v8470_v18, %v7053_v19 }
 0x7c5   : > { %v7133_v6 = vadd.f32 %v8492_v43, %v7093_v2 }
 0x7dd   : > { %v8534_v7 = vpop.f32.mrb[24].mxu1 }
 0x7de   : > { %v8535_v8 = vpop.f32.mrb[25].mxu1 }
 0x7df   : > { %v8512_v24 = vpop.f32.mrb[16].mxu0  ;;  %v8536_v60 = vadd.f32 %v8535_v8, %v8534_v7  ;;  %v8537_v34 = vpop.f32.mrb[26].mxu1 }
 0x7e0   : > { %v8513_v1 = vpop.f32.mrb[17].mxu0  ;;  %v8538_v4 = vpop.f32.mrb[27].mxu1 }
 0x7e1   : > { %v8514_v50 = vadd.f32 %v8513_v1, %v8512_v24  ;;  %v8515_v46 = vpop.f32.mrb[18].mxu0 }
 0x7e2   : > { %v8516_v0 = vpop.f32.mrb[19].mxu0 }
 0x7e3   : > { %v7173_v56 = vadd.f32 %v8514_v50, %v7133_v6 }
 0x7e5   : > { %v7213_v5 = vadd.f32 %v8536_v60, %v7173_v56 }
 0x7e7   : > { %v7218_v59 = vmax.f32 %v7213_v5, 0.0 }
 0x7e9   : > { %v7219_v48 = vpack.c.bf16 %v7218_v59, %v7218_v59 }
 0x7eb   : > { %8566 = vmatmul.mubr.bf16.vlgmr.msra.gmra.mrb[20].mxu0 %v7219_v48 }
 0x8be   : > { %v7319_v20 = vpop.f32.mrb[20].mxu0 }
 0x8bf   : > { %v7320_v55 = vadd.f32 %v7319_v20, %v7236_v25  ;;  %v8567_v11 = vpop.f32.mrb[21].mxu0 }
 0x8c0   : > { %v7322_v61 = vpop.f32.mrb[22].mxu0 }
 0x8c1   : > { %v8568_v12 = vpop.f32.mrb[23].mxu0  ;;  %7326 = vst.msk [vmem:[%s457_s9] sm:$0x1] %vm7325_vm0, %v7320_v55 }
 0x8c2   : > { %10236 = shalt.err (!%p10233_p10)
}
 0x8c3   : > { %s10237_s28 = scalar_lea.hbm %s11092_s23, 16  ;;  %s10241_s22 = scalar_lea.hbm %s11177_s20, 32 }
 0x8c4   : > { %p10238_p11 = scmp.ne.s32.totalorder %s11092_s23, %s10237_s28  ;;  %p10242_p7 = scmp.lt.u32.totalorder %s11092_s23, %s11177_s20 }
 0x8c5   : > { %p10243_p6 = scmp.lt.u32.totalorder %s10241_s22, %s10237_s28  ;;  %p10245_p12 = scmp.lt.u32.totalorder %s10237_s28, %s11092_s23 }
 0x8c6   : > { %p10239_p0 = pnand %p10238_p11, %p11178_p13 }
 0x8c7   : > { %p10244_p9 = por %p10243_p6, %p10242_p7 }
 0x8c8   : > { %p10240_p5 = pneg %p10239_p0 }
 0x8c9   : > { %p10246_p1 = por %p10245_p12, %p10244_p9 }
 0x8cb   : > { %p10247_p3 = pnand %p10246_p1, %p10240_p5 }
 0x8cd   : > { %10250 = shalt.err (!%p10247_p3)
}
 0x8ce   : > { %8675 = dma.vmem_to_hbm [thread:$0]  (%p11178_p13), %s11094_s1, 16, %s11092_s23, %s7328_s15  }
 0x8cf PF: > { %s7352_s24 = sand.u32 1, %s10293_s30   ;;  %p11179_p2 = scmp.ne.s32.totalorder %s11162_s17, 0 }
 0x8d0   : > { %p11180_p8 = scmp.ge.s32.totalorder %s10305_s12, 2  ;;  %s7353_s18 = scalar_lea.sflag [#allocation4], %s7352_s24 }
 0x8d2   : > { %p8707_p4 = pnand %p11180_p8, %p11179_p2 }
 0x8d4   : > { %10288 = dma.done.wait (!%p8707_p4), %s7353_s18, 16  }
 0x8d5   : > { %10290 = vsyncadd (!%p8707_p4), %s7353_s18, 4294967280  ;;  %p26_p10 = scmp.ge.s32.totalorder %s10594_s19, 4   ;;  %s11181_s30 = smov %s10297_s10 }
 0x8d6   : > { %s11182_s10 = smov %s10301_s11  ;;  %s11183_s11 = smov %s10605_s26 }
 0x8d7   : > { %s11184_s12 = smov %s10594_s19  ;;  %28 = sbr.rel (!%p26_p10) target bundleno = 13 (0xd), region = 137 }
 0x8de   :  { %7357 = vsyncpa [#allocation3], 1 }
 0x8df   :  { %7359 = vsyncpa [#allocation3 + $0x1], 1 }
 0x8e0   :  { %7360 = vsyncpa [#allocation6], 1 }
 0x8e1   :  { %7361 = vsyncpa [#allocation9], 1 }
 0x8e2   :  { %7362 = vsyncpa [#allocation12], 1 }
 0x8e3   :  { %7363 = vsyncpa [#allocation15], 1 }
 0x8e4   :  { %7364 = vsyncpa [#allocation4], 1 }
 0x8e5   :  { %7366 = vsyncpa [#allocation4 + $0x1], 1 }

</bundles_post_ra>
